<compile_context>
chip_gen: v5e
topology: v5e:2x2
jax: 0.10.0
libtpu: 0.0.40
codegen_flags: <defaults>
</compile_context>

<pallas_src>
import functools
import math

import jax
import jax.numpy as jnp
import numpy as np
from jax import lax
from jax.experimental import pallas as pl
from jax.experimental.pallas import tpu as pltpu


def _vmem_capacity_bytes():
    """Physical VMEM of the local TPU generation (fallback: v7x's 64 MiB/TC)."""
    try:
        return int(pltpu.get_tpu_info().vmem_capacity_bytes)
    except Exception:
        return 64 * 1024 * 1024


def _supports_bf16_eup():
    """bf16 transcendentals exist on v6e/v7x but not on v5e and older."""
    try:
        kind = jax.devices()[0].device_kind.lower()
    except Exception:
        return False
    return ("v6" in kind) or ("v7" in kind) or ("7x" in kind)


def _pick_query_tile(n, c, kv_itemsize, kv_buffers, vmem_limit_bytes):
    """Largest tile <= 512 dividing N whose live footprint (resident K/V slab +
    one head's (tq, N) softmax intermediates + double-buffered output) stays
    under ~half the scoped VMEM limit — generation-aware via the limit."""
    slab_bytes = kv_buffers * n * c * kv_itemsize
    budget = max(vmem_limit_bytes // 2 - slab_bytes, 512 * 1024)
    per_row = 12 * n + 16 * c          # att/z f32 + e, 2x out block f32, acc f32
    cap = max(8, budget // per_row)
    for t in (512, 256, 128, 64, 32, 16, 8):
        if t <= cap and n % t == 0:
            return t
    return n                            # tiny / awkward N: single full tile


def _mha_fco_kernel(kv_ref, wt_ref, b_ref, o_ref, *, bf16_exp):
    """One (batch, query-tile) grid step: exact row softmax attention + fused fc_o.

    kv_ref : (1, h, N, d_k) bf16  all tokens of this batch element (head-major);
                                  queries/keys/values all come from this slab.
    wt_ref : (h, d_k, C)    bf16  fc_o weight, pre-transposed & split per head.
    b_ref  : (1, C)         f32   fc_o bias.
    o_ref  : (1, tq, C)     f32   output tokens of this query tile.
    """
    h, d_k = kv_ref.shape[1], kv_ref.shape[3]
    tq = o_ref.shape[1]
    c_out = wt_ref.shape[2]
    scale = 1.0 / math.sqrt(d_k)
    q_start = pl.multiple_of(pl.program_id(1) * tq, tq)

    def head_body(head, acc):
        # keys == values == this head's slice of the resident slab
        kh = kv_ref[0, head]                                        # (N, d_k)  bf16
        qh = kv_ref[0, head, pl.ds(q_start, tq), :]                 # (tq, d_k) bf16
        qh = (qh * scale).astype(kh.dtype)                          # fold 1/sqrt(d_k) into q

        # att = q @ k^T without an explicit transpose: contract the last axes.
        att = lax.dot_general(qh, kh, (((1,), (1,)), ((), ())),
                              preferred_element_type=jnp.float32)   # (tq, N) f32

        # Numerically stable softmax; normalization deferred past PV so the
        # reciprocal (EUP) multiplies a (tq, d_k) tensor, not the (tq, N) one.
        m = jnp.max(att, axis=-1, keepdims=True)
        z = att - m
        if bf16_exp:   # v6e/v7x: native bf16 EUP — halves exp cycles, no extra bf16 copy
            e = jnp.exp(z.astype(jnp.bfloat16))                     # (tq, N) bf16
            s = jnp.sum(e, axis=-1, keepdims=True, dtype=jnp.float32)
        else:          # v5e: no bf16 EUP — keep softmax math in f32
            e_f32 = jnp.exp(z)
            s = jnp.sum(e_f32, axis=-1, keepdims=True)
            e = e_f32.astype(jnp.bfloat16)
        inv_s = pl.reciprocal(s, approx=True)                       # EUP slot, ~free

        pv = jnp.dot(e, kh, preferred_element_type=jnp.float32)     # (tq, d_k) f32
        pv = (pv * inv_s).astype(jnp.bfloat16)

        # Fused fc_o contribution of this head: (tq, d_k) @ (d_k, C).  Kept
        # per-head so the fori_loop bounds the (tq, N) live ranges to one head;
        # total MACs equal the single (tq, C) @ (C, C) formulation.
        return acc + jnp.dot(pv, wt_ref[head], preferred_element_type=jnp.float32)

    acc = lax.fori_loop(0, h, head_body, jnp.zeros((tq, c_out), jnp.float32))

    # TODO(synk): nn.Dropout(0.1) on the attention map is eval-mode identity here
    # (train mode would need pltpu.prng_* + stochastic masking).
    o_ref[0] = (acc + b_ref[...]).astype(o_ref.dtype)


def self_correlation_computation1(x_nchw, fc_w, fc_b, *, h, tq=None, kv_buffer_count=1):
    """x_nchw: (B, C, H, W) float32. Returns (B, C, H, W) like the PyTorch module."""
    B, C, H, W = x_nchw.shape
    N = H * W
    assert C % h == 0
    d_k = C // h

    # glue: NCHW -> (B, N, C) -> head-major (B, h, N, d_k).  bf16 cast happens
    # HERE, once, so the kernel DMAs half the bytes and never re-casts the slab.
    x_bnc = jnp.transpose(x_nchw, (0, 2, 3, 1)).reshape(B, N, C)
    x_heads = x_bnc.reshape(B, N, h, d_k).transpose(0, 2, 1, 3).astype(jnp.bfloat16)

    # fc_o weight: pre-transpose ONCE to (C_in, C_out) and split C_in per head.
    wt_heads = jnp.transpose(fc_w).reshape(h, d_k, C).astype(jnp.bfloat16)
    fc_b2 = fc_b.reshape(1, C).astype(jnp.float32)

    # Generation-aware VMEM budget (v5e/v6e: 128 MiB physical, v7x: 64 MiB/TC).
    vmem_limit = min(int(_vmem_capacity_bytes() * 0.9), 100 * 1024 * 1024)
    kv_buffers = kv_buffer_count if kv_buffer_count else 2
    if tq is None:
        tq = _pick_query_tile(N, C, 2, kv_buffers, vmem_limit)
    assert N % tq == 0

    kernel = functools.partial(_mha_fco_kernel, bf16_exp=_supports_bf16_eup())

    # Single-buffer the K/V slab when requested: its index_map is constant in the
    # q axis, so double-buffering it only burns VMEM (matters most on v7x).
    kv_kwargs = {}
    if kv_buffer_count is not None and hasattr(pl, "Buffered"):
        kv_kwargs["pipeline_mode"] = pl.Buffered(kv_buffer_count)

    cost = pl.CostEstimate(
        flops=int(4 * B * N * N * C + 2 * B * N * C * C),
        transcendentals=int(B * h * N * N),
        bytes_accessed=int(B * N * C * (2 + 4) + h * d_k * C * 2 + C * 4),
    )

    out_bnc = pl.pallas_call(
        kernel,
        out_shape=jax.ShapeDtypeStruct((B, N, C), x_nchw.dtype),
        grid_spec=pltpu.PrefetchScalarGridSpec(
            num_scalar_prefetch=0,
            grid=(B, N // tq),
            in_specs=[
                # x passed ONCE, head-major: queries, keys and values all come
                # from this slab (constant in q => re-DMAed only when b changes).
                pl.BlockSpec((1, h, N, d_k), lambda b, q: (b, 0, 0, 0), **kv_kwargs),
                pl.BlockSpec((h, d_k, C), lambda b, q: (0, 0, 0)),   # fc_o W^T, per head
                pl.BlockSpec((1, C), lambda b, q: (0, 0)),           # fc_o bias
            ],
            out_specs=pl.BlockSpec((1, tq, C), lambda b, q: (b, q, 0)),
        ),
        compiler_params=pltpu.CompilerParams(
            dimension_semantics=("parallel", "parallel"),
            vmem_limit_bytes=vmem_limit),
        cost_estimate=cost,
    )(x_heads, wt_heads, fc_b2)

    # PyTorch does out.view(B, C, H, W): a raw reshape of the (B, N, C) buffer.
    return out_bnc.reshape(B, C, H, W)


def _reference(x_nchw, fc_w, fc_b, *, h):
    """Pure-JAX (f32) reference mirroring the PyTorch forward (eval mode)."""
    B, C, H, W = x_nchw.shape
    N = H * W
    d_k = C // h
    x = jnp.transpose(x_nchw, (0, 2, 3, 1)).reshape(B, N, C)
    q = x.reshape(B, N, h, d_k).transpose(0, 2, 1, 3)          # (B,h,N,dk)
    k = x.reshape(B, N, h, d_k).transpose(0, 2, 3, 1)          # (B,h,dk,N)
    v = x.reshape(B, N, h, d_k).transpose(0, 2, 1, 3)          # (B,h,N,dk)
    att = jnp.matmul(q, k) / np.sqrt(d_k)
    att = jax.nn.softmax(att, axis=-1)
    out = jnp.matmul(att, v).transpose(0, 2, 1, 3).reshape(B, N, h * d_k)
    out = out @ fc_w.T + fc_b
    return out.reshape(B, C, H, W)


if __name__ == "__main__":
    # small shapes consistent with the module: d_model = C = 4, h = 2
    B, C, H, W = 2, 4, 16, 16
    h = 2

    key = jax.random.PRNGKey(0)
    kx, kw = jax.random.split(key)
    x = jax.random.normal(kx, (B, C, H, W), dtype=jnp.float32)

    # Deterministic parameter init matching nn.Linear init in init_weights():
    #   weight ~ Normal(0, 0.001), bias = 0
    fc_w = 0.001 * jax.random.normal(kw, (C, C), dtype=jnp.float32)
    fc_b = jnp.zeros((C,), dtype=jnp.float32)

    try:
        out = jax.block_until_ready(self_correlation_computation1(x, fc_w, fc_b, h=h))
    except Exception:
        # pl.Buffered(1) single-buffering of the K/V slab is a perf-only knob;
        # fall back to default double-buffering if this build rejects it.
        out = jax.block_until_ready(
            self_correlation_computation1(x, fc_w, fc_b, h=h, kv_buffer_count=None))

    ref = _reference(x, fc_w, fc_b, h=h)
    # Tolerance accounts for bf16 MXU operands / bf16 exp + approx EUP reciprocal
    # (accumulation and softmax stats stay f32).
    np.testing.assert_allclose(np.asarray(out), np.asarray(ref),
                               rtol=2e-2, atol=1e-3)
    assert out.shape == (B, C, H, W)
    print("KERNEL_OK")
</pallas_src>

<mosaic_0001>
module attributes {stable_mosaic.version = 11 : i64} {
  func.func @_mha_fco_kernel(%arg0: i32, %arg1: i32, %arg2: memref<1x2x256x2xbf16, #tpu.memory_space<vmem>>, %arg3: memref<2x2x4xbf16, #tpu.memory_space<vmem>>, %arg4: memref<1x4xf32, #tpu.memory_space<vmem>>, %arg5: memref<1x256x4xf32, #tpu.memory_space<vmem>>) attributes {dimension_semantics = [#tpu.dimension_semantics<parallel>, #tpu.dimension_semantics<parallel>], iteration_bounds = array<i64: 2, 1>, scalar_prefetch = 0 : i64, scratch_operands = 0 : i64, tpu.core_type = #tpu.core_type<tc>, window_params = [{pipeline_mode = #tpu.pipeline_mode<synchronous>, transform_indices = @transform_0, window_bounds = array<i64: 1, 2, 256, 2>}, {pipeline_mode = #tpu.pipeline_mode<synchronous>, transform_indices = @transform_1, window_bounds = array<i64: 2, 2, 4>}, {pipeline_mode = #tpu.pipeline_mode<synchronous>, transform_indices = @transform_2, window_bounds = array<i64: 1, 4>}, {transform_indices = @transform_3, window_bounds = array<i64: 1, 256, 4>}]} {
    %c256_i32 = arith.constant 256 : i32
    %0 = arith.muli %arg1, %c256_i32 : i32
    %1 = tpu.assume_multiple %0, 256 : i32
    %cst = arith.constant 0.000000e+00 : f32
    %2 = vector.broadcast %cst : f32 to vector<256x4xf32>
    %c0_i32 = arith.constant 0 : i32
    %c2_i32 = arith.constant 2 : i32
    %3 = arith.addi %c0_i32, %c2_i32 : i32
    %c1_i32 = arith.constant 1 : i32
    %4 = scf.for %arg6 = %c0_i32 to %3 step %c1_i32 iter_args(%arg7 = %2) -> (vector<256x4xf32>)  : i32 {
      %c0_5 = arith.constant 0 : index
      %11 = arith.index_cast %arg6 : i32 to index
      %c0_6 = arith.constant 0 : index
      %c0_7 = arith.constant 0 : index
      %12 = vector.load %arg2[%c0_5, %11, %c0_6, %c0_7] : memref<1x2x256x2xbf16, #tpu.memory_space<vmem>>, vector<1x1x256x2xbf16>
      %13 = vector.shape_cast %12 : vector<1x1x256x2xbf16> to vector<256x2xbf16>
      %c0_8 = arith.constant 0 : index
      %14 = arith.index_cast %arg6 : i32 to index
      %15 = arith.index_cast %1 : i32 to index
      %c0_9 = arith.constant 0 : index
      %16 = vector.load %arg2[%c0_8, %14, %15, %c0_9] : memref<1x2x256x2xbf16, #tpu.memory_space<vmem>>, vector<1x1x256x2xbf16>
      %17 = vector.shape_cast %16 : vector<1x1x256x2xbf16> to vector<256x2xbf16>
      %cst_10 = arith.constant 7.070310e-01 : bf16
      %18 = vector.broadcast %cst_10 : bf16 to vector<256x2xbf16>
      %19 = arith.mulf %17, %18 : vector<256x2xbf16>
      %cst_11 = arith.constant dense<0.000000e+00> : vector<256x256xf32>
      %20 = tpu.matmul %19, %13, %cst_11 {dimension_numbers = #tpu.dot_dimension_numbers<[1], [1], [0], [0], [0, 0, 1, 0], [], []>} : vector<256x2xbf16>, vector<256x2xbf16>, vector<256x256xf32> -> vector<256x256xf32>
      %cst_12 = arith.constant dense<0xFF800000> : vector<256xf32>
      %21 = vector.multi_reduction <maximumf>, %20, %cst_12 [1] : vector<256x256xf32> to vector<256xf32>
      %22 = vector.shape_cast %21 : vector<256xf32> to vector<256x1xf32>
      %23 = vector.broadcast %22 : vector<256x1xf32> to vector<256x256xf32>
      %24 = arith.subf %20, %23 : vector<256x256xf32>
      %25 = math.exp %24 : vector<256x256xf32>
      %cst_13 = arith.constant dense<0.000000e+00> : vector<256xf32>
      %26 = vector.multi_reduction <add>, %25, %cst_13 [1] : vector<256x256xf32> to vector<256xf32>
      %27 = vector.shape_cast %26 : vector<256xf32> to vector<256x1xf32>
      %28 = arith.truncf %25 : vector<256x256xf32> to vector<256x256xbf16>
      %29 = tpu.reciprocal %27 {approx = true} : vector<256x1xf32> -> vector<256x1xf32>
      %cst_14 = arith.constant dense<0.000000e+00> : vector<256x2xf32>
      %30 = tpu.matmul %28, %13, %cst_14 {dimension_numbers = #tpu.dot_dimension_numbers<[1], [0], [0], [1], [0, 0, 1, 1], [], []>} : vector<256x256xbf16>, vector<256x2xbf16>, vector<256x2xf32> -> vector<256x2xf32>
      %31 = vector.broadcast %29 : vector<256x1xf32> to vector<256x2xf32>
      %32 = arith.mulf %30, %31 : vector<256x2xf32>
      %33 = arith.truncf %32 : vector<256x2xf32> to vector<256x2xbf16>
      %34 = arith.index_cast %arg6 : i32 to index
      %c0_15 = arith.constant 0 : index
      %c0_16 = arith.constant 0 : index
      %35 = vector.load %arg3[%34, %c0_15, %c0_16] : memref<2x2x4xbf16, #tpu.memory_space<vmem>>, vector<1x2x4xbf16>
      %36 = vector.shape_cast %35 : vector<1x2x4xbf16> to vector<2x4xbf16>
      %cst_17 = arith.constant dense<0.000000e+00> : vector<256x4xf32>
      %37 = tpu.matmul %33, %36, %cst_17 {dimension_numbers = #tpu.dot_dimension_numbers<[1], [0], [0], [1], [0, 0, 1, 1], [], []>} : vector<256x2xbf16>, vector<2x4xbf16>, vector<256x4xf32> -> vector<256x4xf32>
      %38 = arith.addf %arg7, %37 : vector<256x4xf32>
      scf.yield %38 : vector<256x4xf32>
    }
    %c2_i32_0 = arith.constant 2 : i32
    %c0 = arith.constant 0 : index
    %c0_1 = arith.constant 0 : index
    %5 = vector.load %arg4[%c0, %c0_1] : memref<1x4xf32, #tpu.memory_space<vmem>>, vector<1x4xf32>
    %6 = vector.broadcast %5 : vector<1x4xf32> to vector<256x4xf32>
    %7 = arith.addf %4, %6 : vector<256x4xf32>
    %c0_2 = arith.constant 0 : index
    %c0_3 = arith.constant 0 : index
    %c0_4 = arith.constant 0 : index
    %8 = vector.load %arg5[%c0_2, %c0_3, %c0_4] : memref<1x256x4xf32, #tpu.memory_space<vmem>>, vector<1x256x4xf32>
    %9 = vector.shape_cast %8 : vector<1x256x4xf32> to vector<256x4xf32>
    %10 = vector.shape_cast %7 : vector<256x4xf32> to vector<1x256x4xf32>
    tpu.vector_store %arg5[%c0_2, %c0_3, %c0_4], %10 {strides = array<i32>} : memref<1x256x4xf32, #tpu.memory_space<vmem>>, vector<1x256x4xf32>,
    return
  }
  func.func @transform_0(%arg0: i32, %arg1: i32) -> (i32, i32, i32, i32) {
    %c0_i32 = arith.constant 0 : i32
    %c0_i32_0 = arith.constant 0 : i32
    %c0_i32_1 = arith.constant 0 : i32
    %c0_i32_2 = arith.constant 0 : i32
    return %arg0, %c0_i32, %c0_i32_0, %c0_i32_1 : i32, i32, i32, i32
  }
  func.func @transform_1(%arg0: i32, %arg1: i32) -> (i32, i32, i32) {
    %c0_i32 = arith.constant 0 : i32
    %c0_i32_0 = arith.constant 0 : i32
    %c0_i32_1 = arith.constant 0 : i32
    %c0_i32_2 = arith.constant 0 : i32
    return %c0_i32, %c0_i32_0, %c0_i32_1 : i32, i32, i32
  }
  func.func @transform_2(%arg0: i32, %arg1: i32) -> (i32, i32) {
    %c0_i32 = arith.constant 0 : i32
    %c0_i32_0 = arith.constant 0 : i32
    %c0_i32_1 = arith.constant 0 : i32
    return %c0_i32, %c0_i32_0 : i32, i32
  }
  func.func @transform_3(%arg0: i32, %arg1: i32) -> (i32, i32, i32) {
    %c0_i32 = arith.constant 0 : i32
    %c0_i32_0 = arith.constant 0 : i32
    return %arg0, %arg1, %c0_i32 : i32, i32, i32
  }
}

module attributes {stable_mosaic.version = 11 : i64} {
  func.func @_mha_fco_kernel(%arg0: i32, %arg1: i32, %arg2: memref<1x2x256x2xbf16, #tpu.memory_space<vmem>>, %arg3: memref<2x2x4xbf16, #tpu.memory_space<vmem>>, %arg4: memref<1x4xf32, #tpu.memory_space<vmem>>, %arg5: memref<1x256x4xf32, #tpu.memory_space<vmem>>) attributes {dimension_semantics = [#tpu.dimension_semantics<parallel>, #tpu.dimension_semantics<parallel>], iteration_bounds = array<i64: 2, 1>, scalar_prefetch = 0 : i64, scratch_operands = 0 : i64, tpu.core_type = #tpu.core_type<tc>, window_params = [{transform_indices = @transform_0, window_bounds = array<i64: 1, 2, 256, 2>}, {pipeline_mode = #tpu.pipeline_mode<synchronous>, transform_indices = @transform_1, window_bounds = array<i64: 2, 2, 4>}, {pipeline_mode = #tpu.pipeline_mode<synchronous>, transform_indices = @transform_2, window_bounds = array<i64: 1, 4>}, {transform_indices = @transform_3, window_bounds = array<i64: 1, 256, 4>}]} {
    %c256_i32 = arith.constant 256 : i32
    %0 = arith.muli %arg1, %c256_i32 : i32
    %1 = tpu.assume_multiple %0, 256 : i32
    %cst = arith.constant 0.000000e+00 : f32
    %2 = vector.broadcast %cst : f32 to vector<256x4xf32>
    %c0_i32 = arith.constant 0 : i32
    %c2_i32 = arith.constant 2 : i32
    %3 = arith.addi %c0_i32, %c2_i32 : i32
    %c1_i32 = arith.constant 1 : i32
    %4 = scf.for %arg6 = %c0_i32 to %3 step %c1_i32 iter_args(%arg7 = %2) -> (vector<256x4xf32>)  : i32 {
      %c0_5 = arith.constant 0 : index
      %11 = arith.index_cast %arg6 : i32 to index
      %c0_6 = arith.constant 0 : index
      %c0_7 = arith.constant 0 : index
      %12 = vector.load %arg2[%c0_5, %11, %c0_6, %c0_7] : memref<1x2x256x2xbf16, #tpu.memory_space<vmem>>, vector<1x1x256x2xbf16>
      %13 = vector.shape_cast %12 : vector<1x1x256x2xbf16> to vector<256x2xbf16>
      %c0_8 = arith.constant 0 : index
      %14 = arith.index_cast %arg6 : i32 to index
      %15 = arith.index_cast %1 : i32 to index
      %c0_9 = arith.constant 0 : index
      %16 = vector.load %arg2[%c0_8, %14, %15, %c0_9] : memref<1x2x256x2xbf16, #tpu.memory_space<vmem>>, vector<1x1x256x2xbf16>
      %17 = vector.shape_cast %16 : vector<1x1x256x2xbf16> to vector<256x2xbf16>
      %cst_10 = arith.constant 7.070310e-01 : bf16
      %18 = vector.broadcast %cst_10 : bf16 to vector<256x2xbf16>
      %19 = arith.mulf %17, %18 : vector<256x2xbf16>
      %cst_11 = arith.constant dense<0.000000e+00> : vector<256x256xf32>
      %20 = tpu.matmul %19, %13, %cst_11 {dimension_numbers = #tpu.dot_dimension_numbers<[1], [1], [0], [0], [0, 0, 1, 0], [], []>} : vector<256x2xbf16>, vector<256x2xbf16>, vector<256x256xf32> -> vector<256x256xf32>
      %cst_12 = arith.constant dense<0xFF800000> : vector<256xf32>
      %21 = vector.multi_reduction <maximumf>, %20, %cst_12 [1] : vector<256x256xf32> to vector<256xf32>
      %22 = vector.shape_cast %21 : vector<256xf32> to vector<256x1xf32>
      %23 = vector.broadcast %22 : vector<256x1xf32> to vector<256x256xf32>
      %24 = arith.subf %20, %23 : vector<256x256xf32>
      %25 = math.exp %24 : vector<256x256xf32>
      %cst_13 = arith.constant dense<0.000000e+00> : vector<256xf32>
      %26 = vector.multi_reduction <add>, %25, %cst_13 [1] : vector<256x256xf32> to vector<256xf32>
      %27 = vector.shape_cast %26 : vector<256xf32> to vector<256x1xf32>
      %28 = arith.truncf %25 : vector<256x256xf32> to vector<256x256xbf16>
      %29 = tpu.reciprocal %27 {approx = true} : vector<256x1xf32> -> vector<256x1xf32>
      %cst_14 = arith.constant dense<0.000000e+00> : vector<256x2xf32>
      %30 = tpu.matmul %28, %13, %cst_14 {dimension_numbers = #tpu.dot_dimension_numbers<[1], [0], [0], [1], [0, 0, 1, 1], [], []>} : vector<256x256xbf16>, vector<256x2xbf16>, vector<256x2xf32> -> vector<256x2xf32>
      %31 = vector.broadcast %29 : vector<256x1xf32> to vector<256x2xf32>
      %32 = arith.mulf %30, %31 : vector<256x2xf32>
      %33 = arith.truncf %32 : vector<256x2xf32> to vector<256x2xbf16>
      %34 = arith.index_cast %arg6 : i32 to index
      %c0_15 = arith.constant 0 : index
      %c0_16 = arith.constant 0 : index
      %35 = vector.load %arg3[%34, %c0_15, %c0_16] : memref<2x2x4xbf16, #tpu.memory_space<vmem>>, vector<1x2x4xbf16>
      %36 = vector.shape_cast %35 : vector<1x2x4xbf16> to vector<2x4xbf16>
      %cst_17 = arith.constant dense<0.000000e+00> : vector<256x4xf32>
      %37 = tpu.matmul %33, %36, %cst_17 {dimension_numbers = #tpu.dot_dimension_numbers<[1], [0], [0], [1], [0, 0, 1, 1], [], []>} : vector<256x2xbf16>, vector<2x4xbf16>, vector<256x4xf32> -> vector<256x4xf32>
      %38 = arith.addf %arg7, %37 : vector<256x4xf32>
      scf.yield %38 : vector<256x4xf32>
    }
    %c2_i32_0 = arith.constant 2 : i32
    %c0 = arith.constant 0 : index
    %c0_1 = arith.constant 0 : index
    %5 = vector.load %arg4[%c0, %c0_1] : memref<1x4xf32, #tpu.memory_space<vmem>>, vector<1x4xf32>
    %6 = vector.broadcast %5 : vector<1x4xf32> to vector<256x4xf32>
    %7 = arith.addf %4, %6 : vector<256x4xf32>
    %c0_2 = arith.constant 0 : index
    %c0_3 = arith.constant 0 : index
    %c0_4 = arith.constant 0 : index
    %8 = vector.load %arg5[%c0_2, %c0_3, %c0_4] : memref<1x256x4xf32, #tpu.memory_space<vmem>>, vector<1x256x4xf32>
    %9 = vector.shape_cast %8 : vector<1x256x4xf32> to vector<256x4xf32>
    %10 = vector.shape_cast %7 : vector<256x4xf32> to vector<1x256x4xf32>
    tpu.vector_store %arg5[%c0_2, %c0_3, %c0_4], %10 {strides = array<i32>} : memref<1x256x4xf32, #tpu.memory_space<vmem>>, vector<1x256x4xf32>,
    return
  }
  func.func @transform_0(%arg0: i32, %arg1: i32) -> (i32, i32, i32, i32) {
    %c0_i32 = arith.constant 0 : i32
    %c0_i32_0 = arith.constant 0 : i32
    %c0_i32_1 = arith.constant 0 : i32
    %c0_i32_2 = arith.constant 0 : i32
    return %arg0, %c0_i32, %c0_i32_0, %c0_i32_1 : i32, i32, i32, i32
  }
  func.func @transform_1(%arg0: i32, %arg1: i32) -> (i32, i32, i32) {
    %c0_i32 = arith.constant 0 : i32
    %c0_i32_0 = arith.constant 0 : i32
    %c0_i32_1 = arith.constant 0 : i32
    %c0_i32_2 = arith.constant 0 : i32
    return %c0_i32, %c0_i32_0, %c0_i32_1 : i32, i32, i32
  }
  func.func @transform_2(%arg0: i32, %arg1: i32) -> (i32, i32) {
    %c0_i32 = arith.constant 0 : i32
    %c0_i32_0 = arith.constant 0 : i32
    %c0_i32_1 = arith.constant 0 : i32
    return %c0_i32, %c0_i32_0 : i32, i32
  }
  func.func @transform_3(%arg0: i32, %arg1: i32) -> (i32, i32, i32) {
    %c0_i32 = arith.constant 0 : i32
    %c0_i32_0 = arith.constant 0 : i32
    return %arg0, %arg1, %c0_i32 : i32, i32, i32
  }
}

</mosaic_0001>

<bundles_post_ra>
// kernel: tpu_custom_call.1
= control target key start
LH: loop header
LB: loop body
LE: loop exit
PB: predicated region body
PF: predicated region fallthrough
CT: control target
= control target key end

     0   :  { %s2904_s12 = smov 0   ;;  %s2906_s13 = smov 0   ;;  %s4076_s0 = inlined_call_operand.vmem [shape: bf16[2,2,256,2], index: 0, kind: input, shape index: {}]   ;;  %s4077_s1 = inlined_call_operand.vmem [shape: bf16[2,2,4], index: 1, kind: input, shape index: {}]   ;;  %s4078_s2 = inlined_call_operand.vmem [shape: f32[1,4], index: 2, kind: input, shape index: {}]   ;;  %s4079_s3 = inlined_call_operand.vmem [shape: f32[2,256,4], index: 3, kind: output, shape index: {}]  }
   0x1   :  { %s2908_s14 = smov 0  }
   0x2 LB: > { %s25_s15 = sadd.s32 1, %s2746_s13  ;;  %p1870_p0 = scmp.ge.s32.totalorder %s2750_s14, 1  ;;  %s2750_s14 = sphi %s2908_s14, %s13_s14   ;;  %s2746_s13 = sphi %s2906_s13, %s4283_s13   ;;  %s2742_s12 = sphi %s2904_s12, %s4282_s12  }
   0x3   : > { %p27_p1 = scmp.ge.s32.totalorder %s25_s15, 2  ;;  %p151_p2 = scmp.lt.s32.totalorder %s2750_s14, 3 }
   0x5   : > { %s4285_s15 = smov (%p27_p1, %s25_s15), 0  ;;  %p152_p3 = pnand %p1870_p0, %p151_p2 }
   0x7   : > { %155 = sbr.rel (%p152_p3) target bundleno = 1160 (0x488), region = 32 }
   0xc   : > { %p179_p4 = scmp.lt.s32.totalorder %s2742_s12, 1  ;;  %v2932_v0 = vmov 0.0   ;;  %v2934_v1 = vmov 0.0   ;;  %v2936_v2 = vmov 0.0   ;;  %v2938_v3 = vmov 0.0   ;;  %s2996_s23 = smov 0  }
   0xd   : > { %v2940_v4 = vmov 0.0   ;;  %v2942_v5 = vmov 0.0   ;;  %v2944_v6 = vmov 0.0   ;;  %v2946_v7 = vmov 0.0  }
   0xe   : > { %s4287_s12 = smov (!%p179_p4, %s2742_s12), 1  ;;  %v2948_v8 = vmov 0.0   ;;  %v2950_v9 = vmov 0.0   ;;  %v2952_v10 = vmov 0.0   ;;  %v2954_v11 = vmov 0.0  }
   0xf   : > { %s1992_s16 = sshll.u32 %s4287_s12, 8  ;;  %v2956_v12 = vmov 0.0   ;;  %v2958_v13 = vmov 0.0   ;;  %v2960_v14 = vmov 0.0   ;;  %v2962_v15 = vmov 0.0  }
  0x10   : > { %s2925_s19 = scalar_lea.vmem %s4076_s0, %s1992_s16  ;;  %s2930_s22 = scalar_lea.vmem %s4079_s3, %s1992_s16  ;;  %v2964_v16 = vmov 0.0   ;;  %v2966_v17 = vmov 0.0   ;;  %v2968_v18 = vmov 0.0   ;;  %v2970_v19 = vmov 0.0  }
  0x11   : > { %v2972_v20 = vmov 0.0   ;;  %v2974_v21 = vmov 0.0   ;;  %v2976_v22 = vmov 0.0   ;;  %v2978_v23 = vmov 0.0  }
  0x12   : > { %v2980_v24 = vmov 0.0   ;;  %v2982_v25 = vmov 0.0   ;;  %v2984_v26 = vmov 0.0   ;;  %v2986_v27 = vmov 0.0  }
  0x13   : > { %v2988_v28 = vmov 0.0   ;;  %v2990_v29 = vmov 0.0   ;;  %v2992_v30 = vmov 0.0   ;;  %v2994_v31 = vmov 0.0  }
  0x14 LB: >> { %4100 = vst [vmem:[#allocation2_spill] sm:$0xff] %v2754_v0  ;;  %s1994_s24 = sshll.u32 %s2882_s23, 7  ;;  %vm466_vm0 = vcmask 15360   ;;  %s1431_s28 = scalar_lea.vmem %s4077_s1, %s2882_s23  ;;  %vm1481_vm1 = vcmask 1040384   ;;  %s2882_s23 = sphi %s2996_s23, %s4277_s23   ;;  %v2878_v31 = vphi %v2994_v31, %v4276_v31   ;;  %v2874_v30 = vphi %v2992_v30, %v4275_v30   ;;  %v2870_v29 = vphi %v2990_v29, %v4274_v29   ;;  %v2866_v28 = vphi %v2988_v28, %v4273_v28   ;;  %v2862_v27 = vphi %v2986_v27, %v4272_v27   ;;  %v2858_v26 = vphi %v2984_v26, %v4271_v26   ;;  %v2854_v25 = vphi %v2982_v25, %v4270_v25   ;;  %v2850_v24 = vphi %v2980_v24, %v4269_v24   ;;  %v2846_v23 = vphi %v2978_v23, %v4268_v23   ;;  %v2842_v22 = vphi %v2976_v22, %v4267_v22   ;;  %v2838_v21 = vphi %v2974_v21, %v4266_v21   ;;  %v2834_v20 = vphi %v2972_v20, %v4265_v20   ;;  %v2830_v19 = vphi %v2970_v19, %v4264_v19   ;;  %v2826_v18 = vphi %v2968_v18, %v4263_v18   ;;  %v2822_v17 = vphi %v2966_v17, %v4262_v17   ;;  %v2818_v16 = vphi %v2964_v16, %v4261_v16   ;;  %v2814_v15 = vphi %v2962_v15, %v4260_v15   ;;  %v2810_v14 = vphi %v2960_v14, %v4259_v14   ;;  %v2806_v13 = vphi %v2958_v13, %v4258_v13   ;;  %v2802_v12 = vphi %v2956_v12, %v4257_v12   ;;  %v2798_v11 = vphi %v2954_v11, %v4256_v11   ;;  %v2794_v10 = vphi %v2952_v10, %v4255_v10   ;;  %v2790_v9 = vphi %v2950_v9, %v4254_v9   ;;  %v2786_v8 = vphi %v2948_v8, %v4253_v8   ;;  %v2782_v7 = vphi %v2946_v7, %v4252_v7   ;;  %v2778_v6 = vphi %v2944_v6, %v4251_v6   ;;  %v2774_v5 = vphi %v2942_v5, %v4250_v5   ;;  %v2770_v4 = vphi %v2940_v4, %v4249_v4   ;;  %v2766_v3 = vphi %v2938_v3, %v4248_v3   ;;  %v2762_v2 = vphi %v2936_v2, %v4247_v2   ;;  %v2758_v1 = vphi %v2934_v1, %v4245_v1   ;;  %v2754_v0 = vphi %v2932_v0, %v4243_v0  }
  0x15   : >> { %4101 = vst [vmem:[#allocation3_spill] sm:$0xff] %v2758_v1  ;;  %s3099_s25 = scalar_lea.vmem %s2925_s19, %s1994_s24  ;;  %s201_s29 = sadd.s32 1, %s2882_s23  }
  0x16   : >> { %4102 = vst [vmem:[#allocation4_spill] sm:$0xff] %v2762_v2  ;;  %v3102_v32 = vld [vmem:[%s3099_s25 + $0x38] sm:$0xff]  ;;  %v3111_v36 = vld [vmem:[%s3099_s25 + $0x30] sm:$0xff]  ;;  %v3120_v40 = vld [vmem:[%s3099_s25 + $0x28] sm:$0xff]  ;;  %p3862_p5 = scmp.ge.s32.totalorder %s201_s29, 2   ;;  %s4277_s23 = smov %s201_s29 }
  0x17   : >> { %4103 = vst [vmem:[#allocation5_spill] sm:$0xff] %v2766_v3  ;;  %v2010_v33 = vld [vmem:[%s3099_s25 + $0x78] sm:$0xff]  ;;  %v537_v34 = vsel %vm466_vm0, %v3102_v32, 0  ;;  %2093 = vmatpush.bf16.msra.mxu3 %v3102_v32  ;;  %2092 = vmatpush.bf16.msra.mxu2 %v3102_v32  ;;  %v2009_v37 = vld [vmem:[%s3099_s25 + $0x70] sm:$0xff]  ;;  %v534_v38 = vsel %vm466_vm0, %v3111_v36, 0  ;;  %v2008_v41 = vld [vmem:[%s3099_s25 + $0x68] sm:$0xff] }
  0x18   : >> { %4104 = vst [vmem:[#allocation6_spill] sm:$0xff] %v2770_v4  ;;  %v561_v35 = vsel %vm466_vm0, %v2010_v33, 0  ;;  %563 = vmatpush.bf16.xpose.msra.mxu0 %v537_v34  ;;  %v558_v39 = vsel %vm466_vm0, %v2009_v37, 0  ;;  %v3126_v42 = vld [vmem:[%s3099_s25 + $0x20] sm:$0xff]  ;;  %v531_v43 = vsel %vm466_vm0, %v3120_v40, 0  ;;  %v555_v44 = vsel %vm466_vm0, %v2008_v41, 0 }
  0x19   : >> { %4105 = vst [vmem:[#allocation7_spill] sm:$0xff] %v2774_v5  ;;  %652 = vmatpush.bf16.xpose.msra.mxu1 %v561_v35  ;;  %v3134_v45 = vld [vmem:[%s3099_s25 + $0x18] sm:$0xff]  ;;  %v2007_v46 = vld [vmem:[%s3099_s25 + $0x60] sm:$0xff]  ;;  %v3140_v47 = vld [vmem:[%s3099_s25 + $0x10] sm:$0xff]  ;;  %v528_v48 = vsel %vm466_vm0, %v3126_v42, 0  ;;  %vm1642_vm2 = vcmask (%p3862_p5), 31744  }
  0x1a   : >> { %4106 = vst [vmem:[#allocation8_spill] sm:$0xff] %v2778_v6  ;;  %v552_v49 = vsel %vm466_vm0, %v2007_v46, 0  ;;  %v3148_v50 = vld [vmem:[%s3099_s25 + $0x8] sm:$0xff]  ;;  %v2006_v51 = vld [vmem:[%s3099_s25 + $0x58] sm:$0xff]  ;;  %v3154_v52 = vld [vmem:[%s3099_s25] sm:$0xff]  ;;  %v525_v53 = vsel %vm466_vm0, %v3134_v45, 0 }
  0x1b   : >> { %4107 = vst [vmem:[#allocation9_spill] sm:$0xff] %v2782_v7  ;;  %2096 = vmatpush.bf16.msra.mxu3 %v3111_v36  ;;  %2095 = vmatpush.bf16.msra.mxu2 %v3111_v36  ;;  %v549_v54 = vsel %vm466_vm0, %v2006_v51, 0  ;;  %v2005_v55 = vld [vmem:[%s3099_s25 + $0x50] sm:$0xff]  ;;  %v522_v56 = vsel %vm466_vm0, %v3140_v47, 0  ;;  %v2004_v58 = vld [vmem:[%s3099_s25 + $0x48] sm:$0xff]  ;;  %v519_v59 = vsel %vm466_vm0, %v3148_v50, 0 }
  0x1c   : >> { %4108 = vst [vmem:[#allocation10_spill] sm:$0xff] %v2786_v8  ;;  %v546_v57 = vsel %vm466_vm0, %v2005_v55, 0  ;;  %v543_v60 = vsel %vm466_vm0, %v2004_v58, 0  ;;  %v2013_v61 = vld [vmem:[%s3099_s25] sm:$0xff]   ;;  %v516_v34 = vsel %vm466_vm0, %v3154_v52, 0  ;;  %v2090_v1 = vld [vmem:[%s3099_s25 + $0x78] sm:$0xff]  }
  0x1d   : >> { %4109 = vst [vmem:[#allocation11_spill] sm:$0xff] %v2790_v9  ;;  %v2003_v62 = vld [vmem:[%s3099_s25 + $0x40] sm:$0xff]  ;;  %v2014_v63 = vunpack.c.l.bf16 %v2013_v61  ;;  %v2075_v2 = vunpack.c.h.bf16 %v2090_v1 }
  0x1e   : >> { %4110 = vst [vmem:[#allocation12_spill] sm:$0xff] %v2794_v10  ;;  %v540_v35 = vsel %vm466_vm0, %v2003_v62, 0 }
  0x1f   : >> { %4111 = vst [vmem:[#allocation13_spill] sm:$0xff] %v2798_v11  ;;  %2099 = vmatpush.bf16.msra.mxu3 %v3120_v40  ;;  %2098 = vmatpush.bf16.msra.mxu2 %v3120_v40  ;;  %v369_v5 = vmul.f32 0.70703125, %v2075_v2 }
  0x20   : >> { %4112 = vst [vmem:[#allocation14_spill] sm:$0xff] %v2802_v12  ;;  %564 = vmatpush.bf16.xpose.msra.mxu0 %v534_v38 }
  0x21   : >> { %4113 = vst [vmem:[#allocation15_spill] sm:$0xff] %v2806_v13  ;;  %653 = vmatpush.bf16.xpose.msra.mxu1 %v558_v39 }
  0x22   : >> { %4114 = vst [vmem:[#allocation16_spill] sm:$0xff] %v2810_v14 }
  0x23   : >> { %4115 = vst [vmem:[#allocation17_spill] sm:$0xff] %v2814_v15  ;;  %2102 = vmatpush.bf16.msra.mxu3 %v3126_v42  ;;  %2101 = vmatpush.bf16.msra.mxu2 %v3126_v42 }
  0x24   : >> { %4116 = vst [vmem:[#allocation18_spill] sm:$0xff] %v2818_v16 }
  0x25   : >> { %4117 = vst [vmem:[#allocation19_spill] sm:$0xff] %v2822_v17 }
  0x26   : >> { %4118 = vst [vmem:[#allocation20_spill] sm:$0xff] %v2826_v18 }
  0x27   : >> { %4119 = vst [vmem:[#allocation21_spill] sm:$0xff] %v2830_v19  ;;  %2105 = vmatpush.bf16.msra.mxu3 %v3134_v45  ;;  %2104 = vmatpush.bf16.msra.mxu2 %v3134_v45 }
  0x28   : >> { %4120 = vst [vmem:[#allocation22_spill] sm:$0xff] %v2834_v20  ;;  %565 = vmatpush.bf16.xpose.msra.mxu0 %v531_v43 }
  0x29   : >> { %4121 = vst [vmem:[#allocation23_spill] sm:$0xff] %v2838_v21  ;;  %654 = vmatpush.bf16.xpose.msra.mxu1 %v555_v44 }
  0x2a   : >> { %4122 = vst [vmem:[#allocation24_spill] sm:$0xff] %v2842_v22 }
  0x2b   : >> { %4123 = vst [vmem:[#allocation25_spill] sm:$0xff] %v2846_v23  ;;  %2108 = vmatpush.bf16.msra.mxu3 %v3140_v47  ;;  %2107 = vmatpush.bf16.msra.mxu2 %v3140_v47 }
  0x2c   : >> { %4124 = vst [vmem:[#allocation26_spill] sm:$0xff] %v2850_v24 }
  0x2d   : >> { %4125 = vst [vmem:[#allocation27_spill] sm:$0xff] %v2854_v25 }
  0x2e   : >> { %4126 = vst [vmem:[#allocation28_spill] sm:$0xff] %v2858_v26 }
  0x2f   : >> { %4127 = vst [vmem:[#allocation29_spill] sm:$0xff] %v2862_v27  ;;  %2111 = vmatpush.bf16.msra.mxu3 %v3148_v50  ;;  %2110 = vmatpush.bf16.msra.mxu2 %v3148_v50 }
  0x30   : >> { %4128 = vst [vmem:[#allocation30_spill] sm:$0xff] %v2866_v28  ;;  %566 = vmatpush.bf16.xpose.msra.mxu0 %v528_v48 }
  0x31   : >> { %4129 = vst [vmem:[#allocation31_spill] sm:$0xff] %v2870_v29  ;;  %655 = vmatpush.bf16.xpose.msra.mxu1 %v552_v49 }
  0x32   : >> { %4130 = vst [vmem:[#allocation32_spill] sm:$0xff] %v2874_v30 }
  0x33   : >> { %4131 = vst [vmem:[#allocation33_spill] sm:$0xff] %v2878_v31  ;;  %2114 = vmatpush.bf16.msra.mxu3 %v3154_v52  ;;  %2113 = vmatpush.bf16.msra.mxu2 %v3154_v52 }
  0x37   : >> { %1294 = vmatpush.bf16.msrb.mxu3 %v2010_v33  ;;  %v2015_v33 = vunpack.c.h.bf16 %v2013_v61 }
  0x38   : >> { %567 = vmatpush.bf16.xpose.msra.mxu0 %v525_v53 }
  0x39   : >> { %656 = vmatpush.bf16.xpose.msra.mxu1 %v549_v54  ;;  %v339_v38 = vmul.f32 0.70703125, %v2015_v33 }
  0x3b   : >> { %1295 = vmatpush.bf16.msrb.mxu3 %v2009_v37  ;;  %v338_v37 = vmul.f32 0.70703125, %v2014_v63 }
  0x3d   : >> { %v370_v39 = vpack.c.bf16 %v339_v38, %v338_v37  ;;  %v2081_v38 = vld [vmem:[%s3099_s25 + $0x30] sm:$0xff]  }
  0x3f   : >> { %1296 = vmatpush.bf16.msrb.mxu3 %v2008_v41  ;;  %v2076_v41 = vld [vmem:[%s3099_s25 + $0x8] sm:$0xff]  }
  0x40   : >> { %568 = vmatpush.bf16.xpose.msra.mxu0 %v522_v56  ;;  %v2018_v43 = vunpack.c.l.bf16 %v2076_v41  ;;  %v2019_v44 = vunpack.c.h.bf16 %v2076_v41  ;;  %v2039_v41 = vunpack.c.h.bf16 %v2081_v38 }
  0x41   : >> { %657 = vmatpush.bf16.xpose.msra.mxu1 %v546_v57  ;;  %v2079_v57 = vld [vmem:[%s3099_s25 + $0x20] sm:$0xff]  }
  0x43   : >> { %1297 = vmatpush.bf16.msrb.mxu3 %v2007_v46  ;;  %v341_v46 = vmul.f32 0.70703125, %v2019_v44  ;;  %v351_v44 = vmul.f32 0.70703125, %v2039_v41 }
  0x47   : >> { %1298 = vmatpush.bf16.msrb.mxu3 %v2006_v51 }
  0x48   : >> { %569 = vmatpush.bf16.xpose.msra.mxu0 %v519_v59 }
  0x49   : >> { %658 = vmatpush.bf16.xpose.msra.mxu1 %v543_v60 }
  0x4b   : >> { %1299 = vmatpush.bf16.msrb.mxu3 %v2005_v55 }
  0x4f   : >> { %1300 = vmatpush.bf16.msrb.mxu3 %v2004_v58  ;;  %v2031_v58 = vunpack.c.h.bf16 %v2079_v57 }
  0x50   : >> { %570 = vmatpush.bf16.xpose.msra.mxu0 %v516_v34 }
  0x51   : >> { %659 = vmatpush.bf16.xpose.msra.mxu1 %v540_v35  ;;  %v347_v60 = vmul.f32 0.70703125, %v2031_v58 }
  0x53   : >> { %1301 = vmatpush.bf16.msrb.mxu3 %v2003_v62  ;;  %v2080_v62 = vld [vmem:[%s3099_s25 + $0x28] sm:$0xff]  }
  0x54   : >> { %v2034_v63 = vunpack.c.l.bf16 %v2080_v62  ;;  %v2035_v33 = vunpack.c.h.bf16 %v2080_v62 }
  0x56   : >> { %v348_v34 = vmul.f32 0.70703125, %v2034_v63  ;;  %v349_v35 = vmul.f32 0.70703125, %v2035_v33 }
  0x57   : >> { %1942 = vmatmul.msk.bf16.vlgmr.msra.gmra.mxu0 %vm466_vm0, %v370_v39 }
  0x58   : >> { %1205 = vmatpush.bf16.msrb.mxu0 %v3102_v32  ;;  %1958 = vmatmul.msk.bf16.vlgmr.msra.gmra.mxu1 %vm466_vm0, %v370_v39  ;;  %v375_v37 = vpack.c.bf16 %v349_v35, %v348_v34  ;;  %v2038_v39 = vunpack.c.l.bf16 %v2081_v38  ;;  %v2085_v35 = vld [vmem:[%s3099_s25 + $0x50] sm:$0xff]  }
  0x59   : >> { %2091 = vmatpush.bf16.msrb.mxu1 %v3102_v32  ;;  %v340_v32 = vmul.f32 0.70703125, %v2018_v43  ;;  %v2055_v38 = vunpack.c.h.bf16 %v2085_v35 }
  0x5a   : >> { %v350_v43 = vmul.f32 0.70703125, %v2038_v39 }
  0x5c   : >> { %1206 = vmatpush.bf16.msrb.mxu0 %v3111_v36 }
  0x5d   : >> { %2094 = vmatpush.bf16.msrb.mxu1 %v3111_v36  ;;  %v371_v36 = vpack.c.bf16 %v341_v46, %v340_v32  ;;  %v376_v32 = vpack.c.bf16 %v351_v44, %v350_v43  ;;  %v2082_v46 = vld [vmem:[%s3099_s25 + $0x38] sm:$0xff]   ;;  %v359_v44 = vmul.f32 0.70703125, %v2055_v38 }
  0x60   : >> { %1207 = vmatpush.bf16.msrb.mxu0 %v3120_v40 }
  0x61   : >> { %2097 = vmatpush.bf16.msrb.mxu1 %v3120_v40  ;;  %v2077_v40 = vld [vmem:[%s3099_s25 + $0x10] sm:$0xff]  }
  0x62   : >> { %v2023_v48 = vunpack.c.h.bf16 %v2077_v40 }
  0x64   : >> { %1208 = vmatpush.bf16.msrb.mxu0 %v3126_v42  ;;  %v343_v49 = vmul.f32 0.70703125, %v2023_v48 }
  0x65   : >> { %2100 = vmatpush.bf16.msrb.mxu1 %v3126_v42  ;;  %v2022_v42 = vunpack.c.l.bf16 %v2077_v40  ;;  %v2043_v40 = vunpack.c.h.bf16 %v2082_v46 }
  0x67   : >> { %1943 = vmatmul.msk.bf16.gmra.mxu0 %vm466_vm0, %v371_v36  ;;  %v353_v48 = vmul.f32 0.70703125, %v2043_v40  ;;  %v2086_v40 = vld [vmem:[%s3099_s25 + $0x58] sm:$0xff]  }
  0x68   : >> { %1209 = vmatpush.bf16.msrb.mxu0 %v3134_v45  ;;  %1959 = vmatmul.msk.bf16.gmra.mxu1 %vm466_vm0, %v371_v36  ;;  %v2042_v36 = vunpack.c.l.bf16 %v2082_v46 }
  0x69   : >> { %2103 = vmatpush.bf16.msrb.mxu1 %v3134_v45  ;;  %v342_v45 = vmul.f32 0.70703125, %v2022_v42 }
  0x6a   : >> { %v352_v42 = vmul.f32 0.70703125, %v2042_v36 }
  0x6b   : >> { %v372_v51 = vpack.c.bf16 %v343_v49, %v342_v45  ;;  %v2083_v49 = vld [vmem:[%s3099_s25 + $0x40] sm:$0xff]  }
  0x6c   : >> { %1210 = vmatpush.bf16.msrb.mxu0 %v3140_v47  ;;  %v377_v45 = vpack.c.bf16 %v353_v48, %v352_v42  ;;  %v2058_v42 = vunpack.c.l.bf16 %v2086_v40  ;;  %v2059_v48 = vunpack.c.h.bf16 %v2086_v40 }
  0x6d   : >> { %2106 = vmatpush.bf16.msrb.mxu1 %v3140_v47  ;;  %v2078_v47 = vld [vmem:[%s3099_s25 + $0x18] sm:$0xff]  }
  0x6e   : >> { %v2026_v53 = vunpack.c.l.bf16 %v2078_v47  ;;  %v2027_v54 = vunpack.c.h.bf16 %v2078_v47  ;;  %v2047_v47 = vunpack.c.h.bf16 %v2083_v49 }
  0x70   : >> { %1211 = vmatpush.bf16.msrb.mxu0 %v3148_v50  ;;  %v344_v55 = vmul.f32 0.70703125, %v2026_v53 }
  0x71   : >> { %2109 = vmatpush.bf16.msrb.mxu1 %v3148_v50  ;;  %v345_v50 = vmul.f32 0.70703125, %v2027_v54  ;;  %v355_v54 = vmul.f32 0.70703125, %v2047_v47  ;;  %v361_v47 = vmul.f32 0.70703125, %v2059_v48 }
  0x73   : >> { %v373_v56 = vpack.c.bf16 %v345_v50, %v344_v55 }
  0x74   : >> { %1212 = vmatpush.bf16.msrb.mxu0 %v3154_v52 }
  0x75   : >> { %2112 = vmatpush.bf16.msrb.mxu1 %v3154_v52  ;;  %v2030_v52 = vunpack.c.l.bf16 %v2079_v57  ;;  %v2084_v57 = vld [vmem:[%s3099_s25 + $0x48] sm:$0xff]  }
  0x76   : >> { %v2051_v58 = vunpack.c.h.bf16 %v2084_v57 }
  0x77   : >> { %1944 = vmatmul.msk.bf16.gmra.mxu0 %vm466_vm0, %v372_v51  ;;  %v346_v59 = vmul.f32 0.70703125, %v2030_v52  ;;  %v2050_v52 = vunpack.c.l.bf16 %v2084_v57  ;;  %v2087_v57 = vld [vmem:[%s3099_s25 + $0x60] sm:$0xff]  }
  0x78   : >> { %1960 = vmatmul.msk.bf16.gmra.mxu1 %vm466_vm0, %v372_v51  ;;  %v2046_v51 = vunpack.c.l.bf16 %v2083_v49  ;;  %v357_v62 = vmul.f32 0.70703125, %v2051_v58  ;;  %v2063_v58 = vunpack.c.h.bf16 %v2087_v57 }
  0x79   : >> { %v374_v61 = vpack.c.bf16 %v347_v60, %v346_v59 }
  0x7a   : >> { %v354_v53 = vmul.f32 0.70703125, %v2046_v51  ;;  %v360_v51 = vmul.f32 0.70703125, %v2058_v42 }
  0x7c   : >> { %v378_v55 = vpack.c.bf16 %v355_v54, %v354_v53  ;;  %v381_v53 = vpack.c.bf16 %v361_v47, %v360_v51 }
  0x87   : >> { %1945 = vmatmul.msk.bf16.gmra.mxu0 %vm466_vm0, %v373_v56 }
  0x88   : >> { %1961 = vmatmul.msk.bf16.gmra.mxu1 %vm466_vm0, %v373_v56 }
  0x97   : >> { %1946 = vmatmul.msk.bf16.gmra.mxu0 %vm466_vm0, %v374_v61 }
  0x98   : >> { %1962 = vmatmul.msk.bf16.gmra.mxu1 %vm466_vm0, %v374_v61  ;;  %v356_v61 = vmul.f32 0.70703125, %v2050_v52  ;;  %v2062_v52 = vunpack.c.l.bf16 %v2087_v57 }
  0x9a   : >> { %v379_v63 = vpack.c.bf16 %v357_v62, %v356_v61 }
  0xa7   : >> { %1947 = vmatmul.msk.bf16.gmra.mxu0 %vm466_vm0, %v375_v37 }
  0xa8   : >> { %1963 = vmatmul.msk.bf16.gmra.mxu1 %vm466_vm0, %v375_v37  ;;  %v2054_v37 = vunpack.c.l.bf16 %v2085_v35  ;;  %v363_v35 = vmul.f32 0.70703125, %v2063_v58  ;;  %v2089_v58 = vld [vmem:[%s3099_s25 + $0x70] sm:$0xff]  }
  0xaa   : >> { %v358_v43 = vmul.f32 0.70703125, %v2054_v37 }
  0xb7   : >> { %1948 = vmatmul.msk.bf16.gmra.mxu0 %vm466_vm0, %v376_v32 }
  0xb8   : >> { %1964 = vmatmul.msk.bf16.gmra.mxu1 %vm466_vm0, %v376_v32  ;;  %v380_v32 = vpack.c.bf16 %v359_v44, %v358_v43  ;;  %v2088_v44 = vld [vmem:[%s3099_s25 + $0x68] sm:$0xff]  }
  0xb9   : >> { %v2067_v40 = vunpack.c.h.bf16 %v2088_v44 }
  0xbb   : >> { %v365_v47 = vmul.f32 0.70703125, %v2067_v40 }
  0xc7   : >> { %1949 = vmatmul.msk.bf16.gmra.mxu0 %vm466_vm0, %v377_v45 }
  0xc8   : >> { %1965 = vmatmul.msk.bf16.gmra.mxu1 %vm466_vm0, %v377_v45 }
  0xd4   : >> { %v3214_v50 = vpop.f32.mrf.mxu0 }
  0xd5   : >> { %v3216_v56 = vpop.f32.mrf.mxu1 }
  0xd7   : >> { %1950 = vmatmul.msk.bf16.gmra.mxu0 %vm466_vm0, %v378_v55 }
  0xd8   : >> { %1966 = vmatmul.msk.bf16.gmra.mxu1 %vm466_vm0, %v378_v55 }
  0xdc   : >> { %v3221_v59 = vpop.f32.mrf.mxu0 }
  0xdd   : >> { %v3223_v60 = vpop.f32.mrf.mxu1 }
  0xde   : >> { %4132 = vst [vmem:[#allocation34_spill] sm:$0xff] %v3223_v60 }
  0xe4   : >> { %v3225_v33 = vpop.f32.mrf.mxu0 }
  0xe5   : >> { %v3227_v34 = vpop.f32.mrf.mxu1 }
  0xe7   : >> { %1951 = vmatmul.msk.bf16.gmra.mxu0 %vm466_vm0, %v379_v63 }
  0xe8   : >> { %1967 = vmatmul.msk.bf16.gmra.mxu1 %vm466_vm0, %v379_v63  ;;  %v362_v63 = vmul.f32 0.70703125, %v2062_v52 }
  0xea   : >> { %v382_v37 = vpack.c.bf16 %v363_v35, %v362_v63  ;;  %v2070_v63 = vunpack.c.l.bf16 %v2089_v58  ;;  %v2071_v35 = vunpack.c.h.bf16 %v2089_v58 }
  0xec   : >> { %v3232_v39 = vpop.f32.mrf.mxu0  ;;  %v366_v0 = vmul.f32 0.70703125, %v2070_v63 }
  0xed   : >> { %v3234_v41 = vpop.f32.mrf.mxu1 }
  0xf4   : >> { %v3236_v46 = vpop.f32.mrf.mxu0 }
  0xf5   : >> { %v3238_v36 = vpop.f32.mrf.mxu1 }
  0xf7   : >> { %1952 = vmatmul.msk.bf16.gmra.mxu0 %vm466_vm0, %v380_v32 }
  0xf8   : >> { %1968 = vmatmul.msk.bf16.gmra.mxu1 %vm466_vm0, %v380_v32  ;;  %v2066_v32 = vunpack.c.l.bf16 %v2088_v44 }
  0xfa   : >> { %v364_v51 = vmul.f32 0.70703125, %v2066_v32  ;;  %v367_v32 = vmul.f32 0.70703125, %v2071_v35 }
  0xfc   : >> { %v3243_v45 = vpop.f32.mrf.mxu0  ;;  %v384_v40 = vpack.c.bf16 %v367_v32, %v366_v0 }
  0xfd   : >> { %v3245_v49 = vpop.f32.mrf.mxu1 }
 0x104   : >> { %v3247_v54 = vpop.f32.mrf.mxu0 }
 0x105   : >> { %v3249_v55 = vpop.f32.mrf.mxu1 }
 0x107   : >> { %1953 = vmatmul.msk.bf16.gmra.mxu0 %vm466_vm0, %v381_v53 }
 0x108   : >> { %1969 = vmatmul.msk.bf16.gmra.mxu1 %vm466_vm0, %v381_v53  ;;  %v383_v53 = vpack.c.bf16 %v365_v47, %v364_v51 }
 0x10c   : >> { %v3254_v61 = vpop.f32.mrf.mxu0 }
 0x10d   : >> { %v3256_v62 = vpop.f32.mrf.mxu1 }
 0x114   : >> { %v3258_v38 = vpop.f32.mrf.mxu0 }
 0x115   : >> { %v3260_v43 = vpop.f32.mrf.mxu1 }
 0x117   : >> { %1954 = vmatmul.msk.bf16.gmra.mxu0 %vm466_vm0, %v382_v37 }
 0x118   : >> { %1970 = vmatmul.msk.bf16.gmra.mxu1 %vm466_vm0, %v382_v37 }
 0x11c   : >> { %v3265_v42 = vpop.f32.mrf.mxu0 }
 0x11d   : >> { %v3267_v48 = vpop.f32.mrf.mxu1 }
 0x124   : >> { %v3269_v57 = vpop.f32.mrf.mxu0 }
 0x125   : >> { %v3271_v52 = vpop.f32.mrf.mxu1 }
 0x127   : >> { %1955 = vmatmul.msk.bf16.gmra.mxu0 %vm466_vm0, %v383_v53 }
 0x128   : >> { %1971 = vmatmul.msk.bf16.gmra.mxu1 %vm466_vm0, %v383_v53  ;;  %v2074_v53 = vunpack.c.l.bf16 %v2090_v1 }
 0x12a   : >> { %v368_v4 = vmul.f32 0.70703125, %v2074_v53 }
 0x12c   : >> { %v3276_v37 = vpop.f32.mrf.mxu0  ;;  %v385_v63 = vpack.c.bf16 %v369_v5, %v368_v4 }
 0x12d   : >> { %v3278_v44 = vpop.f32.mrf.mxu1 }
 0x12e   : >> { %4133 = vst [vmem:[#allocation35_spill] sm:$0xff] %v3278_v44 }
 0x134   : >> { %v3280_v51 = vpop.f32.mrf.mxu0 }
 0x135   : >> { %v3282_v47 = vpop.f32.mrf.mxu1 }
 0x137   : >> { %1956 = vmatmul.msk.bf16.gmra.mxu0 %vm466_vm0, %v384_v40 }
 0x138   : >> { %1972 = vmatmul.msk.bf16.gmra.mxu1 %vm466_vm0, %v384_v40 }
 0x13c   : >> { %v3287_v3 = vpop.f32.mrf.mxu0 }
 0x13d   : >> { %v3289_v58 = vpop.f32.mrf.mxu1 }
 0x13e   : >> { %4134 = vst [vmem:[#allocation36_spill] sm:$0xff] %v3289_v58 }
 0x144   : >> { %v3291_v35 = vpop.f32.mrf.mxu0 }
 0x145   : >> { %v3293_v0 = vpop.f32.mrf.mxu1 }
 0x147   : >> { %1957 = vmatmul.msk.bf16.gmra.mxu0 %vm466_vm0, %v385_v63 }
 0x148   : >> { %1973 = vmatmul.msk.bf16.gmra.mxu1 %vm466_vm0, %v385_v63 }
 0x14c   : >> { %v3297_v32 = vpop.f32.mrf.mxu0 }
 0x14d   : >> { %v3299_v40 = vpop.f32.mrf.mxu1 }
 0x154   : >> { %v3301_v1 = vpop.f32.mrf.mxu0 }
 0x155   : >> { %v3303_v6 = vpop.f32.mrf.mxu1 }
 0x156   : >> { %4135 = vst [vmem:[#allocation37_spill] sm:$0xff] %v3303_v6 }
 0x15c   : >> { %v3305_v7 = vpop.f32.mrf.mxu0 }
 0x15d   : >> { %v3307_v2 = vpop.f32.mrf.mxu1 }
 0x164   : >> { %v3309_v4 = vpop.f32.mrf.mxu0 }
 0x165   : >> { %v3311_v5 = vpop.f32.mrf.mxu1 }
 0x166   : >> { %4136 = vst [vmem:[#allocation38_spill] sm:$0xff] %v3311_v5 }
 0x16c   : >> { %v3313_v53 = vpop.f32.mrf.mxu0 }
 0x16d   : >> { %v3315_v8 = vpop.f32.mrf.mxu1 }
 0x174   : >> { %v3317_v63 = vpop.f32.mrf.mxu0 }
 0x175   : >> { %v3319_v9 = vpop.f32.mrf.mxu1 }
 0x17c   : >> { %v3321_v10 = vpop.f32.mrf.mxu0 }
 0x17d   : >> { %v3323_v11 = vpop.f32.mrf.mxu1 }
 0x184   : >> { %v3325_v12 = vpop.f32.mrf.mxu0 }
 0x185   : >> { %v3327_v13 = vpop.f32.mrf.mxu1 }
 0x186   : >> { %v807_v14 = vmax.f32 %v3325_v12, %v3327_v13 }
 0x188   : >> { %808 = vmax.xlane.f32.xlu0 %v807_v14 }
 0x18c   : >> { %v3331_v15 = vpop.f32.mrf.mxu0 }
 0x18d   : >> { %v3333_v16 = vpop.f32.mrf.mxu1 }
 0x18e   : >> { %v810_v17 = vmax.f32 %v3331_v15, %v3333_v16 }
 0x190   : >> { %811 = vmax.xlane.f32.xlu0 %v810_v17 }
 0x194   : >> { %v3337_v18 = vpop.f32.mrf.mxu0 }
 0x195   : >> { %v3339_v19 = vpop.f32.mrf.mxu1 }
 0x196   : >> { %v813_v20 = vmax.f32 %v3337_v18, %v3339_v19 }
 0x198   : >> { %814 = vmax.xlane.f32.xlu1 %v813_v20 }
 0x19c   : >> { %v3343_v21 = vpop.f32.mrf.mxu0 }
 0x19d   : >> { %v3345_v22 = vpop.f32.mrf.mxu1 }
 0x19e   : >> { %v816_v14 = vmax.f32 %v3343_v21, %v3345_v22 }
 0x1a0   : >> { %817 = vmax.xlane.f32.xlu1 %v816_v14 }
 0x1a4   : >> { %v3349_v23 = vpop.f32.mrf.mxu0 }
 0x1a5   : >> { %v3351_v24 = vpop.f32.mrf.mxu1 }
 0x1a6   : >> { %v819_v17 = vmax.f32 %v3349_v23, %v3351_v24 }
 0x1a8   : >> { %820 = vmax.xlane.f32.xlu2 %v819_v17 }
 0x1ac   : >> { %v3355_v25 = vpop.f32.mrf.mxu0 }
 0x1ad   : >> { %4137 = vst [vmem:[#allocation39_spill] sm:$0xff] %v3355_v25  ;;  %v3357_v26 = vpop.f32.mrf.mxu1 }
 0x1ae   : >> { %4138 = vst [vmem:[#allocation40_spill] sm:$0xff] %v3357_v26  ;;  %v822_v20 = vmax.f32 %v3355_v25, %v3357_v26 }
 0x1b0   : >> { %823 = vmax.xlane.f32.xlu2 %v822_v20  ;;  %v741_v20 = vmax.f32 %v3214_v50, %v3216_v56 }
 0x1b4   : >> { %v3361_v27 = vpop.f32.mrf.mxu0 }
 0x1b5   : >> { %v3363_v28 = vpop.f32.mrf.mxu1 }
 0x1b6   : >> { %4139 = vst [vmem:[#allocation41_spill] sm:$0xff] %v3363_v28  ;;  %v825_v14 = vmax.f32 %v3361_v27, %v3363_v28 }
 0x1b8   : >> { %826 = vmax.xlane.f32.xlu0 %v825_v14 }
 0x1bc   : >> { %v3367_v29 = vpop.f32.mrf.mxu0 }
 0x1bd   : >> { %4140 = vst [vmem:[#allocation42_spill] sm:$0xff] %v3367_v29  ;;  %v3369_v30 = vpop.f32.mrf.mxu1 }
 0x1be   : >> { %4141 = vst [vmem:[#allocation43_spill] sm:$0xff] %v3369_v30  ;;  %v828_v17 = vmax.f32 %v3367_v29, %v3369_v30  ;;  %v750_v30 = vmax.f32 %v3232_v39, %v3234_v41 }
 0x1c0   : >> { %829 = vmax.xlane.f32.xlu1 %v828_v17  ;;  %v744_v17 = vmax.f32 %v3221_v59, %v3223_v60  ;;  %v768_v60 = vmax.f32 %v3265_v42, %v3267_v48 }
 0x1c4   : >> { %v3373_v31 = vpop.f32.mrf.mxu0 }
 0x1c5   : >> { %v3375_v26 = vpop.f32.mrf.mxu1 }
 0x1c6   : >> { %4142 = vst [vmem:[#allocation44_spill] sm:$0xff] %v3375_v26  ;;  %v831_v25 = vmax.f32 %v3373_v31, %v3375_v26  ;;  %v747_v26 = vmax.f32 %v3225_v33, %v3227_v34 }
 0x1c8   : >> { %742 = vmax.xlane.f32.xlu1 %v741_v20  ;;  %832 = vmax.xlane.f32.xlu2 %v831_v25  ;;  %v759_v20 = vmax.f32 %v3247_v54, %v3249_v55  ;;  %v753_v25 = vmax.f32 %v3236_v46, %v3238_v36 }
 0x1cc   : >> { %v3381_v14 = vpop.f32.mrf.mxu0 }
 0x1cd   : >> { %v3383_v28 = vpop.f32.mrf.mxu1 }
 0x1ce   : >> { %v834_v29 = vmax.f32 %v3381_v14, %v3383_v28 }
 0x1d0   : >> { %751 = vmax.xlane.f32.xlu1 %v750_v30  ;;  %745 = vmax.xlane.f32.xlu2 %v744_v17  ;;  %v762_v30 = vmax.f32 %v3254_v61, %v3256_v62  ;;  %v771_v17 = vmax.f32 %v3269_v57, %v3271_v52 }
 0x1d1   : >> { %835 = vmax.xlane.f32.xlu0 %v834_v29  ;;  %v756_v29 = vmax.f32 %v3243_v45, %v3245_v49 }
 0x1d8   : >> { %760 = vmax.xlane.f32.xlu1 %v759_v20  ;;  %754 = vmax.xlane.f32.xlu2 %v753_v25  ;;  %v777_v20 = vmax.f32 %v3280_v51, %v3282_v47  ;;  %v786_v25 = vmax.f32 %v3297_v32, %v3299_v40 }
 0x1d9   : >> { %748 = vmax.xlane.f32.xlu0 %v747_v26  ;;  %v765_v26 = vmax.f32 %v3258_v38, %v3260_v43 }
 0x1e0   : >> { %769 = vmax.xlane.f32.xlu1 %v768_v60  ;;  %763 = vmax.xlane.f32.xlu2 %v762_v30  ;;  %v774_v60 = vmax.f32 %v3276_v37, %v3278_v44  ;;  %v780_v30 = vmax.f32 %v3287_v3, %v3289_v58 }
 0x1e1   : >> { %757 = vmax.xlane.f32.xlu0 %v756_v29  ;;  %v795_v29 = vmax.f32 %v3309_v4, %v3311_v5  ;;  %v798_v5 = vmax.f32 %v3313_v53, %v3315_v8 }
 0x1e8   : >> { %772 = vmax.xlane.f32.xlu1 %v771_v17  ;;  %778 = vmax.xlane.f32.xlu2 %v777_v20  ;;  %v789_v17 = vmax.f32 %v3301_v1, %v3303_v6  ;;  %v783_v20 = vmax.f32 %v3291_v35, %v3293_v0  ;;  %v792_v6 = vmax.f32 %v3305_v7, %v3307_v2 }
 0x1e9   : >> { %766 = vmax.xlane.f32.xlu0 %v765_v26 }
 0x1f0   : >> { %787 = vmax.xlane.f32.xlu1 %v786_v25  ;;  %775 = vmax.xlane.f32.xlu2 %v774_v60 }
 0x1f1   : >> { %781 = vmax.xlane.f32.xlu0 %v780_v30  ;;  %v804_v30 = vmax.f32 %v3321_v10, %v3323_v11 }
 0x1f8   : >> { %796 = vmax.xlane.f32.xlu1 %v795_v29  ;;  %790 = vmax.xlane.f32.xlu2 %v789_v17 }
 0x1f9   : >> { %784 = vmax.xlane.f32.xlu0 %v783_v20 }
 0x1fb   : >> { %v809_v26 = vpop.xlane.xlu0 %808 }
 0x1fc   : >> { %v881_v44 = vsub.f32 %v3325_v12, %v809_v26  ;;  %v882_v58 = vsub.f32 %v3327_v13, %v809_v26  ;;  %v801_v26 = vmax.f32 %v3317_v63, %v3319_v9 }
 0x1fe   : >> { %v989_v25 = vmul.f32 1.442695, %v881_v44  ;;  %v991_v60 = vmul.f32 1.442695, %v882_v58 }
 0x200   : >> { %2403 = vpow2.f32 %v989_v25  ;;  %805 = vmax.xlane.f32.xlu1 %v804_v30  ;;  %799 = vmax.xlane.f32.xlu2 %v798_v5 }
 0x201   : >> { %2405 = vpow2.f32 %v991_v60  ;;  %793 = vmax.xlane.f32.xlu0 %v792_v6 }
 0x203   : >> { %v812_v29 = vpop.xlane.xlu0 %811 }
 0x204   : >> { %v883_v12 = vsub.f32 %v3331_v15, %v812_v29  ;;  %v884_v13 = vsub.f32 %v3333_v16, %v812_v29 }
 0x206   : >> { %v2404_v44 = vpop.eup %2403  ;;  %v993_v58 = vmul.f32 1.442695, %v883_v12  ;;  %v995_v17 = vmul.f32 1.442695, %v884_v13 }
 0x207   : >> { %v3431_v20 = vpop.eup %2405 }
 0x208   : >> { %4143 = vst [vmem:[#allocation45_spill] sm:$0xff] %v3431_v20  ;;  %2407 = vpow2.f32 %v993_v58  ;;  %v3436_v25 = vadd.f32 %v3431_v20, %v2404_v44 }
 0x209   : >> { %2409 = vpow2.f32 %v995_v17  ;;  %802 = vmax.xlane.f32.xlu0 %v801_v26 }
 0x20b   : >> { %v815_v6 = vpop.xlane.xlu1 %814 }
 0x20c   : >> { %v885_v5 = vsub.f32 %v3337_v18, %v815_v6  ;;  %v886_v15 = vsub.f32 %v3339_v19, %v815_v6 }
 0x20e   : >> { %v2408_v16 = vpop.eup %2407  ;;  %v997_v60 = vmul.f32 1.442695, %v885_v5  ;;  %v999_v30 = vmul.f32 1.442695, %v886_v15 }
 0x20f   : >> { %v3440_v29 = vpop.eup %2409  ;;  %v1147_v12 = vpack.c.bf16 %v2408_v16, %v2404_v44 }
 0x210   : >> { %4144 = vst [vmem:[#allocation46_spill] sm:$0xff] %v3440_v29  ;;  %2411 = vpow2.f32 %v997_v60  ;;  %v3443_v13 = vadd.f32 %v3440_v29, %v2408_v16 }
 0x211   : >> { %2413 = vpow2.f32 %v999_v30  ;;  %1268 = vmatmul.bf16.vlgmr.msra.gmra.mxu3 %v1147_v12 }
 0x212   : >> { %4145 = vst [vmem:[#allocation47_spill] sm:$0xff] %v3443_v13 }
 0x213   : >> { %v818_v17 = vpop.xlane.xlu1 %817 }
 0x214   : >> { %v887_v18 = vsub.f32 %v3343_v21, %v818_v17  ;;  %v888_v19 = vsub.f32 %v3345_v22, %v818_v17 }
 0x216   : >> { %v2412_v26 = vpop.eup %2411  ;;  %v1001_v6 = vmul.f32 1.442695, %v887_v18  ;;  %v1003_v5 = vmul.f32 1.442695, %v888_v19 }
 0x217   : >> { %v3449_v15 = vpop.eup %2413 }
 0x218   : >> { %4146 = vst [vmem:[#allocation48_spill] sm:$0xff] %v3449_v15  ;;  %2415 = vpow2.f32 %v1001_v6  ;;  %v3452_v44 = vadd.f32 %v3449_v15, %v2412_v26  ;;  %v4148_v6 = vld [vmem:[#allocation39_spill] sm:$0xff] }
 0x219   : >> { %2417 = vpow2.f32 %v1003_v5  ;;  %v4149_v5 = vld [vmem:[#allocation40_spill] sm:$0xff] }
 0x21b   : >> { %v821_v16 = vpop.xlane.xlu2 %820 }
 0x21c   : >> { %v889_v60 = vsub.f32 %v3349_v23, %v821_v16  ;;  %v890_v30 = vsub.f32 %v3351_v24, %v821_v16 }
 0x21e   : >> { %v2416_v12 = vpop.eup %2415  ;;  %v1005_v58 = vmul.f32 1.442695, %v889_v60  ;;  %v1007_v21 = vmul.f32 1.442695, %v890_v30 }
 0x21f   : >> { %v3456_v20 = vpop.eup %2417  ;;  %v1149_v22 = vpack.c.bf16 %v2416_v12, %v2412_v26 }
 0x220   : >> { %4147 = vst [vmem:[#allocation49_spill] sm:$0xff] %v3456_v20  ;;  %2419 = vpow2.f32 %v1005_v58  ;;  %v3459_v17 = vadd.f32 %v3456_v20, %v2416_v12 }
 0x221   : >> { %2421 = vpow2.f32 %v1007_v21  ;;  %1273 = vmatmul.bf16.gmra.mxu3 %v1149_v22  ;;  %v4152_v21 = vld [vmem:[#allocation41_spill] sm:$0xff] }
 0x223   : >> { %v824_v19 = vpop.xlane.xlu2 %823 }
 0x224   : >> { %v891_v23 = vsub.f32 %v4148_v6, %v824_v19  ;;  %v892_v24 = vsub.f32 %v4149_v5, %v824_v19  ;;  %v4156_v5 = vld [vmem:[#allocation44_spill] sm:$0xff] }
 0x226   : >> { %v2420_v16 = vpop.eup %2419  ;;  %v1009_v60 = vmul.f32 1.442695, %v891_v23  ;;  %v1011_v30 = vmul.f32 1.442695, %v892_v24 }
 0x227   : >> { %v3465_v29 = vpop.eup %2421 }
 0x228   : >> { %4150 = vst [vmem:[#allocation39_spill] sm:$0xff] %v3465_v29  ;;  %2423 = vpow2.f32 %v1009_v60  ;;  %v3468_v58 = vadd.f32 %v3465_v29, %v2420_v16  ;;  %v4154_v60 = vld [vmem:[#allocation42_spill] sm:$0xff] }
 0x229   : >> { %2425 = vpow2.f32 %v1011_v30  ;;  %v4155_v30 = vld [vmem:[#allocation43_spill] sm:$0xff] }
 0x22a   : >> { %4151 = vst [vmem:[#allocation40_spill] sm:$0xff] %v3468_v58 }
 0x22b   : >> { %v827_v26 = vpop.xlane.xlu0 %826 }
 0x22c   : >> { %v893_v12 = vsub.f32 %v3361_v27, %v827_v26  ;;  %v894_v22 = vsub.f32 %v4152_v21, %v827_v26 }
 0x22e   : >> { %v2424_v18 = vpop.eup %2423  ;;  %v1013_v15 = vmul.f32 1.442695, %v893_v12  ;;  %v1015_v6 = vmul.f32 1.442695, %v894_v22 }
 0x22f   : >> { %v3472_v20 = vpop.eup %2425  ;;  %v1151_v19 = vpack.c.bf16 %v2424_v18, %v2420_v16 }
 0x230   : >> { %4153 = vst [vmem:[#allocation41_spill] sm:$0xff] %v3472_v20  ;;  %2427 = vpow2.f32 %v1013_v15  ;;  %v3475_v23 = vadd.f32 %v3472_v20, %v2424_v18 }
 0x231   : >> { %2429 = vpow2.f32 %v1015_v6  ;;  %1278 = vmatmul.bf16.gmra.mxu3 %v1151_v19 }
 0x233   : >> { %v830_v24 = vpop.xlane.xlu1 %829 }
 0x234   : >> { %v895_v27 = vsub.f32 %v4154_v60, %v830_v24  ;;  %v896_v26 = vsub.f32 %v4155_v30, %v830_v24 }
 0x236   : >> { %v2428_v21 = vpop.eup %2427  ;;  %v1017_v12 = vmul.f32 1.442695, %v895_v27  ;;  %v1019_v22 = vmul.f32 1.442695, %v896_v26 }
 0x237   : >> { %v3481_v58 = vpop.eup %2429 }
 0x238   : >> { %2431 = vpow2.f32 %v1017_v12  ;;  %v3484_v15 = vadd.f32 %v3481_v58, %v2428_v21 }
 0x239   : >> { %2433 = vpow2.f32 %v1019_v22 }
 0x23b   : >> { %v743_v18 = vpop.xlane.xlu1 %742  ;;  %v833_v16 = vpop.xlane.xlu2 %832 }
 0x23c   : >> { %v837_v6 = vsub.f32 %v3214_v50, %v743_v18  ;;  %v838_v19 = vsub.f32 %v3216_v56, %v743_v18  ;;  %v897_v60 = vsub.f32 %v3373_v31, %v833_v16  ;;  %v898_v24 = vsub.f32 %v4156_v5, %v833_v16 }
 0x23e   : >> { %v2432_v30 = vpop.eup %2431  ;;  %v901_v27 = vmul.f32 1.442695, %v837_v6  ;;  %v903_v26 = vmul.f32 1.442695, %v838_v19  ;;  %v1021_v29 = vmul.f32 1.442695, %v897_v60 }
 0x23f   : >> { %v3490_v20 = vpop.eup %2433  ;;  %v1023_v12 = vmul.f32 1.442695, %v898_v24  ;;  %v1153_v13 = vpack.c.bf16 %v2432_v30, %v2428_v21  ;;  %v4157_v21 = vld [vmem:[#allocation34_spill] sm:$0xff] }
 0x240   : >> { %2435 = vpow2.f32 %v901_v27  ;;  %v3493_v22 = vadd.f32 %v3490_v20, %v2432_v30 }
 0x241   : >> { %2437 = vpow2.f32 %v903_v26  ;;  %1283 = vmatmul.bf16.gmra.mxu3 %v1153_v13 }
 0x242   : >> { %2439 = vpow2.f32 %v1021_v29 }
 0x243   : >> { %2441 = vpow2.f32 %v1023_v12  ;;  %v752_v31 = vpop.xlane.xlu1 %751  ;;  %v746_v56 = vpop.xlane.xlu2 %745 }
 0x244   : >> { %v843_v5 = vsub.f32 %v3232_v39, %v752_v31  ;;  %v844_v18 = vsub.f32 %v3234_v41, %v752_v31  ;;  %v839_v16 = vsub.f32 %v3221_v59, %v746_v56  ;;  %v840_v6 = vsub.f32 %v4157_v21, %v746_v56  ;;  %v836_v19 = vpop.xlane.xlu0 %835 }
 0x245   : >> { %v899_v60 = vsub.f32 %v3381_v14, %v836_v19  ;;  %v900_v24 = vsub.f32 %v3383_v28, %v836_v19 }
 0x246   : >> { %v2436_v30 = vpop.eup %2435  ;;  %v913_v27 = vmul.f32 1.442695, %v843_v5  ;;  %v915_v13 = vmul.f32 1.442695, %v844_v18  ;;  %v905_v29 = vmul.f32 1.442695, %v839_v16 }
 0x247   : >> { %v3503_v26 = vpop.eup %2437  ;;  %v907_v12 = vmul.f32 1.442695, %v840_v6  ;;  %v1025_v39 = vmul.f32 1.442695, %v899_v60  ;;  %v1027_v31 = vmul.f32 1.442695, %v900_v24 }
 0x248   : >> { %v2440_v50 = vpop.eup %2439  ;;  %2443 = vpow2.f32 %v913_v27  ;;  %v1029_v41 = vadd.f32 %v3503_v26, %v2436_v30 }
 0x249   : >> { %v3506_v59 = vpop.eup %2441  ;;  %2445 = vpow2.f32 %v915_v13 }
 0x24a   : >> { %2447 = vpow2.f32 %v905_v29  ;;  %1030 = vadd.xlane.f32.xlu2 %v1029_v41  ;;  %v3509_v28 = vadd.f32 %v3506_v59, %v2440_v50 }
 0x24b   : >> { %2449 = vpow2.f32 %v907_v12  ;;  %v761_v14 = vpop.xlane.xlu1 %760  ;;  %v755_v56 = vpop.xlane.xlu2 %754 }
 0x24c   : >> { %2451 = vpow2.f32 %v1025_v39  ;;  %v849_v5 = vsub.f32 %v3247_v54, %v761_v14  ;;  %v850_v18 = vsub.f32 %v3249_v55, %v761_v14  ;;  %v845_v16 = vsub.f32 %v3236_v46, %v755_v56  ;;  %v749_v21 = vpop.xlane.xlu0 %748 }
 0x24d   : >> { %2453 = vpow2.f32 %v1027_v31  ;;  %v846_v6 = vsub.f32 %v3238_v36, %v755_v56  ;;  %v841_v19 = vsub.f32 %v3225_v33, %v749_v21  ;;  %v842_v60 = vsub.f32 %v3227_v34, %v749_v21 }
 0x24e   : >> { %v3517_v24 = vpop.eup %2443  ;;  %v925_v27 = vmul.f32 1.442695, %v849_v5  ;;  %v927_v13 = vmul.f32 1.442695, %v850_v18  ;;  %v917_v29 = vmul.f32 1.442695, %v845_v16 }
 0x24f   : >> { %v3519_v12 = vpop.eup %2445  ;;  %v919_v54 = vmul.f32 1.442695, %v846_v6  ;;  %v909_v55 = vmul.f32 1.442695, %v841_v19  ;;  %v911_v33 = vmul.f32 1.442695, %v842_v60 }
 0x250   : >> { %v2448_v39 = vpop.eup %2447  ;;  %2455 = vpow2.f32 %v925_v27  ;;  %v1038_v46 = vadd.f32 %v3519_v12, %v3517_v24 }
 0x251   : >> { %v3523_v41 = vpop.eup %2449  ;;  %2457 = vpow2.f32 %v927_v13  ;;  %v1125_v36 = vpack.c.bf16 %v2448_v39, %v2436_v30 }
 0x252   : >> { %v2452_v34 = vpop.eup %2451  ;;  %2459 = vpow2.f32 %v917_v29  ;;  %1039 = vadd.xlane.f32.xlu2 %v1038_v46  ;;  %v1032_v31 = vadd.f32 %v3523_v41, %v2448_v39 }
 0x253   : >> { %v3526_v14 = vpop.eup %2453  ;;  %2461 = vpow2.f32 %v919_v54  ;;  %1213 = vmatmul.bf16.vlgmr.msrb.gmra.mxu0 %v1125_v36  ;;  %v1155_v56 = vpack.c.bf16 %v2452_v34, %v2440_v50  ;;  %v770_v5 = vpop.xlane.xlu1 %769 }
 0x254   : >> { %v764_v18 = vpop.xlane.xlu2 %763  ;;  %2463 = vpow2.f32 %v909_v55  ;;  %1033 = vadd.xlane.f32.xlu0 %v1032_v31  ;;  %v855_v16 = vsub.f32 %v3265_v42, %v770_v5  ;;  %v856_v21 = vsub.f32 %v3267_v48, %v770_v5  ;;  %v758_v6 = vpop.xlane.xlu0 %757  ;;  %v3535_v39 = vadd.f32 %v3526_v14, %v2452_v34 }
 0x255   : >> { %v851_v30 = vsub.f32 %v3254_v61, %v764_v18  ;;  %2465 = vpow2.f32 %v911_v33  ;;  %1288 = vmatmul.bf16.gmra.mxu3 %v1155_v56  ;;  %v852_v19 = vsub.f32 %v3256_v62, %v764_v18  ;;  %v847_v60 = vsub.f32 %v3243_v45, %v758_v6 }
 0x256   : >> { %v848_v27 = vsub.f32 %v3245_v49, %v758_v6  ;;  %v2456_v50 = vpop.eup %2455  ;;  %v937_v13 = vmul.f32 1.442695, %v855_v16  ;;  %v939_v29 = vmul.f32 1.442695, %v856_v21  ;;  %v1156_v61 = vpack.c.bf16 %v3526_v14, %v3506_v59 }
 0x257   : >> { %v929_v54 = vmul.f32 1.442695, %v851_v30  ;;  %v3537_v42 = vpop.eup %2457  ;;  %v931_v48 = vmul.f32 1.442695, %v852_v19  ;;  %v921_v62 = vmul.f32 1.442695, %v847_v60 }
 0x258   : >> { %v3541_v55 = vpop.eup %2459  ;;  %2467 = vpow2.f32 %v937_v13  ;;  %v1047_v45 = vadd.f32 %v3537_v42, %v2456_v50  ;;  %v923_v46 = vmul.f32 1.442695, %v848_v27 }
 0x259   : >> { %v3544_v49 = vpop.eup %2461  ;;  %2469 = vpow2.f32 %v939_v29 }
 0x25a   : >> { %v2464_v33 = vpop.eup %2463  ;;  %2471 = vpow2.f32 %v929_v54  ;;  %1048 = vadd.xlane.f32.xlu2 %v1047_v45  ;;  %v1041_v36 = vadd.f32 %v3544_v49, %v3541_v55 }
 0x25b   : >> { %v3548_v34 = vpop.eup %2465  ;;  %2473 = vpow2.f32 %v931_v48  ;;  %v773_v31 = vpop.xlane.xlu1 %772 }
 0x25c   : >> { %v779_v56 = vpop.xlane.xlu2 %778  ;;  %2475 = vpow2.f32 %v921_v62  ;;  %1042 = vadd.xlane.f32.xlu0 %v1041_v36  ;;  %v1035_v5 = vadd.f32 %v3548_v34, %v2464_v33  ;;  %v857_v18 = vsub.f32 %v3269_v57, %v773_v31  ;;  %v858_v16 = vsub.f32 %v3271_v52, %v773_v31  ;;  %v767_v21 = vpop.xlane.xlu0 %766 }
 0x25d   : >> { %2477 = vpow2.f32 %v923_v46  ;;  %v861_v30 = vsub.f32 %v3280_v51, %v779_v56  ;;  %v862_v6 = vsub.f32 %v3282_v47, %v779_v56  ;;  %v853_v19 = vsub.f32 %v3258_v38, %v767_v21 }
 0x25e   : >> { %v3556_v60 = vpop.eup %2467  ;;  %1036 = vadd.xlane.f32.xlu1 %v1035_v5  ;;  %v941_v27 = vmul.f32 1.442695, %v857_v18  ;;  %v943_v13 = vmul.f32 1.442695, %v858_v16  ;;  %v854_v29 = vsub.f32 %v3260_v43, %v767_v21  ;;  %v1127_v46 = vpack.c.bf16 %v3517_v24, %v2464_v33 }
 0x25f   : >> { %v3559_v54 = vpop.eup %2469  ;;  %v949_v57 = vmul.f32 1.442695, %v861_v30  ;;  %v951_v48 = vmul.f32 1.442695, %v862_v6  ;;  %v933_v62 = vmul.f32 1.442695, %v853_v19  ;;  %v1126_v56 = vpack.c.bf16 %v3523_v41, %v3503_v26 }
 0x260   : >> { %v2472_v52 = vpop.eup %2471  ;;  %2479 = vpow2.f32 %v941_v27  ;;  %v1056_v51 = vadd.f32 %v3559_v54, %v3556_v60  ;;  %v935_v38 = vmul.f32 1.442695, %v854_v29  ;;  %v4158_v30 = vld [vmem:[#allocation35_spill] sm:$0xff] }
 0x261   : >> { %v3563_v47 = vpop.eup %2473  ;;  %2481 = vpow2.f32 %v943_v13  ;;  %v1131_v45 = vpack.c.bf16 %v2472_v52, %v2456_v50  ;;  %v4159_v13 = vld [vmem:[#allocation36_spill] sm:$0xff] }
 0x262   : >> { %v3566_v36 = vpop.eup %2475  ;;  %2483 = vpow2.f32 %v949_v57  ;;  %1057 = vadd.xlane.f32.xlu2 %v1056_v51  ;;  %v1050_v43 = vadd.f32 %v3563_v47, %v2472_v52 }
 0x263   : >> { %v3569_v31 = vpop.eup %2477  ;;  %2485 = vpow2.f32 %v951_v48  ;;  %1228 = vmatmul.bf16.vlgmr.msrb.gmra.mxu1 %v1131_v45  ;;  %1218 = vmatmul.bf16.gmra.mxu0 %v1127_v46  ;;  %v788_v5 = vpop.xlane.xlu1 %787 }
 0x264   : >> { %v776_v18 = vpop.xlane.xlu2 %775  ;;  %2487 = vpow2.f32 %v933_v62  ;;  %1051 = vadd.xlane.f32.xlu0 %v1050_v43  ;;  %v1044_v24 = vadd.f32 %v3569_v31, %v3566_v36  ;;  %v867_v50 = vsub.f32 %v3297_v32, %v788_v5  ;;  %v868_v33 = vsub.f32 %v3299_v40, %v788_v5  ;;  %v782_v16 = vpop.xlane.xlu0 %781 }
 0x265   : >> { %2489 = vpow2.f32 %v935_v38  ;;  %1302 = vmatmul.bf16.vlgmr.msrb.gmra.mxu3 %v1126_v56  ;;  %v859_v21 = vsub.f32 %v3276_v37, %v776_v18  ;;  %v860_v6 = vsub.f32 %v4158_v30, %v776_v18  ;;  %v863_v26 = vsub.f32 %v3287_v3, %v782_v16  ;;  %v4160_v18 = vld [vmem:[#allocation38_spill] sm:$0xff] }
 0x266   : >> { %v3580_v41 = vpop.eup %2479  ;;  %1045 = vadd.xlane.f32.xlu1 %v1044_v24  ;;  %v961_v19 = vmul.f32 1.442695, %v867_v50  ;;  %v963_v27 = vmul.f32 1.442695, %v868_v33  ;;  %v864_v29 = vsub.f32 %v4159_v13, %v782_v16  ;;  %v4161_v16 = vld [vmem:[#allocation37_spill] sm:$0xff] }
 0x267   : >> { %v3583_v57 = vpop.eup %2481  ;;  %v945_v32 = vmul.f32 1.442695, %v859_v21  ;;  %v947_v40 = vmul.f32 1.442695, %v860_v6  ;;  %v953_v52 = vmul.f32 1.442695, %v863_v26 }
 0x268   : >> { %v2484_v48 = vpop.eup %2483  ;;  %2491 = vpow2.f32 %v961_v19  ;;  %v1059_v37 = vadd.f32 %v3583_v57, %v3580_v41  ;;  %v955_v3 = vmul.f32 1.442695, %v864_v29 }
 0x269   : >> { %v3587_v62 = vpop.eup %2485  ;;  %2493 = vpow2.f32 %v963_v27 }
 0x26a   : >> { %v2488_v51 = vpop.eup %2487  ;;  %2495 = vpow2.f32 %v945_v32  ;;  %v1065_v38 = vadd.f32 %v3587_v62, %v2484_v48 }
 0x26b   : >> { %v3590_v45 = vpop.eup %2489  ;;  %2497 = vpow2.f32 %v947_v40  ;;  %v797_v46 = vpop.xlane.xlu1 %796 }
 0x26c   : >> { %v791_v43 = vpop.xlane.xlu2 %790  ;;  %2499 = vpow2.f32 %v953_v52  ;;  %1066 = vadd.xlane.f32.xlu2 %v1065_v38  ;;  %1060 = vadd.xlane.f32.xlu0 %v1059_v37  ;;  %v1053_v56 = vadd.f32 %v3590_v45, %v2488_v51  ;;  %v873_v5 = vsub.f32 %v3309_v4, %v797_v46  ;;  %v874_v24 = vsub.f32 %v4160_v18, %v797_v46  ;;  %v785_v50 = vpop.xlane.xlu0 %784 }
 0x26d   : >> { %2501 = vpow2.f32 %v955_v3  ;;  %v869_v33 = vsub.f32 %v3301_v1, %v791_v43  ;;  %v870_v21 = vsub.f32 %v4161_v16, %v791_v43  ;;  %v865_v30 = vsub.f32 %v3291_v35, %v785_v50 }
 0x26e   : >> { %v3598_v6 = vpop.eup %2491  ;;  %1054 = vadd.xlane.f32.xlu1 %v1053_v56  ;;  %v973_v26 = vmul.f32 1.442695, %v873_v5  ;;  %v975_v19 = vmul.f32 1.442695, %v874_v24  ;;  %v866_v27 = vsub.f32 %v3293_v0, %v785_v50  ;;  %v1129_v37 = vpack.c.bf16 %v3566_v36, %v3541_v55 }
 0x26f   : >> { %v3601_v13 = vpop.eup %2493  ;;  %v965_v4 = vmul.f32 1.442695, %v869_v33  ;;  %v967_v29 = vmul.f32 1.442695, %v870_v21  ;;  %v957_v40 = vmul.f32 1.442695, %v865_v30  ;;  %v1133_v0 = vpack.c.bf16 %v3556_v60, %v2488_v51 }
 0x270   : >> { %v3603_v32 = vpop.eup %2495  ;;  %2503 = vpow2.f32 %v973_v26  ;;  %v1074_v1 = vadd.f32 %v3601_v13, %v3598_v6  ;;  %v959_v35 = vmul.f32 1.442695, %v866_v27  ;;  %v1128_v56 = vpack.c.bf16 %v3519_v12, %v3548_v34 }
 0x271   : >> { %v3607_v52 = vpop.eup %2497  ;;  %2505 = vpow2.f32 %v975_v19 }
 0x272   : >> { %v2500_v3 = vpop.eup %2499  ;;  %2507 = vpow2.f32 %v965_v4  ;;  %v1062_v38 = vadd.f32 %v3607_v52, %v3603_v32  ;;  %v1136_v46 = vpack.c.bf16 %v3607_v52, %v3583_v57 }
 0x273   : >> { %v3616_v43 = vpop.eup %2501  ;;  %2509 = vpow2.f32 %v967_v29  ;;  %1223 = vmatmul.bf16.gmra.mxu0 %v1129_v37  ;;  %1233 = vmatmul.bf16.gmra.mxu1 %v1133_v0  ;;  %v1137_v5 = vpack.c.bf16 %v2500_v3, %v2484_v48  ;;  %v806_v55 = vpop.xlane.xlu1 %805 }
 0x274   : >> { %v800_v36 = vpop.xlane.xlu2 %799  ;;  %2511 = vpow2.f32 %v957_v40  ;;  %1075 = vadd.xlane.f32.xlu2 %v1074_v1  ;;  %v1068_v60 = vadd.f32 %v3616_v43, %v2500_v3  ;;  %v879_v51 = vsub.f32 %v3321_v10, %v806_v55  ;;  %v880_v18 = vsub.f32 %v3323_v11, %v806_v55  ;;  %v794_v24 = vpop.xlane.xlu0 %793 }
 0x275   : >> { %2513 = vpow2.f32 %v959_v35  ;;  %1307 = vmatmul.bf16.gmra.mxu3 %v1128_v56  ;;  %1243 = vmatmul.bf16.vlgmr.msra.gmra.mxu2 %v1137_v5  ;;  %v875_v50 = vsub.f32 %v3313_v53, %v800_v36  ;;  %v876_v33 = vsub.f32 %v3315_v8, %v800_v36  ;;  %v871_v12 = vsub.f32 %v3305_v7, %v794_v24 }
 0x276   : >> { %v3626_v34 = vpop.eup %2503  ;;  %1063 = vadd.xlane.f32.xlu1 %v1062_v38  ;;  %1069 = vadd.xlane.f32.xlu0 %v1068_v60  ;;  %v985_v48 = vmul.f32 1.442695, %v879_v51  ;;  %v987_v16 = vmul.f32 1.442695, %v880_v18  ;;  %v872_v10 = vsub.f32 %v3307_v2, %v794_v24  ;;  %v1138_v11 = vpack.c.bf16 %v3616_v43, %v3587_v62 }
 0x277   : >> { %v3631_v21 = vpop.eup %2505  ;;  %v977_v30 = vmul.f32 1.442695, %v875_v50  ;;  %v979_v26 = vmul.f32 1.442695, %v876_v33  ;;  %v969_v8 = vmul.f32 1.442695, %v871_v12  ;;  %v1135_v51 = vpack.c.bf16 %v3603_v32, %v3580_v41 }
 0x278   : >> { %v3633_v53 = vpop.eup %2507  ;;  %2515 = vpow2.f32 %v985_v48  ;;  %v1083_v7 = vadd.f32 %v3631_v21, %v3626_v34  ;;  %v971_v27 = vmul.f32 1.442695, %v872_v10  ;;  %v1130_v50 = vpack.c.bf16 %v3569_v31, %v3544_v49  ;;  %v1432_v12 = vld [vmem:[%s1431_s28] sm:$0x1] }
 0x279   : >> { %v3637_v19 = vpop.eup %2509  ;;  %2517 = vpow2.f32 %v987_v16  ;;  %v1483_v16 = vsel %vm1481_vm1, %v1432_v12, 0 }
 0x27a   : >> { %v2512_v4 = vpop.eup %2511  ;;  %2519 = vpow2.f32 %v977_v30  ;;  %v1077_v2 = vadd.f32 %v3637_v19, %v3633_v53  ;;  %1492 = vmatpush.bf16.msrb.mxu2 %v1483_v16 }
 0x27b   : >> { %v3641_v29 = vpop.eup %2513  ;;  %2521 = vpow2.f32 %v979_v26  ;;  %v1139_v33 = vpack.c.bf16 %v3598_v6, %v2512_v4  ;;  %v1132_v6 = vpack.c.bf16 %v3563_v47, %v3537_v42  ;;  %v1134_v42 = vpack.c.bf16 %v3559_v54, %v3590_v45 }
 0x27c   : >> { %2523 = vpow2.f32 %v969_v8  ;;  %1084 = vadd.xlane.f32.xlu2 %v1083_v7  ;;  %v1071_v40 = vadd.f32 %v3641_v29, %v2512_v4  ;;  %v803_v1 = vpop.xlane.xlu0 %802  ;;  %v1140_v35 = vpack.c.bf16 %v3601_v13, %v3641_v29  ;;  %v4162_v8 = vld [vmem:[#allocation47_spill] sm:$0xff] }
 0x27d   : >> { %2525 = vpow2.f32 %v971_v27  ;;  %v877_v37 = vsub.f32 %v3317_v63, %v803_v1  ;;  %v878_v0 = vsub.f32 %v3319_v9, %v803_v1 }
 0x27e   : >> { %v2516_v3 = vpop.eup %2515  ;;  %1078 = vadd.xlane.f32.xlu0 %v1077_v2  ;;  %1072 = vadd.xlane.f32.xlu1 %v1071_v40 }
 0x27f   : >> { %v3648_v38 = vpop.eup %2517  ;;  %v981_v56 = vmul.f32 1.442695, %v877_v37  ;;  %v983_v5 = vmul.f32 1.442695, %v878_v0 }
 0x280   : >> { %v2520_v55 = vpop.eup %2519  ;;  %v1092_v36 = vadd.f32 %v3648_v38, %v2516_v3 }
 0x281   : >> { %v3651_v60 = vpop.eup %2521  ;;  %2527 = vpow2.f32 %v981_v56 }
 0x282   : >> { %v2524_v63 = vpop.eup %2523  ;;  %2529 = vpow2.f32 %v983_v5  ;;  %v1086_v9 = vadd.f32 %v3651_v60, %v2520_v55  ;;  %v1144_v18 = vpack.c.bf16 %v3651_v60, %v3631_v21 }
 0x283   : >> { %v2526_v24 = vpop.eup %2525  ;;  %1238 = vmatmul.bf16.gmra.mxu1 %v1135_v51  ;;  %v1141_v30 = vpack.c.bf16 %v2524_v63, %v3633_v53 }
 0x284   : >> { %1093 = vadd.xlane.f32.xlu2 %v1092_v36  ;;  %v1080_v41 = vadd.f32 %v2526_v24, %v2524_v63  ;;  %v1142_v32 = vpack.c.bf16 %v2526_v24, %v3637_v19 }
 0x285   : >> { %1312 = vmatmul.bf16.gmra.mxu3 %v1130_v50  ;;  %1248 = vmatmul.bf16.gmra.mxu2 %v1139_v33 }
 0x286   : >> { %1087 = vadd.xlane.f32.xlu0 %v1086_v9  ;;  %1081 = vadd.xlane.f32.xlu1 %v1080_v41 }
 0x287   : >> { %v2528_v48 = vpop.eup %2527 }
 0x288   : >> { %v3666_v10 = vpop.eup %2529 }
 0x289   : >> { %v1146_v49 = vpack.c.bf16 %v3648_v38, %v3666_v10  ;;  %v1089_v31 = vadd.f32 %v3666_v10, %v2528_v48  ;;  %v4164_v38 = vld [vmem:[#allocation46_spill] sm:$0xff]  ;;  %v4165_v10 = vld [vmem:[#allocation45_spill] sm:$0xff] }
 0x28c   : >> { %1102 = vadd.xlane.f32.xlu2 %v3452_v44 }
 0x28e   : >> { %1096 = vadd.xlane.f32.xlu0 %v3436_v25  ;;  %1090 = vadd.xlane.f32.xlu1 %v1089_v31  ;;  %v4163_v25 = vld [vmem:[#allocation40_spill] sm:$0xff] }
 0x294   : >> { %1111 = vadd.xlane.f32.xlu2 %v3475_v23  ;;  %v3677_v26 = vpop.f32.mrf.mxu3  ;;  %v1143_v23 = vpack.c.bf16 %v2520_v55, %v3626_v34 }
 0x295   : >> { %1317 = vmatmul.bf16.gmra.mxu3 %v1132_v6  ;;  %1253 = vmatmul.bf16.gmra.mxu2 %v1141_v30 }
 0x296   : >> { %1105 = vadd.xlane.f32.xlu0 %v3459_v17  ;;  %1099 = vadd.xlane.f32.xlu1 %v4162_v8 }
 0x29c   : >> { %1120 = vadd.xlane.f32.xlu2 %v3509_v28  ;;  %v3682_v44 = vpop.f32.mrf.mxu3  ;;  %v1145_v28 = vpack.c.bf16 %v2516_v3, %v2528_v48 }
 0x29e   : >> { %1114 = vadd.xlane.f32.xlu0 %v3484_v15  ;;  %1108 = vadd.xlane.f32.xlu1 %v4163_v25 }
 0x2a4   : >> { %v3689_v47 = vpop.f32.mrf.mxu3 }
 0x2a5   : >> { %1322 = vmatmul.bf16.gmra.mxu3 %v1134_v42  ;;  %1258 = vmatmul.bf16.gmra.mxu2 %v1143_v23 }
 0x2a6   : >> { %1123 = vadd.xlane.f32.xlu0 %v3535_v39  ;;  %1117 = vadd.xlane.f32.xlu1 %v3493_v22 }
 0x2ac   : >> { %v3693_v17 = vpop.f32.mrf.mxu3 }
 0x2b4   : >> { %v3695_v53 = vpop.f32.mrf.mxu3 }
 0x2b5   : >> { %1263 = vmatmul.bf16.gmra.mxu2 %v1145_v28  ;;  %1327 = vmatmul.bf16.gmra.mxu3 %v1136_v46 }
 0x2bc   : >> { %v3700_v15 = vpop.f32.mrf.mxu3 }
 0x2bd   : >> { %v1031_v57 = vpop.xlane.xlu2 %1030 }
 0x2be   : >> { %2531 = vrcp.f32 %v1031_v57 }
 0x2c4   : >> { %v3702_v54 = vpop.f32.mrf.mxu3 }
 0x2c5   : >> { %1332 = vmatmul.bf16.gmra.mxu3 %v1138_v11  ;;  %v2532_v11 = vpop.eup %2531  ;;  %v1040_v40 = vpop.xlane.xlu2 %1039 }
 0x2c7   : >> { %v1034_v7 = vpop.xlane.xlu0 %1033 }
 0x2c8   : >> { %2533 = vrcp.f32 %v1034_v7 }
 0x2c9   : >> { %2535 = vrcp.f32 %v1040_v40 }
 0x2cc   : >> { %v3707_v39 = vpop.f32.mrf.mxu3 }
 0x2cd   : >> { %v1049_v30 = vpop.xlane.xlu2 %1048 }
 0x2ce   : >> { %v2534_v27 = vpop.eup %2533 }
 0x2cf   : >> { %v2536_v56 = vpop.eup %2535  ;;  %v1043_v63 = vpop.xlane.xlu0 %1042 }
 0x2d0   : >> { %v1214_v45 = vpop.f32.mrf.mxu0 }
 0x2d5   : >> { %1337 = vmatmul.bf16.gmra.mxu3 %v1140_v35  ;;  %v1037_v35 = vpop.xlane.xlu1 %1036 }
 0x2d6   : >> { %2537 = vrcp.f32 %v1037_v35 }
 0x2d7   : >> { %2539 = vrcp.f32 %v1043_v63  ;;  %v1052_v23 = vpop.xlane.xlu0 %1051 }
 0x2d8   : >> { %v3712_v22 = vpop.f32.mrf.mxu3  ;;  %v1216_v52 = vpop.f32.mrf.mxu0 }
 0x2dc   : >> { %v2538_v55 = vpop.eup %2537 }
 0x2e0   : >> { %v3714_v34 = vpop.f32.mrf.mxu3  ;;  %v1219_v4 = vpop.f32.mrf.mxu0 }
 0x2e1   : >> { %v1229_v24 = vpop.f32.mrf.mxu1 }
 0x2e5   : >> { %1342 = vmatmul.bf16.gmra.mxu3 %v1142_v32  ;;  %v2540_v32 = vpop.eup %2539 }
 0x2e8   : >> { %v1303_v46 = vpop.f32.mrf.mxu3  ;;  %v1221_v37 = vpop.f32.mrf.mxu0 }
 0x2e9   : >> { %v1304_v62 = vadd.f32 %v1303_v46, %v1214_v45  ;;  %v1231_v8 = vpop.f32.mrf.mxu1 }
 0x2eb   : >> { %v1383_v13 = vmul.f32 %v2532_v11, %v1304_v62 }
 0x2f0   : >> { %v1305_v43 = vpop.f32.mrf.mxu3  ;;  %v1224_v60 = vpop.f32.mrf.mxu0 }
 0x2f1   : >> { %v1306_v19 = vadd.f32 %v1305_v43, %v1216_v52  ;;  %v1234_v52 = vpop.f32.mrf.mxu1 }
 0x2f3   : >> { %v1384_v2 = vmul.f32 %v2534_v27, %v1306_v19  ;;  %v4167_v19 = vld [vmem:[#allocation49_spill] sm:$0xff]  ;;  %v4168_v27 = vld [vmem:[#allocation48_spill] sm:$0xff] }
 0x2f5   : >> { %v1415_v29 = vpack.c.bf16 %v1384_v2, %v1383_v13  ;;  %1347 = vmatmul.bf16.gmra.mxu3 %v1144_v18  ;;  %v1046_v18 = vpop.xlane.xlu1 %1045  ;;  %v1058_v2 = vpop.xlane.xlu2 %1057 }
 0x2f6   : >> { %2541 = vrcp.f32 %v1046_v18 }
 0x2f7   : >> { %1974 = vmatmul.msk.bf16.vlgmr.msrb.gmra.mxu2 %vm466_vm0, %v1415_v29  ;;  %2543 = vrcp.f32 %v1049_v30 }
 0x2f8   : >> { %v1308_v1 = vpop.f32.mrf.mxu3  ;;  %v1226_v33 = vpop.f32.mrf.mxu0  ;;  %2545 = vrcp.f32 %v1052_v23 }
 0x2f9   : >> { %v1309_v0 = vadd.f32 %v1308_v1, %v1219_v4  ;;  %v1244_v25 = vpop.f32.mrf.mxu2  ;;  %v4169_v4 = vpack.c.bf16 %v4167_v19, %v4168_v27  ;;  %2547 = vrcp.f32 %v1058_v2  ;;  %v1236_v1 = vpop.f32.mrf.mxu1 }
 0x2fb   : >> { %v1385_v36 = vmul.f32 %v2538_v55, %v1309_v0 }
 0x2fc   : >> { %v2542_v48 = vpop.eup %2541 }
 0x2fd   : >> { %v2544_v57 = vpop.eup %2543  ;;  %v1055_v40 = vpop.xlane.xlu1 %1054 }
 0x2fe   : >> { %v2546_v7 = vpop.eup %2545  ;;  %2549 = vrcp.f32 %v1055_v40 }
 0x300   : >> { %v1310_v3 = vpop.f32.mrf.mxu3 }
 0x301   : >> { %v1311_v5 = vadd.f32 %v1310_v3, %v1221_v37  ;;  %v1246_v62 = vpop.f32.mrf.mxu2  ;;  %v2548_v3 = vpop.eup %2547 }
 0x303   : >> { %v1386_v51 = vmul.f32 %v2536_v56, %v1311_v5 }
 0x304   : >> { %v2550_v5 = vpop.eup %2549 }
 0x305   : >> { %1352 = vmatmul.bf16.gmra.mxu3 %v1146_v49  ;;  %v1416_v21 = vpack.c.bf16 %v1386_v51, %v1385_v36  ;;  %v4166_v49 = vpack.c.bf16 %v4164_v38, %v4165_v10  ;;  %v1239_v51 = vpop.f32.mrf.mxu1 }
 0x307   : >> { %1975 = vmatmul.msk.bf16.gmra.mxu2 %vm466_vm0, %v1416_v21  ;;  %v4170_v21 = vld [vmem:[#allocation41_spill] sm:$0xff] }
 0x308   : >> { %v1313_v9 = vpop.f32.mrf.mxu3 }
 0x309   : >> { %v1314_v50 = vadd.f32 %v1313_v9, %v1224_v60  ;;  %v1249_v35 = vpop.f32.mrf.mxu2  ;;  %v4171_v60 = vld [vmem:[#allocation39_spill] sm:$0xff] }
 0x30a   : >> { %v4172_v63 = vpack.c.bf16 %v4170_v21, %v4171_v60 }
 0x30b   : >> { %v1387_v16 = vmul.f32 %v2540_v32, %v1314_v50 }
 0x310   : >> { %v1315_v41 = vpop.f32.mrf.mxu3 }
 0x311   : >> { %v1316_v12 = vadd.f32 %v1315_v41, %v1226_v33  ;;  %v1251_v18 = vpop.f32.mrf.mxu2  ;;  %v1064_v33 = vpop.xlane.xlu1 %1063 }
 0x312   : >> { %v1241_v41 = vpop.f32.mrf.mxu1 }
 0x313   : >> { %v1388_v31 = vmul.f32 %v2542_v48, %v1316_v12 }
 0x315   : >> { %1357 = vmatmul.bf16.gmra.mxu3 %v4166_v49  ;;  %v1417_v6 = vpack.c.bf16 %v1388_v31, %v1387_v16 }
 0x317   : >> { %1976 = vmatmul.msk.bf16.gmra.mxu2 %vm466_vm0, %v1417_v6  ;;  %v4173_v6 = vpack.c.bf16 %v3490_v20, %v3481_v58 }
 0x318   : >> { %v1318_v42 = vpop.f32.mrf.mxu3 }
 0x319   : >> { %v1319_v28 = vadd.f32 %v1318_v42, %v1229_v24  ;;  %v1061_v24 = vpop.xlane.xlu0 %1060  ;;  %v1254_v12 = vpop.f32.mrf.mxu2 }
 0x31a   : >> { %2551 = vrcp.f32 %v1061_v24 }
 0x31b   : >> { %v1389_v43 = vmul.f32 %v2544_v57, %v1319_v28  ;;  %2553 = vrcp.f32 %v1064_v33  ;;  %v4174_v33 = vld [vmem:[#allocation33_spill] sm:$0xff] }
 0x320   : >> { %v1320_v45 = vpop.f32.mrf.mxu3  ;;  %v2552_v16 = vpop.eup %2551 }
 0x321   : >> { %v1321_v46 = vadd.f32 %v1320_v45, %v1231_v8  ;;  %v2554_v38 = vpop.eup %2553  ;;  %v1067_v8 = vpop.xlane.xlu2 %1066 }
 0x322   : >> { %v1070_v23 = vpop.xlane.xlu0 %1069  ;;  %v1256_v28 = vpop.f32.mrf.mxu2  ;;  %2555 = vrcp.f32 %v1067_v8 }
 0x323   : >> { %v1390_v11 = vmul.f32 %v2546_v7, %v1321_v46  ;;  %2557 = vrcp.f32 %v1070_v23 }
 0x325   : >> { %1362 = vmatmul.bf16.gmra.mxu3 %v4169_v4  ;;  %v1418_v13 = vpack.c.bf16 %v1390_v11, %v1389_v43  ;;  %v1073_v4 = vpop.xlane.xlu1 %1072 }
 0x327   : >> { %1977 = vmatmul.msk.bf16.gmra.mxu2 %vm466_vm0, %v1418_v13 }
 0x328   : >> { %v1323_v29 = vpop.f32.mrf.mxu3 }
 0x329   : >> { %v1324_v37 = vadd.f32 %v1323_v29, %v1234_v52  ;;  %v2556_v52 = vpop.eup %2555  ;;  %v1076_v58 = vpop.xlane.xlu2 %1075 }
 0x32a   : >> { %v2558_v7 = vpop.eup %2557  ;;  %v1259_v19 = vpop.f32.mrf.mxu2  ;;  %2559 = vrcp.f32 %v1076_v58 }
 0x32b   : >> { %v1391_v55 = vmul.f32 %v2550_v5, %v1324_v37  ;;  %2561 = vrcp.f32 %v1073_v4  ;;  %v4180_v4 = vld [vmem:[#allocation30_spill] sm:$0xff] }
 0x330   : >> { %v1325_v0 = vpop.f32.mrf.mxu3 }
 0x331   : >> { %v1326_v56 = vadd.f32 %v1325_v0, %v1236_v1 }
 0x333   : >> { %v1392_v36 = vmul.f32 %v2548_v3, %v1326_v56  ;;  %v1079_v3 = vpop.xlane.xlu0 %1078 }
 0x334   : >> { %2563 = vrcp.f32 %v1079_v3 }
 0x335   : >> { %1367 = vmatmul.bf16.gmra.mxu3 %v4172_v63  ;;  %v1419_v9 = vpack.c.bf16 %v1392_v36, %v1391_v55 }
 0x337   : >> { %1978 = vmatmul.msk.bf16.gmra.mxu2 %vm466_vm0, %v1419_v9  ;;  %v1085_v9 = vpop.xlane.xlu2 %1084 }
 0x338   : >> { %v1328_v50 = vpop.f32.mrf.mxu3 }
 0x339   : >> { %v1329_v32 = vadd.f32 %v1328_v50, %v1239_v51 }
 0x33b   : >> { %v1393_v10 = vmul.f32 %v2552_v16, %v1329_v32  ;;  %v1088_v24 = vpop.xlane.xlu0 %1087 }
 0x33f   : >> { %v1094_v23 = vpop.xlane.xlu2 %1093 }
 0x340   : >> { %v1330_v48 = vpop.f32.mrf.mxu3 }
 0x341   : >> { %v1331_v31 = vadd.f32 %v1330_v48, %v1241_v41 }
 0x343   : >> { %v1394_v49 = vmul.f32 %v2554_v38, %v1331_v31 }
 0x345   : >> { %1372 = vmatmul.bf16.gmra.mxu3 %v4173_v6  ;;  %v1420_v30 = vpack.c.bf16 %v1394_v49, %v1393_v10 }
 0x347   : >> { %1979 = vmatmul.msk.bf16.gmra.mxu2 %vm466_vm0, %v1420_v30  ;;  %v4176_v30 = vld [vmem:[#allocation32_spill] sm:$0xff] }
 0x348   : >> { %v1333_v42 = vpop.f32.mrf.mxu3 }
 0x349   : >> { %v1334_v45 = vadd.f32 %v1333_v42, %v1244_v25  ;;  %v1261_v25 = vpop.f32.mrf.mxu2 }
 0x34b   : >> { %v1395_v43 = vmul.f32 %v2556_v52, %v1334_v45 }
 0x350   : >> { %v1335_v57 = vpop.f32.mrf.mxu3 }
 0x351   : >> { %v1336_v46 = vadd.f32 %v1335_v57, %v1246_v62  ;;  %v2560_v62 = vpop.eup %2559  ;;  %v1264_v59 = vpop.f32.mrf.mxu2 }
 0x352   : >> { %v2562_v40 = vpop.eup %2561 }
 0x353   : >> { %v1396_v11 = vmul.f32 %v2558_v7, %v1336_v46  ;;  %v2564_v55 = vpop.eup %2563 }
 0x355   : >> { %1377 = vmatmul.bf16.gmra.mxu3 %v1156_v61  ;;  %v1421_v20 = vpack.c.bf16 %v1396_v11, %v1395_v43  ;;  %v1082_v61 = vpop.xlane.xlu1 %1081 }
 0x356   : >> { %2565 = vrcp.f32 %v1082_v61 }
 0x357   : >> { %1980 = vmatmul.msk.bf16.gmra.mxu2 %vm466_vm0, %v1421_v20  ;;  %2567 = vrcp.f32 %v1085_v9 }
 0x358   : >> { %v1338_v27 = vpop.f32.mrf.mxu3  ;;  %2569 = vrcp.f32 %v1088_v24 }
 0x359   : >> { %v1339_v13 = vadd.f32 %v1338_v27, %v1249_v35  ;;  %v1266_v51 = vpop.f32.mrf.mxu2  ;;  %2571 = vrcp.f32 %v1094_v23 }
 0x35b   : >> { %v1397_v1 = vmul.f32 %v2562_v40, %v1339_v13  ;;  %v1097_v13 = vpop.xlane.xlu0 %1096 }
 0x35c   : >> { %v2566_v35 = vpop.eup %2565 }
 0x35d   : >> { %v2568_v48 = vpop.eup %2567  ;;  %v1091_v45 = vpop.xlane.xlu1 %1090 }
 0x35e   : >> { %v2570_v38 = vpop.eup %2569  ;;  %2573 = vrcp.f32 %v1091_v45 }
 0x35f   : >> { %v2572_v43 = vpop.eup %2571  ;;  %2575 = vrcp.f32 %v1097_v13 }
 0x360   : >> { %v1340_v2 = vpop.f32.mrf.mxu3 }
 0x361   : >> { %v1341_v29 = vadd.f32 %v1340_v2, %v1251_v18 }
 0x363   : >> { %v1398_v37 = vmul.f32 %v2560_v62, %v1341_v29 }
 0x365   : >> { %v1422_v0 = vpack.c.bf16 %v1398_v37, %v1397_v1  ;;  %v1100_v40 = vpop.xlane.xlu1 %1099 }
 0x366   : >> { %2577 = vrcp.f32 %v1100_v40 }
 0x367   : >> { %1981 = vmatmul.msk.bf16.gmra.mxu2 %vm466_vm0, %v1422_v0 }
 0x368   : >> { %v1343_v14 = vpop.f32.mrf.mxu3 }
 0x369   : >> { %v1344_v56 = vadd.f32 %v1343_v14, %v1254_v12 }
 0x36b   : >> { %v1399_v21 = vmul.f32 %v2564_v55, %v1344_v56 }
 0x370   : >> { %v1345_v5 = vpop.f32.mrf.mxu3 }
 0x371   : >> { %v1346_v36 = vadd.f32 %v1345_v5, %v1256_v28 }
 0x373   : >> { %v1400_v60 = vmul.f32 %v2566_v35, %v1346_v36  ;;  %v4184_v36 = vld [vmem:[#allocation28_spill] sm:$0xff] }
 0x375   : >> { %v1423_v63 = vpack.c.bf16 %v1400_v60, %v1399_v21  ;;  %v1103_v21 = vpop.xlane.xlu2 %1102 }
 0x376   : >> { %2579 = vrcp.f32 %v1103_v21 }
 0x377   : >> { %1982 = vmatmul.msk.bf16.gmra.mxu2 %vm466_vm0, %v1423_v63  ;;  %v1106_v63 = vpop.xlane.xlu0 %1105 }
 0x378   : >> { %v1348_v18 = vpop.f32.mrf.mxu3  ;;  %2581 = vrcp.f32 %v1106_v63 }
 0x379   : >> { %v1349_v32 = vadd.f32 %v1348_v18, %v1259_v19  ;;  %v2574_v19 = vpop.eup %2573  ;;  %v4186_v18 = vld [vmem:[#allocation27_spill] sm:$0xff] }
 0x37a   : >> { %v1494_v50 = vpop.f32.mrf.mxu2 }
 0x37b   : >> { %v3747_v31 = vadd.f32 %v4174_v33, %v1494_v50   ;;  %v1401_v49 = vmul.f32 %v2568_v48, %v1349_v32 }
 0x37d   : >> { %4175 = vst [vmem:[#allocation50_spill] sm:$0xff] %v3747_v31  ;;  %v4178_v31 = vld [vmem:[#allocation31_spill] sm:$0xff] }
 0x380   : >> { %v1350_v12 = vpop.f32.mrf.mxu3 }
 0x381   : >> { %v1351_v16 = vadd.f32 %v1350_v12, %v1261_v25 }
 0x382   : >> { %v1496_v10 = vpop.f32.mrf.mxu2 }
 0x383   : >> { %v1402_v6 = vmul.f32 %v2570_v38, %v1351_v16  ;;  %v3750_v30 = vadd.f32 %v4176_v30, %v1496_v10   ;;  %v4188_v38 = vld [vmem:[#allocation26_spill] sm:$0xff] }
 0x385   : >> { %v4177_v42 = vmov %v3750_v30  ;;  %v1424_v8 = vpack.c.bf16 %v1402_v6, %v1401_v49  ;;  %v1112_v6 = vpop.xlane.xlu2 %1111 }
 0x386   : >> { %2583 = vrcp.f32 %v1112_v6 }
 0x387   : >> { %1983 = vmatmul.msk.bf16.gmra.mxu2 %vm466_vm0, %v1424_v8  ;;  %v1109_v8 = vpop.xlane.xlu1 %1108 }
 0x388   : >> { %v1353_v28 = vpop.f32.mrf.mxu3  ;;  %2585 = vrcp.f32 %v1109_v8 }
 0x389   : >> { %v1354_v46 = vadd.f32 %v1353_v28, %v1264_v59  ;;  %v2576_v59 = vpop.eup %2575 }
 0x38a   : >> { %v1499_v57 = vpop.f32.mrf.mxu2  ;;  %v2578_v61 = vpop.eup %2577 }
 0x38b   : >> { %v3754_v29 = vadd.f32 %v4178_v31, %v1499_v57   ;;  %v1403_v58 = vmul.f32 %v2574_v19, %v1354_v46  ;;  %v2580_v33 = vpop.eup %2579  ;;  %v4192_v19 = vld [vmem:[#allocation24_spill] sm:$0xff] }
 0x38c   : >> { %v2582_v12 = vpop.eup %2581 }
 0x38d   : >> { %v4179_v52 = vmov %v3754_v29  ;;  %v4182_v29 = vld [vmem:[#allocation29_spill] sm:$0xff]  ;;  %v2584_v57 = vpop.eup %2583 }
 0x38e   : >> { %v2586_v46 = vpop.eup %2585 }
 0x38f   : >> { %v1118_v13 = vpop.xlane.xlu1 %1117 }
 0x390   : >> { %v1355_v7 = vpop.f32.mrf.mxu3 }
 0x391   : >> { %v1356_v11 = vadd.f32 %v1355_v7, %v1266_v51 }
 0x392   : >> { %v1501_v20 = vpop.f32.mrf.mxu2 }
 0x393   : >> { %v1404_v27 = vmul.f32 %v2572_v43, %v1356_v11  ;;  %v3757_v28 = vadd.f32 %v4180_v4, %v1501_v20   ;;  %v1115_v4 = vpop.xlane.xlu0 %1114 }
 0x394   : >> { %2587 = vrcp.f32 %v1115_v4 }
 0x395   : >> { %v4181_v62 = vmov %v3757_v28  ;;  %v1425_v25 = vpack.c.bf16 %v1404_v27, %v1403_v58  ;;  %2589 = vrcp.f32 %v1118_v13 }
 0x397   : >> { %1984 = vmatmul.msk.bf16.gmra.mxu2 %vm466_vm0, %v1425_v25 }
 0x398   : >> { %v1358_v2 = vpop.f32.mrf.mxu3 }
 0x399   : >> { %v1359_v0 = vadd.f32 %v1358_v2, %v3677_v26 }
 0x39a   : >> { %v1504_v1 = vpop.f32.mrf.mxu2 }
 0x39b   : >> { %v3761_v27 = vadd.f32 %v4182_v29, %v1504_v1   ;;  %v1405_v5 = vmul.f32 %v2576_v59, %v1359_v0  ;;  %v2588_v29 = vpop.eup %2587 }
 0x39d   : >> { %v4183_v37 = vmov %v3761_v27 }
 0x3a0   : >> { %v1360_v3 = vpop.f32.mrf.mxu3 }
 0x3a1   : >> { %v1361_v14 = vadd.f32 %v1360_v3, %v3682_v44  ;;  %v2590_v3 = vpop.eup %2589 }
 0x3a2   : >> { %v1506_v56 = vpop.f32.mrf.mxu2 }
 0x3a3   : >> { %v1406_v55 = vmul.f32 %v2578_v61, %v1361_v14  ;;  %v3766_v26 = vadd.f32 %v4184_v36, %v1506_v56   ;;  %v4196_v56 = vld [vmem:[#allocation22_spill] sm:$0xff]  ;;  %v1121_v36 = vpop.xlane.xlu2 %1120 }
 0x3a4   : >> { %2591 = vrcp.f32 %v1121_v36 }
 0x3a5   : >> { %v4185_v35 = vmov %v3766_v26  ;;  %v1426_v51 = vpack.c.bf16 %v1406_v55, %v1405_v5 }
 0x3a7   : >> { %1985 = vmatmul.msk.bf16.gmra.mxu2 %vm466_vm0, %v1426_v51 }
 0x3a8   : >> { %v1363_v60 = vpop.f32.mrf.mxu3 }
 0x3a9   : >> { %v1364_v44 = vadd.f32 %v1363_v60, %v3689_v47  ;;  %v4190_v47 = vld [vmem:[#allocation25_spill] sm:$0xff] }
 0x3aa   : >> { %v1509_v9 = vpop.f32.mrf.mxu2 }
 0x3ab   : >> { %v3770_v25 = vadd.f32 %v4186_v18, %v1509_v9   ;;  %v1407_v48 = vmul.f32 %v2580_v33, %v1364_v44  ;;  %v2592_v18 = vpop.eup %2591 }
 0x3ad   : >> { %v4187_v50 = vmov %v3770_v25 }
 0x3b0   : >> { %v1365_v24 = vpop.f32.mrf.mxu3 }
 0x3b1   : >> { %v1366_v32 = vadd.f32 %v1365_v24, %v3693_v17 }
 0x3b2   : >> { %v1511_v26 = vpop.f32.mrf.mxu2 }
 0x3b3   : >> { %v1408_v16 = vmul.f32 %v2582_v12, %v1366_v32  ;;  %v3775_v24 = vadd.f32 %v4188_v38, %v1511_v26   ;;  %v4200_v26 = vld [vmem:[#allocation20_spill] sm:$0xff] }
 0x3b5   : >> { %v4189_v49 = vmov %v3775_v24  ;;  %v1427_v10 = vpack.c.bf16 %v1408_v16, %v1407_v48 }
 0x3b7   : >> { %1986 = vmatmul.msk.bf16.gmra.mxu2 %vm466_vm0, %v1427_v10  ;;  %v4202_v10 = vld [vmem:[#allocation19_spill] sm:$0xff] }
 0x3b8   : >> { %v1368_v30 = vpop.f32.mrf.mxu3 }
 0x3b9   : >> { %v1369_v17 = vadd.f32 %v1368_v30, %v3695_v53  ;;  %v4194_v53 = vld [vmem:[#allocation23_spill] sm:$0xff] }
 0x3ba   : >> { %v1514_v23 = vpop.f32.mrf.mxu2 }
 0x3bb   : >> { %v3779_v23 = vadd.f32 %v4190_v47, %v1514_v23   ;;  %v1409_v43 = vmul.f32 %v2586_v46, %v1369_v17 }
 0x3bd   : >> { %v4191_v45 = vmov %v3779_v23  ;;  %v4208_v23 = vld [vmem:[#allocation16_spill] sm:$0xff] }
 0x3c0   : >> { %v1370_v28 = vpop.f32.mrf.mxu3 }
 0x3c1   : >> { %v1371_v31 = vadd.f32 %v1370_v28, %v3700_v15 }
 0x3c2   : >> { %v1516_v7 = vpop.f32.mrf.mxu2 }
 0x3c3   : >> { %v1410_v11 = vmul.f32 %v2584_v57, %v1371_v31  ;;  %v3784_v20 = vadd.f32 %v4192_v19, %v1516_v7   ;;  %v4210_v31 = vld [vmem:[#allocation15_spill] sm:$0xff] }
 0x3c5   : >> { %v4193_v58 = vmov %v3784_v20  ;;  %v1428_v27 = vpack.c.bf16 %v1410_v11, %v1409_v43  ;;  %v4212_v11 = vld [vmem:[#allocation14_spill] sm:$0xff] }
 0x3c7   : >> { %1987 = vmatmul.msk.bf16.gmra.mxu2 %vm466_vm0, %v1428_v27  ;;  %v4216_v27 = vld [vmem:[#allocation12_spill] sm:$0xff] }
 0x3c8   : >> { %v1373_v25 = vpop.f32.mrf.mxu3 }
 0x3c9   : >> { %v1374_v15 = vadd.f32 %v1373_v25, %v3702_v54  ;;  %v4198_v54 = vld [vmem:[#allocation21_spill] sm:$0xff]  ;;  %v4218_v25 = vld [vmem:[#allocation11_spill] sm:$0xff] }
 0x3ca   : >> { %v1519_v2 = vpop.f32.mrf.mxu2 }
 0x3cb   : >> { %v3788_v21 = vadd.f32 %v4194_v53, %v1519_v2   ;;  %v1411_v14 = vmul.f32 %v2588_v29, %v1374_v15 }
 0x3cd   : >> { %v4195_v40 = vmov %v3788_v21  ;;  %v1124_v21 = vpop.xlane.xlu0 %1123 }
 0x3ce   : >> { %2593 = vrcp.f32 %v1124_v21 }
 0x3d0   : >> { %v1375_v1 = vpop.f32.mrf.mxu3 }
 0x3d1   : >> { %v1376_v0 = vadd.f32 %v1375_v1, %v3707_v39  ;;  %v4222_v1 = vld [vmem:[#allocation9_spill] sm:$0xff] }
 0x3d2   : >> { %v1521_v59 = vpop.f32.mrf.mxu2 }
 0x3d3   : >> { %v1412_v61 = vmul.f32 %v2590_v3, %v1376_v0  ;;  %v3793_v20 = vadd.f32 %v4196_v56, %v1521_v59   ;;  %v4224_v0 = vld [vmem:[#allocation8_spill] sm:$0xff] }
 0x3d4   : >> { %v2594_v24 = vpop.eup %2593 }
 0x3d5   : >> { %v4197_v55 = vmov %v3793_v20  ;;  %v1429_v5 = vpack.c.bf16 %v1412_v61, %v1411_v14 }
 0x3d7   : >> { %1988 = vmatmul.msk.bf16.gmra.mxu2 %vm466_vm0, %v1429_v5 }
 0x3d8   : >> { %v1378_v51 = vpop.f32.mrf.mxu3 }
 0x3d9   : >> { %v1379_v39 = vadd.f32 %v1378_v51, %v3712_v22  ;;  %v4204_v22 = vld [vmem:[#allocation18_spill] sm:$0xff] }
 0x3da   : >> { %v1524_v60 = vpop.f32.mrf.mxu2 }
 0x3db   : >> { %v3797_v19 = vadd.f32 %v4198_v54, %v1524_v60   ;;  %v1413_v32 = vmul.f32 %v2592_v18, %v1379_v39 }
 0x3dd   : >> { %v4199_v63 = vmov %v3797_v19  ;;  %v4214_v19 = vld [vmem:[#allocation13_spill] sm:$0xff] }
 0x3e0   : >> { %v1380_v9 = vpop.f32.mrf.mxu3 }
 0x3e1   : >> { %v1381_v44 = vadd.f32 %v1380_v9, %v3714_v34  ;;  %v4206_v34 = vld [vmem:[#allocation17_spill] sm:$0xff] }
 0x3e2   : >> { %v1526_v33 = vpop.f32.mrf.mxu2 }
 0x3e3   : >> { %v1414_v12 = vmul.f32 %v2594_v24, %v1381_v44  ;;  %v3802_v18 = vadd.f32 %v4200_v26, %v1526_v33   ;;  %v4230_v24 = vld [vmem:[#allocation5_spill] sm:$0xff] }
 0x3e5   : >> { %v4201_v48 = vmov %v3802_v18  ;;  %v1430_v16 = vpack.c.bf16 %v1414_v12, %v1413_v32  ;;  %v4228_v18 = vld [vmem:[#allocation6_spill] sm:$0xff] }
 0x3e7   : >> { %1989 = vmatmul.msk.bf16.gmra.mxu2 %vm466_vm0, %v1430_v16 }
 0x3ea   : >> { %v1529_v38 = vpop.f32.mrf.mxu2 }
 0x3eb   : >> { %v3806_v17 = vadd.f32 %v4202_v10, %v1529_v38  }
 0x3ed   : >> { %v4203_v47 = vmov %v3806_v17 }
 0x3f2   : >> { %v1531_v6 = vpop.f32.mrf.mxu2 }
 0x3f3   : >> { %v3809_v16 = vadd.f32 %v4204_v22, %v1531_v6   ;;  %v4267_v22 = vmov %v4193_v58 }
 0x3f5   : >> { %v4205_v57 = vmov %v3809_v16  ;;  %v4235_v16 = vld [vmem:[#allocation3_spill] sm:$0xff] }
 0x3fa   : >> { %v1534_v30 = vpop.f32.mrf.mxu2 }
 0x3fb   : >> { %v3812_v15 = vadd.f32 %v4206_v34, %v1534_v30   ;;  %v4275_v30 = vmov %v4177_v42 }
 0x3fd   : >> { %v4207_v46 = vmov %v3812_v15  ;;  %v4220_v15 = vld [vmem:[#allocation10_spill] sm:$0xff] }
 0x402   : >> { %v1536_v8 = vpop.f32.mrf.mxu2 }
 0x403   : >> { %v3815_v14 = vadd.f32 %v4208_v23, %v1536_v8   ;;  %v4268_v23 = vmov %v4191_v45 }
 0x405   : >> { %v4209_v43 = vmov %v3815_v14  ;;  %v4226_v14 = vld [vmem:[#allocation7_spill] sm:$0xff] }
 0x40a   : >> { %v1539_v28 = vpop.f32.mrf.mxu2 }
 0x40b   : >> { %v3818_v13 = vadd.f32 %v4210_v31, %v1539_v28   ;;  %v4273_v28 = vmov %v4181_v62  ;;  %v4276_v31 = vld [vmem:[#allocation50_spill] sm:$0xff] }
 0x40d   : >> { %v4211_v53 = vmov %v3818_v13 }
 0x412   : >> { %v1541_v7 = vpop.f32.mrf.mxu2 }
 0x413   : >> { %v3821_v12 = vadd.f32 %v4212_v11, %v1541_v7  }
 0x415   : >> { %v4213_v59 = vmov %v3821_v12  ;;  %v4232_v12 = vld [vmem:[#allocation4_spill] sm:$0xff] }
 0x41a   : >> { %v1544_v17 = vpop.f32.mrf.mxu2 }
 0x41b   : >> { %v3824_v11 = vadd.f32 %v4214_v19, %v1544_v17   ;;  %v4262_v17 = vmov %v4203_v47  ;;  %v4264_v19 = vmov %v4199_v63 }
 0x41d   : >> { %v4215_v61 = vmov %v3824_v11 }
 0x41e   : >> { %v4256_v11 = vmov %v4215_v61 }
 0x422   : >> { %v1546_v20 = vpop.f32.mrf.mxu2 }
 0x423   : >> { %v3827_v10 = vadd.f32 %v4216_v27, %v1546_v20   ;;  %v4265_v20 = vmov %v4197_v55  ;;  %v4272_v27 = vmov %v4183_v37 }
 0x425   : >> { %v4217_v56 = vmov %v3827_v10 }
 0x42a   : >> { %v1549_v4 = vpop.f32.mrf.mxu2 }
 0x42b   : >> { %v3830_v9 = vadd.f32 %v4218_v25, %v1549_v4   ;;  %v4270_v25 = vmov %v4187_v50 }
 0x42d   : >> { %v4219_v36 = vmov %v3830_v9 }
 0x432   : >> { %v1551_v2 = vpop.f32.mrf.mxu2 }
 0x433   : >> { %v3833_v8 = vadd.f32 %v4220_v15, %v1551_v2   ;;  %v4260_v15 = vmov %v4207_v46 }
 0x435   : >> { %v4221_v51 = vmov %v3833_v8 }
 0x436   : >> { %v4253_v8 = vmov %v4221_v51 }
 0x43a   : >> { %v1554_v13 = vpop.f32.mrf.mxu2 }
 0x43b   : >> { %v3836_v7 = vadd.f32 %v4222_v1, %v1554_v13   ;;  %v4258_v13 = vmov %v4211_v53 }
 0x43d   : >> { %v4223_v60 = vmov %v3836_v7 }
 0x43e   : >> { %v4252_v7 = vmov %v4223_v60 }
 0x442   : >> { %v1556_v29 = vpop.f32.mrf.mxu2 }
 0x443   : >> { %v3839_v6 = vadd.f32 %v4224_v0, %v1556_v29   ;;  %v4274_v29 = vmov %v4179_v52 }
 0x445   : >> { %v4225_v54 = vmov %v3839_v6  ;;  %v4238_v6 = vld [vmem:[#allocation2_spill] sm:$0xff] }
 0x44a   : >> { %v1559_v3 = vpop.f32.mrf.mxu2 }
 0x44b   : >> { %v3842_v5 = vadd.f32 %v4226_v14, %v1559_v3   ;;  %v4259_v14 = vmov %v4209_v43 }
 0x44d   : >> { %v4227_v39 = vmov %v3842_v5 }
 0x44e   : >> { %v4250_v5 = vmov %v4227_v39 }
 0x452   : >> { %v1561_v21 = vpop.f32.mrf.mxu2 }
 0x453   : >> { %v3845_v4 = vadd.f32 %v4228_v18, %v1561_v21   ;;  %v4263_v18 = vmov %v4201_v48  ;;  %v4266_v21 = vmov %v4195_v40 }
 0x455   : >> { %v4229_v44 = vmov %v3845_v4 }
 0x456   : >> { %v4249_v4 = vmov %v4229_v44 }
 0x45a   : >> { %v1564_v9 = vpop.f32.mrf.mxu2 }
 0x45b   : >> { %v3848_v3 = vadd.f32 %v4230_v24, %v1564_v9   ;;  %v4254_v9 = vmov %v4219_v36  ;;  %v4269_v24 = vmov %v4189_v49 }
 0x45d   : >> { %v4231_v33 = vmov %v3848_v3 }
 0x45e   : >> { %v4248_v3 = vmov %v4231_v33 }
 0x462   : >> { %v1566_v32 = vpop.f32.mrf.mxu2 }
 0x463   : >> { %v3851_v2 = vadd.f32 %v4232_v12, %v1566_v32   ;;  %v4257_v12 = vmov %v4213_v59  ;;  %v2595_v32 = vld [vmem:[%s4078_s2] ss:$0 sm:$0xff] (%p3862_p5) }
 0x464   : > { %v1611_v31 = vadd.f32 (%p3862_p5), %v2595_v32, %v4177_v42  ;;  %v1613_v5 = vadd.f32 (%p3862_p5), %v2595_v32, %v4181_v62  ;;  %v1614_v22 = vadd.f32 (%p3862_p5), %v2595_v32, %v4183_v37  ;;  %v1615_v30 = vadd.f32 (%p3862_p5), %v2595_v32, %v4185_v35 }
 0x465   : >> { %4233 = vst [vmem:[#allocation51_spill] sm:$0xff] %v3851_v2  ;;  %v4246_v38 = vmov %v3851_v2  ;;  %v1617_v42 = vadd.f32 (%p3862_p5), %v2595_v32, %v4189_v49  ;;  %v1619_v62 = vadd.f32 (%p3862_p5), %v2595_v32, %v4193_v58  ;;  %v1620_v37 = vadd.f32 (%p3862_p5), %v2595_v32, %v4195_v40 }
 0x466   : >> { %v4247_v2 = vmov %v4246_v38  ;;  %v1612_v38 = vadd.f32 (%p3862_p5), %v2595_v32, %v4179_v52  ;;  %1644 = vst.msk [vmem:[%s2930_s22 + $0x8] sm:$0xff] (%p3862_p5), %vm1642_vm2, %v1611_v31  ;;  %v1618_v52 = vadd.f32 (%p3862_p5), %v2595_v32, %v4191_v45  ;;  %v1623_v49 = vadd.f32 (%p3862_p5), %v2595_v32, %v4201_v48 }
 0x467   : > { %1646 = vst.msk [vmem:[%s2930_s22 + $0x18] sm:$0xff] (%p3862_p5), %vm1642_vm2, %v1613_v5  ;;  %v1624_v45 = vadd.f32 (%p3862_p5), %v2595_v32, %v4203_v47  ;;  %v1625_v58 = vadd.f32 (%p3862_p5), %v2595_v32, %v4205_v57  ;;  %v1626_v40 = vadd.f32 (%p3862_p5), %v2595_v32, %v4207_v46  ;;  %v1629_v48 = vadd.f32 (%p3862_p5), %v2595_v32, %v4213_v59 }
 0x468   : > { %1645 = vst.msk [vmem:[%s2930_s22 + $0x10] sm:$0xff] (%p3862_p5), %vm1642_vm2, %v1612_v38  ;;  %v1630_v47 = vadd.f32 (%p3862_p5), %v2595_v32, %v4215_v61  ;;  %v1632_v46 = vadd.f32 (%p3862_p5), %v2595_v32, %v4219_v36  ;;  %v1633_v8 = vadd.f32 (%p3862_p5), %v2595_v32, %v4221_v51  ;;  %v1634_v23 = vadd.f32 (%p3862_p5), %v2595_v32, %v4223_v60 }
 0x469   : > { %1647 = vst.msk [vmem:[%s2930_s22 + $0x20] sm:$0xff] (%p3862_p5), %vm1642_vm2, %v1614_v22  ;;  %v1636_v28 = vadd.f32 (%p3862_p5), %v2595_v32, %v4227_v39  ;;  %v1638_v7 = vadd.f32 (%p3862_p5), %v2595_v32, %v4231_v33 }
 0x46a   : >> { %v1569_v26 = vpop.f32.mrf.mxu2  ;;  %1648 = vst.msk [vmem:[%s2930_s22 + $0x28] sm:$0xff] (%p3862_p5), %vm1642_vm2, %v1615_v30 }
 0x46b   : >> { %v3854_v1 = vadd.f32 %v4235_v16, %v1569_v26   ;;  %v4261_v16 = vmov %v4205_v57  ;;  %v4271_v26 = vmov %v4185_v35  ;;  %1650 = vst.msk [vmem:[%s2930_s22 + $0x38] sm:$0xff] (%p3862_p5), %vm1642_vm2, %v1617_v42  ;;  %v1621_v35 = vadd.f32 (%p3862_p5), %v2595_v32, %v4197_v55 }
 0x46c   : > { %1651 = vst.msk [vmem:[%s2930_s22 + $0x40] sm:$0xff] (%p3862_p5), %vm1642_vm2, %v1618_v52  ;;  %v1627_v55 = vadd.f32 (%p3862_p5), %v2595_v32, %v4209_v43  ;;  %v1631_v57 = vadd.f32 (%p3862_p5), %v2595_v32, %v4217_v56  ;;  %v1635_v43 = vadd.f32 (%p3862_p5), %v2595_v32, %v4225_v54  ;;  %v4279_v11 = vld [vmem:[#allocation51_spill] sm:$0xff] (%p3862_p5) }
 0x46d   : >> { %4236 = vst [vmem:[#allocation52_spill] sm:$0xff] %v3854_v1  ;;  %v4244_v34 = vmov %v3854_v1  ;;  %v1639_v59 = vadd.f32 (%p3862_p5), %v2595_v32, %v4279_v11 }
 0x46e   : >> { %v4245_v1 = vmov %v4244_v34  ;;  %1652 = vst.msk [vmem:[%s2930_s22 + $0x48] sm:$0xff] (%p3862_p5), %vm1642_vm2, %v1619_v62 }
 0x46f   : > { %1653 = vst.msk [vmem:[%s2930_s22 + $0x50] sm:$0xff] (%p3862_p5), %vm1642_vm2, %v1620_v37 }
 0x470   : > { %1654 = vst.msk [vmem:[%s2930_s22 + $0x58] sm:$0xff] (%p3862_p5), %vm1642_vm2, %v1621_v35 }
 0x471   : > { %1656 = vst.msk [vmem:[%s2930_s22 + $0x68] sm:$0xff] (%p3862_p5), %vm1642_vm2, %v1623_v49 }
 0x472   : >> { %v1571_v10 = vpop.f32.mrf.mxu2  ;;  %200 = sbr.rel (!%p3862_p5) target bundleno = 20 (0x14), region = 72  ;;  %1657 = vst.msk [vmem:[%s2930_s22 + $0x70] sm:$0xff] (%p3862_p5), %vm1642_vm2, %v1624_v45 }
 0x473   : >> { %v3857_v0 = vadd.f32 %v4238_v6, %v1571_v10   ;;  %v4251_v6 = vmov %v4225_v54  ;;  %v4255_v10 = vmov %v4217_v56  ;;  %1658 = vst.msk [vmem:[%s2930_s22 + $0x78] sm:$0xff] (%p3862_p5), %vm1642_vm2, %v1625_v58 }
 0x474   : > { %1659 = vst.msk [vmem:[%s2930_s22 + $0x80] sm:$0xff] (%p3862_p5), %vm1642_vm2, %v1626_v40  ;;  %v4280_v17 = vld [vmem:[#allocation52_spill] sm:$0xff] (%p3862_p5) }
 0x475   : >> { %4239 = vst [vmem:[#allocation53_spill] sm:$0xff] %v3857_v0  ;;  %v4242_v41 = vmov %v3857_v0  ;;  %v1640_v19 = vadd.f32 (%p3862_p5), %v2595_v32, %v4280_v17 }
 0x476   : >> { %v4243_v0 = vmov %v4242_v41  ;;  %v4278_v41 = vld [vmem:[#allocation50_spill] sm:$0xff] (%p3862_p5)  ;;  %1660 = vst.msk [vmem:[%s2930_s22 + $0x88] sm:$0xff] (%p3862_p5), %vm1642_vm2, %v1627_v55 }
 0x477   : > { %v1610_v34 = vadd.f32 %v2595_v32, %v4278_v41  ;;  %v1616_v41 = vadd.f32 %v2595_v32, %v4187_v50  ;;  %v1622_v50 = vadd.f32 %v2595_v32, %v4199_v63  ;;  %v1628_v63 = vadd.f32 %v2595_v32, %v4211_v53  ;;  %1662 = vst.msk [vmem:[%s2930_s22 + $0x98] sm:$0xff] %vm1642_vm2, %v1629_v48 }
 0x478   : > { %1663 = vst.msk [vmem:[%s2930_s22 + $0xa0] sm:$0xff] %vm1642_vm2, %v1630_v47  ;;  %v1637_v53 = vadd.f32 %v2595_v32, %v4229_v44 }
 0x479   : > { %1643 = vst.msk [vmem:[%s2930_s22] sm:$0xff] %vm1642_vm2, %v1610_v34 }
 0x47a   : > { %1649 = vst.msk [vmem:[%s2930_s22 + $0x30] sm:$0xff] %vm1642_vm2, %v1616_v41 }
 0x47b   : > { %1655 = vst.msk [vmem:[%s2930_s22 + $0x60] sm:$0xff] %vm1642_vm2, %v1622_v50 }
 0x47c   : > { %1661 = vst.msk [vmem:[%s2930_s22 + $0x90] sm:$0xff] %vm1642_vm2, %v1628_v63  ;;  %v4281_v61 = vld [vmem:[#allocation53_spill] sm:$0xff] }
 0x47d   : > { %1664 = vst.msk [vmem:[%s2930_s22 + $0xa8] sm:$0xff] %vm1642_vm2, %v1631_v57  ;;  %v1641_v20 = vadd.f32 %v2595_v32, %v4281_v61 }
 0x47e   : > { %1665 = vst.msk [vmem:[%s2930_s22 + $0xb0] sm:$0xff] %vm1642_vm2, %v1632_v46 }
 0x47f   : > { %1666 = vst.msk [vmem:[%s2930_s22 + $0xb8] sm:$0xff] %vm1642_vm2, %v1633_v8 }
 0x480   : > { %1667 = vst.msk [vmem:[%s2930_s22 + $0xc0] sm:$0xff] %vm1642_vm2, %v1634_v23 }
 0x481   : > { %1668 = vst.msk [vmem:[%s2930_s22 + $0xc8] sm:$0xff] %vm1642_vm2, %v1635_v43 }
 0x482   : > { %1669 = vst.msk [vmem:[%s2930_s22 + $0xd0] sm:$0xff] %vm1642_vm2, %v1636_v28 }
 0x483   : > { %1670 = vst.msk [vmem:[%s2930_s22 + $0xd8] sm:$0xff] %vm1642_vm2, %v1637_v53 }
 0x484   : > { %1671 = vst.msk [vmem:[%s2930_s22 + $0xe0] sm:$0xff] %vm1642_vm2, %v1638_v7 }
 0x485   : > { %1672 = vst.msk [vmem:[%s2930_s22 + $0xe8] sm:$0xff] %vm1642_vm2, %v1639_v59 }
 0x486   : > { %1673 = vst.msk [vmem:[%s2930_s22 + $0xf0] sm:$0xff] %vm1642_vm2, %v1640_v19 }
 0x487   : > { %1674 = vst.msk [vmem:[%s2930_s22 + $0xf8] sm:$0xff] %vm1642_vm2, %v1641_v20 }
 0x488 PF: > { %s13_s14 = sadd.s32 1, %s2750_s14   ;;  %s4282_s12 = smov %s2746_s13 }
 0x489   : > { %p10_p6 = scmp.ge.s32.totalorder %s13_s14, 4   ;;  %s4283_s13 = smov %s4285_s15 }
 0x48b   :  { %12 = sbr.rel (!%p10_p6) target bundleno = 2 (0x2), region = 83 }

// kernel: tpu_custom_call.1
= control target key start
LH: loop header
LB: loop body
LE: loop exit
PB: predicated region body
PF: predicated region fallthrough
CT: control target
= control target key end

     0   :  { %s2902_s12 = smov 0   ;;  %s2904_s13 = smov 0   ;;  %s4074_s0 = inlined_call_operand.vmem [shape: bf16[2,2,256,2], index: 0, kind: input, shape index: {}]   ;;  %s4075_s1 = inlined_call_operand.vmem [shape: bf16[2,2,4], index: 1, kind: input, shape index: {}]   ;;  %s4076_s2 = inlined_call_operand.vmem [shape: f32[1,4], index: 2, kind: input, shape index: {}]   ;;  %s4077_s3 = inlined_call_operand.vmem [shape: f32[2,256,4], index: 3, kind: output, shape index: {}]  }
   0x1   :  { %s2906_s14 = smov 0  }
   0x2 LB: > { %s25_s15 = sadd.s32 1, %s2744_s13  ;;  %p1868_p0 = scmp.ge.s32.totalorder %s2748_s14, 1  ;;  %s2748_s14 = sphi %s2906_s14, %s13_s14   ;;  %s2744_s13 = sphi %s2904_s13, %s4281_s13   ;;  %s2740_s12 = sphi %s2902_s12, %s4280_s12  }
   0x3   : > { %p27_p1 = scmp.ge.s32.totalorder %s25_s15, 2  ;;  %p151_p2 = scmp.lt.s32.totalorder %s2748_s14, 3 }
   0x5   : > { %s4283_s15 = smov (%p27_p1, %s25_s15), 0  ;;  %p152_p3 = pnand %p1868_p0, %p151_p2 }
   0x7   : > { %155 = sbr.rel (%p152_p3) target bundleno = 1160 (0x488), region = 32 }
   0xc   : > { %p179_p4 = scmp.lt.s32.totalorder %s2740_s12, 1  ;;  %v2930_v0 = vmov 0.0   ;;  %v2932_v1 = vmov 0.0   ;;  %v2934_v2 = vmov 0.0   ;;  %v2936_v3 = vmov 0.0   ;;  %s2994_s23 = smov 0  }
   0xd   : > { %v2938_v4 = vmov 0.0   ;;  %v2940_v5 = vmov 0.0   ;;  %v2942_v6 = vmov 0.0   ;;  %v2944_v7 = vmov 0.0  }
   0xe   : > { %s4285_s12 = smov (!%p179_p4, %s2740_s12), 1  ;;  %v2946_v8 = vmov 0.0   ;;  %v2948_v9 = vmov 0.0   ;;  %v2950_v10 = vmov 0.0   ;;  %v2952_v11 = vmov 0.0  }
   0xf   : > { %s1990_s16 = sshll.u32 %s4285_s12, 8  ;;  %v2954_v12 = vmov 0.0   ;;  %v2956_v13 = vmov 0.0   ;;  %v2958_v14 = vmov 0.0   ;;  %v2960_v15 = vmov 0.0  }
  0x10   : > { %s2923_s19 = scalar_lea.vmem %s4074_s0, %s1990_s16  ;;  %s2928_s22 = scalar_lea.vmem %s4077_s3, %s1990_s16  ;;  %v2962_v16 = vmov 0.0   ;;  %v2964_v17 = vmov 0.0   ;;  %v2966_v18 = vmov 0.0   ;;  %v2968_v19 = vmov 0.0  }
  0x11   : > { %v2970_v20 = vmov 0.0   ;;  %v2972_v21 = vmov 0.0   ;;  %v2974_v22 = vmov 0.0   ;;  %v2976_v23 = vmov 0.0  }
  0x12   : > { %v2978_v24 = vmov 0.0   ;;  %v2980_v25 = vmov 0.0   ;;  %v2982_v26 = vmov 0.0   ;;  %v2984_v27 = vmov 0.0  }
  0x13   : > { %v2986_v28 = vmov 0.0   ;;  %v2988_v29 = vmov 0.0   ;;  %v2990_v30 = vmov 0.0   ;;  %v2992_v31 = vmov 0.0  }
  0x14 LB: >> { %4098 = vst [vmem:[#allocation2_spill] sm:$0xff] %v2752_v0  ;;  %s1992_s24 = sshll.u32 %s2880_s23, 7  ;;  %vm466_vm0 = vcmask 15360   ;;  %s1431_s28 = scalar_lea.vmem %s4075_s1, %s2880_s23  ;;  %vm1481_vm1 = vcmask 1040384   ;;  %s2880_s23 = sphi %s2994_s23, %s4275_s23   ;;  %v2876_v31 = vphi %v2992_v31, %v4274_v31   ;;  %v2872_v30 = vphi %v2990_v30, %v4273_v30   ;;  %v2868_v29 = vphi %v2988_v29, %v4272_v29   ;;  %v2864_v28 = vphi %v2986_v28, %v4271_v28   ;;  %v2860_v27 = vphi %v2984_v27, %v4270_v27   ;;  %v2856_v26 = vphi %v2982_v26, %v4269_v26   ;;  %v2852_v25 = vphi %v2980_v25, %v4268_v25   ;;  %v2848_v24 = vphi %v2978_v24, %v4267_v24   ;;  %v2844_v23 = vphi %v2976_v23, %v4266_v23   ;;  %v2840_v22 = vphi %v2974_v22, %v4265_v22   ;;  %v2836_v21 = vphi %v2972_v21, %v4264_v21   ;;  %v2832_v20 = vphi %v2970_v20, %v4263_v20   ;;  %v2828_v19 = vphi %v2968_v19, %v4262_v19   ;;  %v2824_v18 = vphi %v2966_v18, %v4261_v18   ;;  %v2820_v17 = vphi %v2964_v17, %v4260_v17   ;;  %v2816_v16 = vphi %v2962_v16, %v4259_v16   ;;  %v2812_v15 = vphi %v2960_v15, %v4258_v15   ;;  %v2808_v14 = vphi %v2958_v14, %v4257_v14   ;;  %v2804_v13 = vphi %v2956_v13, %v4256_v13   ;;  %v2800_v12 = vphi %v2954_v12, %v4255_v12   ;;  %v2796_v11 = vphi %v2952_v11, %v4254_v11   ;;  %v2792_v10 = vphi %v2950_v10, %v4253_v10   ;;  %v2788_v9 = vphi %v2948_v9, %v4252_v9   ;;  %v2784_v8 = vphi %v2946_v8, %v4251_v8   ;;  %v2780_v7 = vphi %v2944_v7, %v4250_v7   ;;  %v2776_v6 = vphi %v2942_v6, %v4249_v6   ;;  %v2772_v5 = vphi %v2940_v5, %v4248_v5   ;;  %v2768_v4 = vphi %v2938_v4, %v4247_v4   ;;  %v2764_v3 = vphi %v2936_v3, %v4246_v3   ;;  %v2760_v2 = vphi %v2934_v2, %v4245_v2   ;;  %v2756_v1 = vphi %v2932_v1, %v4243_v1   ;;  %v2752_v0 = vphi %v2930_v0, %v4241_v0  }
  0x15   : >> { %4099 = vst [vmem:[#allocation3_spill] sm:$0xff] %v2756_v1  ;;  %s3097_s25 = scalar_lea.vmem %s2923_s19, %s1992_s24  ;;  %s201_s29 = sadd.s32 1, %s2880_s23  }
  0x16   : >> { %4100 = vst [vmem:[#allocation4_spill] sm:$0xff] %v2760_v2  ;;  %v3100_v32 = vld [vmem:[%s3097_s25 + $0x38] sm:$0xff]  ;;  %v3109_v36 = vld [vmem:[%s3097_s25 + $0x30] sm:$0xff]  ;;  %v3118_v40 = vld [vmem:[%s3097_s25 + $0x28] sm:$0xff]  ;;  %p3860_p5 = scmp.ge.s32.totalorder %s201_s29, 2   ;;  %s4275_s23 = smov %s201_s29 }
  0x17   : >> { %4101 = vst [vmem:[#allocation5_spill] sm:$0xff] %v2764_v3  ;;  %v2008_v33 = vld [vmem:[%s3097_s25 + $0x78] sm:$0xff]  ;;  %v537_v34 = vsel %vm466_vm0, %v3100_v32, 0  ;;  %2091 = vmatpush.bf16.msra.mxu3 %v3100_v32  ;;  %2090 = vmatpush.bf16.msra.mxu2 %v3100_v32  ;;  %v2007_v37 = vld [vmem:[%s3097_s25 + $0x70] sm:$0xff]  ;;  %v534_v38 = vsel %vm466_vm0, %v3109_v36, 0  ;;  %v2006_v41 = vld [vmem:[%s3097_s25 + $0x68] sm:$0xff] }
  0x18   : >> { %4102 = vst [vmem:[#allocation6_spill] sm:$0xff] %v2768_v4  ;;  %v561_v35 = vsel %vm466_vm0, %v2008_v33, 0  ;;  %563 = vmatpush.bf16.xpose.msra.mxu0 %v537_v34  ;;  %v558_v39 = vsel %vm466_vm0, %v2007_v37, 0  ;;  %v3124_v42 = vld [vmem:[%s3097_s25 + $0x20] sm:$0xff]  ;;  %v531_v43 = vsel %vm466_vm0, %v3118_v40, 0  ;;  %v555_v44 = vsel %vm466_vm0, %v2006_v41, 0 }
  0x19   : >> { %4103 = vst [vmem:[#allocation7_spill] sm:$0xff] %v2772_v5  ;;  %652 = vmatpush.bf16.xpose.msra.mxu1 %v561_v35  ;;  %v3132_v45 = vld [vmem:[%s3097_s25 + $0x18] sm:$0xff]  ;;  %v2005_v46 = vld [vmem:[%s3097_s25 + $0x60] sm:$0xff]  ;;  %v3138_v47 = vld [vmem:[%s3097_s25 + $0x10] sm:$0xff]  ;;  %v528_v48 = vsel %vm466_vm0, %v3124_v42, 0  ;;  %vm1642_vm2 = vcmask (%p3860_p5), 31744  }
  0x1a   : >> { %4104 = vst [vmem:[#allocation8_spill] sm:$0xff] %v2776_v6  ;;  %v552_v49 = vsel %vm466_vm0, %v2005_v46, 0  ;;  %v3146_v50 = vld [vmem:[%s3097_s25 + $0x8] sm:$0xff]  ;;  %v2004_v51 = vld [vmem:[%s3097_s25 + $0x58] sm:$0xff]  ;;  %v3152_v52 = vld [vmem:[%s3097_s25] sm:$0xff]  ;;  %v525_v53 = vsel %vm466_vm0, %v3132_v45, 0 }
  0x1b   : >> { %4105 = vst [vmem:[#allocation9_spill] sm:$0xff] %v2780_v7  ;;  %2094 = vmatpush.bf16.msra.mxu3 %v3109_v36  ;;  %2093 = vmatpush.bf16.msra.mxu2 %v3109_v36  ;;  %v549_v54 = vsel %vm466_vm0, %v2004_v51, 0  ;;  %v2003_v55 = vld [vmem:[%s3097_s25 + $0x50] sm:$0xff]  ;;  %v522_v56 = vsel %vm466_vm0, %v3138_v47, 0  ;;  %v2002_v58 = vld [vmem:[%s3097_s25 + $0x48] sm:$0xff]  ;;  %v519_v59 = vsel %vm466_vm0, %v3146_v50, 0 }
  0x1c   : >> { %4106 = vst [vmem:[#allocation10_spill] sm:$0xff] %v2784_v8  ;;  %v546_v57 = vsel %vm466_vm0, %v2003_v55, 0  ;;  %v543_v60 = vsel %vm466_vm0, %v2002_v58, 0  ;;  %v2011_v61 = vld [vmem:[%s3097_s25] sm:$0xff]   ;;  %v516_v34 = vsel %vm466_vm0, %v3152_v52, 0  ;;  %v2088_v1 = vld [vmem:[%s3097_s25 + $0x78] sm:$0xff]  }
  0x1d   : >> { %4107 = vst [vmem:[#allocation11_spill] sm:$0xff] %v2788_v9  ;;  %v2001_v62 = vld [vmem:[%s3097_s25 + $0x40] sm:$0xff]  ;;  %v2012_v63 = vunpack.c.l.bf16 %v2011_v61  ;;  %v2073_v2 = vunpack.c.h.bf16 %v2088_v1 }
  0x1e   : >> { %4108 = vst [vmem:[#allocation12_spill] sm:$0xff] %v2792_v10  ;;  %v540_v35 = vsel %vm466_vm0, %v2001_v62, 0 }
  0x1f   : >> { %4109 = vst [vmem:[#allocation13_spill] sm:$0xff] %v2796_v11  ;;  %2097 = vmatpush.bf16.msra.mxu3 %v3118_v40  ;;  %2096 = vmatpush.bf16.msra.mxu2 %v3118_v40  ;;  %v369_v5 = vmul.f32 0.70703125, %v2073_v2 }
  0x20   : >> { %4110 = vst [vmem:[#allocation14_spill] sm:$0xff] %v2800_v12  ;;  %564 = vmatpush.bf16.xpose.msra.mxu0 %v534_v38 }
  0x21   : >> { %4111 = vst [vmem:[#allocation15_spill] sm:$0xff] %v2804_v13  ;;  %653 = vmatpush.bf16.xpose.msra.mxu1 %v558_v39 }
  0x22   : >> { %4112 = vst [vmem:[#allocation16_spill] sm:$0xff] %v2808_v14 }
  0x23   : >> { %4113 = vst [vmem:[#allocation17_spill] sm:$0xff] %v2812_v15  ;;  %2100 = vmatpush.bf16.msra.mxu3 %v3124_v42  ;;  %2099 = vmatpush.bf16.msra.mxu2 %v3124_v42 }
  0x24   : >> { %4114 = vst [vmem:[#allocation18_spill] sm:$0xff] %v2816_v16 }
  0x25   : >> { %4115 = vst [vmem:[#allocation19_spill] sm:$0xff] %v2820_v17 }
  0x26   : >> { %4116 = vst [vmem:[#allocation20_spill] sm:$0xff] %v2824_v18 }
  0x27   : >> { %4117 = vst [vmem:[#allocation21_spill] sm:$0xff] %v2828_v19  ;;  %2103 = vmatpush.bf16.msra.mxu3 %v3132_v45  ;;  %2102 = vmatpush.bf16.msra.mxu2 %v3132_v45 }
  0x28   : >> { %4118 = vst [vmem:[#allocation22_spill] sm:$0xff] %v2832_v20  ;;  %565 = vmatpush.bf16.xpose.msra.mxu0 %v531_v43 }
  0x29   : >> { %4119 = vst [vmem:[#allocation23_spill] sm:$0xff] %v2836_v21  ;;  %654 = vmatpush.bf16.xpose.msra.mxu1 %v555_v44 }
  0x2a   : >> { %4120 = vst [vmem:[#allocation24_spill] sm:$0xff] %v2840_v22 }
  0x2b   : >> { %4121 = vst [vmem:[#allocation25_spill] sm:$0xff] %v2844_v23  ;;  %2106 = vmatpush.bf16.msra.mxu3 %v3138_v47  ;;  %2105 = vmatpush.bf16.msra.mxu2 %v3138_v47 }
  0x2c   : >> { %4122 = vst [vmem:[#allocation26_spill] sm:$0xff] %v2848_v24 }
  0x2d   : >> { %4123 = vst [vmem:[#allocation27_spill] sm:$0xff] %v2852_v25 }
  0x2e   : >> { %4124 = vst [vmem:[#allocation28_spill] sm:$0xff] %v2856_v26 }
  0x2f   : >> { %4125 = vst [vmem:[#allocation29_spill] sm:$0xff] %v2860_v27  ;;  %2109 = vmatpush.bf16.msra.mxu3 %v3146_v50  ;;  %2108 = vmatpush.bf16.msra.mxu2 %v3146_v50 }
  0x30   : >> { %4126 = vst [vmem:[#allocation30_spill] sm:$0xff] %v2864_v28  ;;  %566 = vmatpush.bf16.xpose.msra.mxu0 %v528_v48 }
  0x31   : >> { %4127 = vst [vmem:[#allocation31_spill] sm:$0xff] %v2868_v29  ;;  %655 = vmatpush.bf16.xpose.msra.mxu1 %v552_v49 }
  0x32   : >> { %4128 = vst [vmem:[#allocation32_spill] sm:$0xff] %v2872_v30 }
  0x33   : >> { %4129 = vst [vmem:[#allocation33_spill] sm:$0xff] %v2876_v31  ;;  %2112 = vmatpush.bf16.msra.mxu3 %v3152_v52  ;;  %2111 = vmatpush.bf16.msra.mxu2 %v3152_v52 }
  0x37   : >> { %1294 = vmatpush.bf16.msrb.mxu3 %v2008_v33  ;;  %v2013_v33 = vunpack.c.h.bf16 %v2011_v61 }
  0x38   : >> { %567 = vmatpush.bf16.xpose.msra.mxu0 %v525_v53 }
  0x39   : >> { %656 = vmatpush.bf16.xpose.msra.mxu1 %v549_v54  ;;  %v339_v38 = vmul.f32 0.70703125, %v2013_v33 }
  0x3b   : >> { %1295 = vmatpush.bf16.msrb.mxu3 %v2007_v37  ;;  %v338_v37 = vmul.f32 0.70703125, %v2012_v63 }
  0x3d   : >> { %v370_v39 = vpack.c.bf16 %v339_v38, %v338_v37  ;;  %v2079_v38 = vld [vmem:[%s3097_s25 + $0x30] sm:$0xff]  }
  0x3f   : >> { %1296 = vmatpush.bf16.msrb.mxu3 %v2006_v41  ;;  %v2074_v41 = vld [vmem:[%s3097_s25 + $0x8] sm:$0xff]  }
  0x40   : >> { %568 = vmatpush.bf16.xpose.msra.mxu0 %v522_v56  ;;  %v2016_v43 = vunpack.c.l.bf16 %v2074_v41  ;;  %v2017_v44 = vunpack.c.h.bf16 %v2074_v41  ;;  %v2037_v41 = vunpack.c.h.bf16 %v2079_v38 }
  0x41   : >> { %657 = vmatpush.bf16.xpose.msra.mxu1 %v546_v57  ;;  %v2077_v57 = vld [vmem:[%s3097_s25 + $0x20] sm:$0xff]  }
  0x43   : >> { %1297 = vmatpush.bf16.msrb.mxu3 %v2005_v46  ;;  %v341_v46 = vmul.f32 0.70703125, %v2017_v44  ;;  %v351_v44 = vmul.f32 0.70703125, %v2037_v41 }
  0x47   : >> { %1298 = vmatpush.bf16.msrb.mxu3 %v2004_v51 }
  0x48   : >> { %569 = vmatpush.bf16.xpose.msra.mxu0 %v519_v59 }
  0x49   : >> { %658 = vmatpush.bf16.xpose.msra.mxu1 %v543_v60 }
  0x4b   : >> { %1299 = vmatpush.bf16.msrb.mxu3 %v2003_v55 }
  0x4f   : >> { %1300 = vmatpush.bf16.msrb.mxu3 %v2002_v58  ;;  %v2029_v58 = vunpack.c.h.bf16 %v2077_v57 }
  0x50   : >> { %570 = vmatpush.bf16.xpose.msra.mxu0 %v516_v34 }
  0x51   : >> { %659 = vmatpush.bf16.xpose.msra.mxu1 %v540_v35  ;;  %v347_v60 = vmul.f32 0.70703125, %v2029_v58 }
  0x53   : >> { %1301 = vmatpush.bf16.msrb.mxu3 %v2001_v62  ;;  %v2078_v62 = vld [vmem:[%s3097_s25 + $0x28] sm:$0xff]  }
  0x54   : >> { %v2032_v63 = vunpack.c.l.bf16 %v2078_v62  ;;  %v2033_v33 = vunpack.c.h.bf16 %v2078_v62 }
  0x56   : >> { %v348_v34 = vmul.f32 0.70703125, %v2032_v63  ;;  %v349_v35 = vmul.f32 0.70703125, %v2033_v33 }
  0x57   : >> { %1940 = vmatmul.msk.bf16.vlgmr.msra.gmra.mxu0 %vm466_vm0, %v370_v39 }
  0x58   : >> { %1205 = vmatpush.bf16.msrb.mxu0 %v3100_v32  ;;  %1956 = vmatmul.msk.bf16.vlgmr.msra.gmra.mxu1 %vm466_vm0, %v370_v39  ;;  %v375_v37 = vpack.c.bf16 %v349_v35, %v348_v34  ;;  %v2036_v39 = vunpack.c.l.bf16 %v2079_v38  ;;  %v2083_v35 = vld [vmem:[%s3097_s25 + $0x50] sm:$0xff]  }
  0x59   : >> { %2089 = vmatpush.bf16.msrb.mxu1 %v3100_v32  ;;  %v340_v32 = vmul.f32 0.70703125, %v2016_v43  ;;  %v2053_v38 = vunpack.c.h.bf16 %v2083_v35 }
  0x5a   : >> { %v350_v43 = vmul.f32 0.70703125, %v2036_v39 }
  0x5c   : >> { %1206 = vmatpush.bf16.msrb.mxu0 %v3109_v36 }
  0x5d   : >> { %2092 = vmatpush.bf16.msrb.mxu1 %v3109_v36  ;;  %v371_v36 = vpack.c.bf16 %v341_v46, %v340_v32  ;;  %v376_v32 = vpack.c.bf16 %v351_v44, %v350_v43  ;;  %v2080_v46 = vld [vmem:[%s3097_s25 + $0x38] sm:$0xff]   ;;  %v359_v44 = vmul.f32 0.70703125, %v2053_v38 }
  0x60   : >> { %1207 = vmatpush.bf16.msrb.mxu0 %v3118_v40 }
  0x61   : >> { %2095 = vmatpush.bf16.msrb.mxu1 %v3118_v40  ;;  %v2075_v40 = vld [vmem:[%s3097_s25 + $0x10] sm:$0xff]  }
  0x62   : >> { %v2021_v48 = vunpack.c.h.bf16 %v2075_v40 }
  0x64   : >> { %1208 = vmatpush.bf16.msrb.mxu0 %v3124_v42  ;;  %v343_v49 = vmul.f32 0.70703125, %v2021_v48 }
  0x65   : >> { %2098 = vmatpush.bf16.msrb.mxu1 %v3124_v42  ;;  %v2020_v42 = vunpack.c.l.bf16 %v2075_v40  ;;  %v2041_v40 = vunpack.c.h.bf16 %v2080_v46 }
  0x67   : >> { %1941 = vmatmul.msk.bf16.gmra.mxu0 %vm466_vm0, %v371_v36  ;;  %v353_v48 = vmul.f32 0.70703125, %v2041_v40  ;;  %v2084_v40 = vld [vmem:[%s3097_s25 + $0x58] sm:$0xff]  }
  0x68   : >> { %1209 = vmatpush.bf16.msrb.mxu0 %v3132_v45  ;;  %1957 = vmatmul.msk.bf16.gmra.mxu1 %vm466_vm0, %v371_v36  ;;  %v2040_v36 = vunpack.c.l.bf16 %v2080_v46 }
  0x69   : >> { %2101 = vmatpush.bf16.msrb.mxu1 %v3132_v45  ;;  %v342_v45 = vmul.f32 0.70703125, %v2020_v42 }
  0x6a   : >> { %v352_v42 = vmul.f32 0.70703125, %v2040_v36 }
  0x6b   : >> { %v372_v51 = vpack.c.bf16 %v343_v49, %v342_v45  ;;  %v2081_v49 = vld [vmem:[%s3097_s25 + $0x40] sm:$0xff]  }
  0x6c   : >> { %1210 = vmatpush.bf16.msrb.mxu0 %v3138_v47  ;;  %v377_v45 = vpack.c.bf16 %v353_v48, %v352_v42  ;;  %v2056_v42 = vunpack.c.l.bf16 %v2084_v40  ;;  %v2057_v48 = vunpack.c.h.bf16 %v2084_v40 }
  0x6d   : >> { %2104 = vmatpush.bf16.msrb.mxu1 %v3138_v47  ;;  %v2076_v47 = vld [vmem:[%s3097_s25 + $0x18] sm:$0xff]  }
  0x6e   : >> { %v2024_v53 = vunpack.c.l.bf16 %v2076_v47  ;;  %v2025_v54 = vunpack.c.h.bf16 %v2076_v47  ;;  %v2045_v47 = vunpack.c.h.bf16 %v2081_v49 }
  0x70   : >> { %1211 = vmatpush.bf16.msrb.mxu0 %v3146_v50  ;;  %v344_v55 = vmul.f32 0.70703125, %v2024_v53 }
  0x71   : >> { %2107 = vmatpush.bf16.msrb.mxu1 %v3146_v50  ;;  %v345_v50 = vmul.f32 0.70703125, %v2025_v54  ;;  %v355_v54 = vmul.f32 0.70703125, %v2045_v47  ;;  %v361_v47 = vmul.f32 0.70703125, %v2057_v48 }
  0x73   : >> { %v373_v56 = vpack.c.bf16 %v345_v50, %v344_v55 }
  0x74   : >> { %1212 = vmatpush.bf16.msrb.mxu0 %v3152_v52 }
  0x75   : >> { %2110 = vmatpush.bf16.msrb.mxu1 %v3152_v52  ;;  %v2028_v52 = vunpack.c.l.bf16 %v2077_v57  ;;  %v2082_v57 = vld [vmem:[%s3097_s25 + $0x48] sm:$0xff]  }
  0x76   : >> { %v2049_v58 = vunpack.c.h.bf16 %v2082_v57 }
  0x77   : >> { %1942 = vmatmul.msk.bf16.gmra.mxu0 %vm466_vm0, %v372_v51  ;;  %v346_v59 = vmul.f32 0.70703125, %v2028_v52  ;;  %v2048_v52 = vunpack.c.l.bf16 %v2082_v57  ;;  %v2085_v57 = vld [vmem:[%s3097_s25 + $0x60] sm:$0xff]  }
  0x78   : >> { %1958 = vmatmul.msk.bf16.gmra.mxu1 %vm466_vm0, %v372_v51  ;;  %v2044_v51 = vunpack.c.l.bf16 %v2081_v49  ;;  %v357_v62 = vmul.f32 0.70703125, %v2049_v58  ;;  %v2061_v58 = vunpack.c.h.bf16 %v2085_v57 }
  0x79   : >> { %v374_v61 = vpack.c.bf16 %v347_v60, %v346_v59 }
  0x7a   : >> { %v354_v53 = vmul.f32 0.70703125, %v2044_v51  ;;  %v360_v51 = vmul.f32 0.70703125, %v2056_v42 }
  0x7c   : >> { %v378_v55 = vpack.c.bf16 %v355_v54, %v354_v53  ;;  %v381_v53 = vpack.c.bf16 %v361_v47, %v360_v51 }
  0x87   : >> { %1943 = vmatmul.msk.bf16.gmra.mxu0 %vm466_vm0, %v373_v56 }
  0x88   : >> { %1959 = vmatmul.msk.bf16.gmra.mxu1 %vm466_vm0, %v373_v56 }
  0x97   : >> { %1944 = vmatmul.msk.bf16.gmra.mxu0 %vm466_vm0, %v374_v61 }
  0x98   : >> { %1960 = vmatmul.msk.bf16.gmra.mxu1 %vm466_vm0, %v374_v61  ;;  %v356_v61 = vmul.f32 0.70703125, %v2048_v52  ;;  %v2060_v52 = vunpack.c.l.bf16 %v2085_v57 }
  0x9a   : >> { %v379_v63 = vpack.c.bf16 %v357_v62, %v356_v61 }
  0xa7   : >> { %1945 = vmatmul.msk.bf16.gmra.mxu0 %vm466_vm0, %v375_v37 }
  0xa8   : >> { %1961 = vmatmul.msk.bf16.gmra.mxu1 %vm466_vm0, %v375_v37  ;;  %v2052_v37 = vunpack.c.l.bf16 %v2083_v35  ;;  %v363_v35 = vmul.f32 0.70703125, %v2061_v58  ;;  %v2087_v58 = vld [vmem:[%s3097_s25 + $0x70] sm:$0xff]  }
  0xaa   : >> { %v358_v43 = vmul.f32 0.70703125, %v2052_v37 }
  0xb7   : >> { %1946 = vmatmul.msk.bf16.gmra.mxu0 %vm466_vm0, %v376_v32 }
  0xb8   : >> { %1962 = vmatmul.msk.bf16.gmra.mxu1 %vm466_vm0, %v376_v32  ;;  %v380_v32 = vpack.c.bf16 %v359_v44, %v358_v43  ;;  %v2086_v44 = vld [vmem:[%s3097_s25 + $0x68] sm:$0xff]  }
  0xb9   : >> { %v2065_v40 = vunpack.c.h.bf16 %v2086_v44 }
  0xbb   : >> { %v365_v47 = vmul.f32 0.70703125, %v2065_v40 }
  0xc7   : >> { %1947 = vmatmul.msk.bf16.gmra.mxu0 %vm466_vm0, %v377_v45 }
  0xc8   : >> { %1963 = vmatmul.msk.bf16.gmra.mxu1 %vm466_vm0, %v377_v45 }
  0xd4   : >> { %v3212_v50 = vpop.f32.mrf.mxu0 }
  0xd5   : >> { %v3214_v56 = vpop.f32.mrf.mxu1 }
  0xd7   : >> { %1948 = vmatmul.msk.bf16.gmra.mxu0 %vm466_vm0, %v378_v55 }
  0xd8   : >> { %1964 = vmatmul.msk.bf16.gmra.mxu1 %vm466_vm0, %v378_v55 }
  0xdc   : >> { %v3219_v59 = vpop.f32.mrf.mxu0 }
  0xdd   : >> { %v3221_v60 = vpop.f32.mrf.mxu1 }
  0xde   : >> { %4130 = vst [vmem:[#allocation34_spill] sm:$0xff] %v3221_v60 }
  0xe4   : >> { %v3223_v33 = vpop.f32.mrf.mxu0 }
  0xe5   : >> { %v3225_v34 = vpop.f32.mrf.mxu1 }
  0xe7   : >> { %1949 = vmatmul.msk.bf16.gmra.mxu0 %vm466_vm0, %v379_v63 }
  0xe8   : >> { %1965 = vmatmul.msk.bf16.gmra.mxu1 %vm466_vm0, %v379_v63  ;;  %v362_v63 = vmul.f32 0.70703125, %v2060_v52 }
  0xea   : >> { %v382_v37 = vpack.c.bf16 %v363_v35, %v362_v63  ;;  %v2068_v63 = vunpack.c.l.bf16 %v2087_v58  ;;  %v2069_v35 = vunpack.c.h.bf16 %v2087_v58 }
  0xec   : >> { %v3230_v39 = vpop.f32.mrf.mxu0  ;;  %v366_v0 = vmul.f32 0.70703125, %v2068_v63 }
  0xed   : >> { %v3232_v41 = vpop.f32.mrf.mxu1 }
  0xf4   : >> { %v3234_v46 = vpop.f32.mrf.mxu0 }
  0xf5   : >> { %v3236_v36 = vpop.f32.mrf.mxu1 }
  0xf7   : >> { %1950 = vmatmul.msk.bf16.gmra.mxu0 %vm466_vm0, %v380_v32 }
  0xf8   : >> { %1966 = vmatmul.msk.bf16.gmra.mxu1 %vm466_vm0, %v380_v32  ;;  %v2064_v32 = vunpack.c.l.bf16 %v2086_v44 }
  0xfa   : >> { %v364_v51 = vmul.f32 0.70703125, %v2064_v32  ;;  %v367_v32 = vmul.f32 0.70703125, %v2069_v35 }
  0xfc   : >> { %v3241_v45 = vpop.f32.mrf.mxu0  ;;  %v384_v40 = vpack.c.bf16 %v367_v32, %v366_v0 }
  0xfd   : >> { %v3243_v49 = vpop.f32.mrf.mxu1 }
 0x104   : >> { %v3245_v54 = vpop.f32.mrf.mxu0 }
 0x105   : >> { %v3247_v55 = vpop.f32.mrf.mxu1 }
 0x107   : >> { %1951 = vmatmul.msk.bf16.gmra.mxu0 %vm466_vm0, %v381_v53 }
 0x108   : >> { %1967 = vmatmul.msk.bf16.gmra.mxu1 %vm466_vm0, %v381_v53  ;;  %v383_v53 = vpack.c.bf16 %v365_v47, %v364_v51 }
 0x10c   : >> { %v3252_v61 = vpop.f32.mrf.mxu0 }
 0x10d   : >> { %v3254_v62 = vpop.f32.mrf.mxu1 }
 0x114   : >> { %v3256_v38 = vpop.f32.mrf.mxu0 }
 0x115   : >> { %v3258_v43 = vpop.f32.mrf.mxu1 }
 0x117   : >> { %1952 = vmatmul.msk.bf16.gmra.mxu0 %vm466_vm0, %v382_v37 }
 0x118   : >> { %1968 = vmatmul.msk.bf16.gmra.mxu1 %vm466_vm0, %v382_v37 }
 0x11c   : >> { %v3263_v42 = vpop.f32.mrf.mxu0 }
 0x11d   : >> { %v3265_v48 = vpop.f32.mrf.mxu1 }
 0x124   : >> { %v3267_v57 = vpop.f32.mrf.mxu0 }
 0x125   : >> { %v3269_v52 = vpop.f32.mrf.mxu1 }
 0x127   : >> { %1953 = vmatmul.msk.bf16.gmra.mxu0 %vm466_vm0, %v383_v53 }
 0x128   : >> { %1969 = vmatmul.msk.bf16.gmra.mxu1 %vm466_vm0, %v383_v53  ;;  %v2072_v53 = vunpack.c.l.bf16 %v2088_v1 }
 0x12a   : >> { %v368_v4 = vmul.f32 0.70703125, %v2072_v53 }
 0x12c   : >> { %v3274_v37 = vpop.f32.mrf.mxu0  ;;  %v385_v63 = vpack.c.bf16 %v369_v5, %v368_v4 }
 0x12d   : >> { %v3276_v44 = vpop.f32.mrf.mxu1 }
 0x12e   : >> { %4131 = vst [vmem:[#allocation35_spill] sm:$0xff] %v3276_v44 }
 0x134   : >> { %v3278_v51 = vpop.f32.mrf.mxu0 }
 0x135   : >> { %v3280_v47 = vpop.f32.mrf.mxu1 }
 0x137   : >> { %1954 = vmatmul.msk.bf16.gmra.mxu0 %vm466_vm0, %v384_v40 }
 0x138   : >> { %1970 = vmatmul.msk.bf16.gmra.mxu1 %vm466_vm0, %v384_v40 }
 0x13c   : >> { %v3285_v3 = vpop.f32.mrf.mxu0 }
 0x13d   : >> { %v3287_v58 = vpop.f32.mrf.mxu1 }
 0x13e   : >> { %4132 = vst [vmem:[#allocation36_spill] sm:$0xff] %v3287_v58 }
 0x144   : >> { %v3289_v35 = vpop.f32.mrf.mxu0 }
 0x145   : >> { %v3291_v0 = vpop.f32.mrf.mxu1 }
 0x147   : >> { %1955 = vmatmul.msk.bf16.gmra.mxu0 %vm466_vm0, %v385_v63 }
 0x148   : >> { %1971 = vmatmul.msk.bf16.gmra.mxu1 %vm466_vm0, %v385_v63 }
 0x14c   : >> { %v3295_v32 = vpop.f32.mrf.mxu0 }
 0x14d   : >> { %v3297_v40 = vpop.f32.mrf.mxu1 }
 0x154   : >> { %v3299_v1 = vpop.f32.mrf.mxu0 }
 0x155   : >> { %v3301_v6 = vpop.f32.mrf.mxu1 }
 0x156   : >> { %4133 = vst [vmem:[#allocation37_spill] sm:$0xff] %v3301_v6 }
 0x15c   : >> { %v3303_v7 = vpop.f32.mrf.mxu0 }
 0x15d   : >> { %v3305_v2 = vpop.f32.mrf.mxu1 }
 0x164   : >> { %v3307_v4 = vpop.f32.mrf.mxu0 }
 0x165   : >> { %v3309_v5 = vpop.f32.mrf.mxu1 }
 0x166   : >> { %4134 = vst [vmem:[#allocation38_spill] sm:$0xff] %v3309_v5 }
 0x16c   : >> { %v3311_v53 = vpop.f32.mrf.mxu0 }
 0x16d   : >> { %v3313_v8 = vpop.f32.mrf.mxu1 }
 0x174   : >> { %v3315_v63 = vpop.f32.mrf.mxu0 }
 0x175   : >> { %v3317_v9 = vpop.f32.mrf.mxu1 }
 0x17c   : >> { %v3319_v10 = vpop.f32.mrf.mxu0 }
 0x17d   : >> { %v3321_v11 = vpop.f32.mrf.mxu1 }
 0x184   : >> { %v3323_v12 = vpop.f32.mrf.mxu0 }
 0x185   : >> { %v3325_v13 = vpop.f32.mrf.mxu1 }
 0x186   : >> { %v807_v14 = vmax.f32 %v3323_v12, %v3325_v13 }
 0x188   : >> { %808 = vmax.xlane.f32.xlu0 %v807_v14 }
 0x18c   : >> { %v3329_v15 = vpop.f32.mrf.mxu0 }
 0x18d   : >> { %v3331_v16 = vpop.f32.mrf.mxu1 }
 0x18e   : >> { %v810_v17 = vmax.f32 %v3329_v15, %v3331_v16 }
 0x190   : >> { %811 = vmax.xlane.f32.xlu0 %v810_v17 }
 0x194   : >> { %v3335_v18 = vpop.f32.mrf.mxu0 }
 0x195   : >> { %v3337_v19 = vpop.f32.mrf.mxu1 }
 0x196   : >> { %v813_v20 = vmax.f32 %v3335_v18, %v3337_v19 }
 0x198   : >> { %814 = vmax.xlane.f32.xlu1 %v813_v20 }
 0x19c   : >> { %v3341_v21 = vpop.f32.mrf.mxu0 }
 0x19d   : >> { %v3343_v22 = vpop.f32.mrf.mxu1 }
 0x19e   : >> { %v816_v14 = vmax.f32 %v3341_v21, %v3343_v22 }
 0x1a0   : >> { %817 = vmax.xlane.f32.xlu1 %v816_v14 }
 0x1a4   : >> { %v3347_v23 = vpop.f32.mrf.mxu0 }
 0x1a5   : >> { %v3349_v24 = vpop.f32.mrf.mxu1 }
 0x1a6   : >> { %v819_v17 = vmax.f32 %v3347_v23, %v3349_v24 }
 0x1a8   : >> { %820 = vmax.xlane.f32.xlu2 %v819_v17 }
 0x1ac   : >> { %v3353_v25 = vpop.f32.mrf.mxu0 }
 0x1ad   : >> { %4135 = vst [vmem:[#allocation39_spill] sm:$0xff] %v3353_v25  ;;  %v3355_v26 = vpop.f32.mrf.mxu1 }
 0x1ae   : >> { %4136 = vst [vmem:[#allocation40_spill] sm:$0xff] %v3355_v26  ;;  %v822_v20 = vmax.f32 %v3353_v25, %v3355_v26 }
 0x1b0   : >> { %823 = vmax.xlane.f32.xlu2 %v822_v20  ;;  %v741_v20 = vmax.f32 %v3212_v50, %v3214_v56 }
 0x1b4   : >> { %v3359_v27 = vpop.f32.mrf.mxu0 }
 0x1b5   : >> { %v3361_v28 = vpop.f32.mrf.mxu1 }
 0x1b6   : >> { %4137 = vst [vmem:[#allocation41_spill] sm:$0xff] %v3361_v28  ;;  %v825_v14 = vmax.f32 %v3359_v27, %v3361_v28 }
 0x1b8   : >> { %826 = vmax.xlane.f32.xlu0 %v825_v14 }
 0x1bc   : >> { %v3365_v29 = vpop.f32.mrf.mxu0 }
 0x1bd   : >> { %4138 = vst [vmem:[#allocation42_spill] sm:$0xff] %v3365_v29  ;;  %v3367_v30 = vpop.f32.mrf.mxu1 }
 0x1be   : >> { %4139 = vst [vmem:[#allocation43_spill] sm:$0xff] %v3367_v30  ;;  %v828_v17 = vmax.f32 %v3365_v29, %v3367_v30  ;;  %v750_v30 = vmax.f32 %v3230_v39, %v3232_v41 }
 0x1c0   : >> { %829 = vmax.xlane.f32.xlu1 %v828_v17  ;;  %v744_v17 = vmax.f32 %v3219_v59, %v3221_v60  ;;  %v768_v60 = vmax.f32 %v3263_v42, %v3265_v48 }
 0x1c4   : >> { %v3371_v31 = vpop.f32.mrf.mxu0 }
 0x1c5   : >> { %v3373_v26 = vpop.f32.mrf.mxu1 }
 0x1c6   : >> { %4140 = vst [vmem:[#allocation44_spill] sm:$0xff] %v3373_v26  ;;  %v831_v25 = vmax.f32 %v3371_v31, %v3373_v26  ;;  %v747_v26 = vmax.f32 %v3223_v33, %v3225_v34 }
 0x1c8   : >> { %742 = vmax.xlane.f32.xlu1 %v741_v20  ;;  %832 = vmax.xlane.f32.xlu2 %v831_v25  ;;  %v759_v20 = vmax.f32 %v3245_v54, %v3247_v55  ;;  %v753_v25 = vmax.f32 %v3234_v46, %v3236_v36 }
 0x1cc   : >> { %v3379_v14 = vpop.f32.mrf.mxu0 }
 0x1cd   : >> { %v3381_v28 = vpop.f32.mrf.mxu1 }
 0x1ce   : >> { %v834_v29 = vmax.f32 %v3379_v14, %v3381_v28 }
 0x1d0   : >> { %751 = vmax.xlane.f32.xlu1 %v750_v30  ;;  %745 = vmax.xlane.f32.xlu2 %v744_v17  ;;  %v762_v30 = vmax.f32 %v3252_v61, %v3254_v62  ;;  %v771_v17 = vmax.f32 %v3267_v57, %v3269_v52 }
 0x1d1   : >> { %835 = vmax.xlane.f32.xlu0 %v834_v29  ;;  %v756_v29 = vmax.f32 %v3241_v45, %v3243_v49 }
 0x1d8   : >> { %760 = vmax.xlane.f32.xlu1 %v759_v20  ;;  %754 = vmax.xlane.f32.xlu2 %v753_v25  ;;  %v777_v20 = vmax.f32 %v3278_v51, %v3280_v47  ;;  %v786_v25 = vmax.f32 %v3295_v32, %v3297_v40 }
 0x1d9   : >> { %748 = vmax.xlane.f32.xlu0 %v747_v26  ;;  %v765_v26 = vmax.f32 %v3256_v38, %v3258_v43 }
 0x1e0   : >> { %769 = vmax.xlane.f32.xlu1 %v768_v60  ;;  %763 = vmax.xlane.f32.xlu2 %v762_v30  ;;  %v774_v60 = vmax.f32 %v3274_v37, %v3276_v44  ;;  %v780_v30 = vmax.f32 %v3285_v3, %v3287_v58 }
 0x1e1   : >> { %757 = vmax.xlane.f32.xlu0 %v756_v29  ;;  %v795_v29 = vmax.f32 %v3307_v4, %v3309_v5  ;;  %v798_v5 = vmax.f32 %v3311_v53, %v3313_v8 }
 0x1e8   : >> { %772 = vmax.xlane.f32.xlu1 %v771_v17  ;;  %778 = vmax.xlane.f32.xlu2 %v777_v20  ;;  %v789_v17 = vmax.f32 %v3299_v1, %v3301_v6  ;;  %v783_v20 = vmax.f32 %v3289_v35, %v3291_v0  ;;  %v792_v6 = vmax.f32 %v3303_v7, %v3305_v2 }
 0x1e9   : >> { %766 = vmax.xlane.f32.xlu0 %v765_v26 }
 0x1f0   : >> { %787 = vmax.xlane.f32.xlu1 %v786_v25  ;;  %775 = vmax.xlane.f32.xlu2 %v774_v60 }
 0x1f1   : >> { %781 = vmax.xlane.f32.xlu0 %v780_v30  ;;  %v804_v30 = vmax.f32 %v3319_v10, %v3321_v11 }
 0x1f8   : >> { %796 = vmax.xlane.f32.xlu1 %v795_v29  ;;  %790 = vmax.xlane.f32.xlu2 %v789_v17 }
 0x1f9   : >> { %784 = vmax.xlane.f32.xlu0 %v783_v20 }
 0x1fb   : >> { %v809_v26 = vpop.xlane.xlu0 %808 }
 0x1fc   : >> { %v881_v44 = vsub.f32 %v3323_v12, %v809_v26  ;;  %v882_v58 = vsub.f32 %v3325_v13, %v809_v26  ;;  %v801_v26 = vmax.f32 %v3315_v63, %v3317_v9 }
 0x1fe   : >> { %v989_v25 = vmul.f32 1.442695, %v881_v44  ;;  %v991_v60 = vmul.f32 1.442695, %v882_v58 }
 0x200   : >> { %2401 = vpow2.f32 %v989_v25  ;;  %805 = vmax.xlane.f32.xlu1 %v804_v30  ;;  %799 = vmax.xlane.f32.xlu2 %v798_v5 }
 0x201   : >> { %2403 = vpow2.f32 %v991_v60  ;;  %793 = vmax.xlane.f32.xlu0 %v792_v6 }
 0x203   : >> { %v812_v29 = vpop.xlane.xlu0 %811 }
 0x204   : >> { %v883_v12 = vsub.f32 %v3329_v15, %v812_v29  ;;  %v884_v13 = vsub.f32 %v3331_v16, %v812_v29 }
 0x206   : >> { %v2402_v44 = vpop.eup %2401  ;;  %v993_v58 = vmul.f32 1.442695, %v883_v12  ;;  %v995_v17 = vmul.f32 1.442695, %v884_v13 }
 0x207   : >> { %v3429_v20 = vpop.eup %2403 }
 0x208   : >> { %4141 = vst [vmem:[#allocation45_spill] sm:$0xff] %v3429_v20  ;;  %2405 = vpow2.f32 %v993_v58  ;;  %v3434_v25 = vadd.f32 %v3429_v20, %v2402_v44 }
 0x209   : >> { %2407 = vpow2.f32 %v995_v17  ;;  %802 = vmax.xlane.f32.xlu0 %v801_v26 }
 0x20b   : >> { %v815_v6 = vpop.xlane.xlu1 %814 }
 0x20c   : >> { %v885_v5 = vsub.f32 %v3335_v18, %v815_v6  ;;  %v886_v15 = vsub.f32 %v3337_v19, %v815_v6 }
 0x20e   : >> { %v2406_v16 = vpop.eup %2405  ;;  %v997_v60 = vmul.f32 1.442695, %v885_v5  ;;  %v999_v30 = vmul.f32 1.442695, %v886_v15 }
 0x20f   : >> { %v3438_v29 = vpop.eup %2407  ;;  %v1147_v12 = vpack.c.bf16 %v2406_v16, %v2402_v44 }
 0x210   : >> { %4142 = vst [vmem:[#allocation46_spill] sm:$0xff] %v3438_v29  ;;  %2409 = vpow2.f32 %v997_v60  ;;  %v3441_v13 = vadd.f32 %v3438_v29, %v2406_v16 }
 0x211   : >> { %2411 = vpow2.f32 %v999_v30  ;;  %1268 = vmatmul.bf16.vlgmr.msra.gmra.mxu3 %v1147_v12 }
 0x212   : >> { %4143 = vst [vmem:[#allocation47_spill] sm:$0xff] %v3441_v13 }
 0x213   : >> { %v818_v17 = vpop.xlane.xlu1 %817 }
 0x214   : >> { %v887_v18 = vsub.f32 %v3341_v21, %v818_v17  ;;  %v888_v19 = vsub.f32 %v3343_v22, %v818_v17 }
 0x216   : >> { %v2410_v26 = vpop.eup %2409  ;;  %v1001_v6 = vmul.f32 1.442695, %v887_v18  ;;  %v1003_v5 = vmul.f32 1.442695, %v888_v19 }
 0x217   : >> { %v3447_v15 = vpop.eup %2411 }
 0x218   : >> { %4144 = vst [vmem:[#allocation48_spill] sm:$0xff] %v3447_v15  ;;  %2413 = vpow2.f32 %v1001_v6  ;;  %v3450_v44 = vadd.f32 %v3447_v15, %v2410_v26  ;;  %v4146_v6 = vld [vmem:[#allocation39_spill] sm:$0xff] }
 0x219   : >> { %2415 = vpow2.f32 %v1003_v5  ;;  %v4147_v5 = vld [vmem:[#allocation40_spill] sm:$0xff] }
 0x21b   : >> { %v821_v16 = vpop.xlane.xlu2 %820 }
 0x21c   : >> { %v889_v60 = vsub.f32 %v3347_v23, %v821_v16  ;;  %v890_v30 = vsub.f32 %v3349_v24, %v821_v16 }
 0x21e   : >> { %v2414_v12 = vpop.eup %2413  ;;  %v1005_v58 = vmul.f32 1.442695, %v889_v60  ;;  %v1007_v21 = vmul.f32 1.442695, %v890_v30 }
 0x21f   : >> { %v3454_v20 = vpop.eup %2415  ;;  %v1149_v22 = vpack.c.bf16 %v2414_v12, %v2410_v26 }
 0x220   : >> { %4145 = vst [vmem:[#allocation49_spill] sm:$0xff] %v3454_v20  ;;  %2417 = vpow2.f32 %v1005_v58  ;;  %v3457_v17 = vadd.f32 %v3454_v20, %v2414_v12 }
 0x221   : >> { %2419 = vpow2.f32 %v1007_v21  ;;  %1273 = vmatmul.bf16.gmra.mxu3 %v1149_v22  ;;  %v4150_v21 = vld [vmem:[#allocation41_spill] sm:$0xff] }
 0x223   : >> { %v824_v19 = vpop.xlane.xlu2 %823 }
 0x224   : >> { %v891_v23 = vsub.f32 %v4146_v6, %v824_v19  ;;  %v892_v24 = vsub.f32 %v4147_v5, %v824_v19  ;;  %v4154_v5 = vld [vmem:[#allocation44_spill] sm:$0xff] }
 0x226   : >> { %v2418_v16 = vpop.eup %2417  ;;  %v1009_v60 = vmul.f32 1.442695, %v891_v23  ;;  %v1011_v30 = vmul.f32 1.442695, %v892_v24 }
 0x227   : >> { %v3463_v29 = vpop.eup %2419 }
 0x228   : >> { %4148 = vst [vmem:[#allocation39_spill] sm:$0xff] %v3463_v29  ;;  %2421 = vpow2.f32 %v1009_v60  ;;  %v3466_v58 = vadd.f32 %v3463_v29, %v2418_v16  ;;  %v4152_v60 = vld [vmem:[#allocation42_spill] sm:$0xff] }
 0x229   : >> { %2423 = vpow2.f32 %v1011_v30  ;;  %v4153_v30 = vld [vmem:[#allocation43_spill] sm:$0xff] }
 0x22a   : >> { %4149 = vst [vmem:[#allocation40_spill] sm:$0xff] %v3466_v58 }
 0x22b   : >> { %v827_v26 = vpop.xlane.xlu0 %826 }
 0x22c   : >> { %v893_v12 = vsub.f32 %v3359_v27, %v827_v26  ;;  %v894_v22 = vsub.f32 %v4150_v21, %v827_v26 }
 0x22e   : >> { %v2422_v18 = vpop.eup %2421  ;;  %v1013_v15 = vmul.f32 1.442695, %v893_v12  ;;  %v1015_v6 = vmul.f32 1.442695, %v894_v22 }
 0x22f   : >> { %v3470_v20 = vpop.eup %2423  ;;  %v1151_v19 = vpack.c.bf16 %v2422_v18, %v2418_v16 }
 0x230   : >> { %4151 = vst [vmem:[#allocation41_spill] sm:$0xff] %v3470_v20  ;;  %2425 = vpow2.f32 %v1013_v15  ;;  %v3473_v23 = vadd.f32 %v3470_v20, %v2422_v18 }
 0x231   : >> { %2427 = vpow2.f32 %v1015_v6  ;;  %1278 = vmatmul.bf16.gmra.mxu3 %v1151_v19 }
 0x233   : >> { %v830_v24 = vpop.xlane.xlu1 %829 }
 0x234   : >> { %v895_v27 = vsub.f32 %v4152_v60, %v830_v24  ;;  %v896_v26 = vsub.f32 %v4153_v30, %v830_v24 }
 0x236   : >> { %v2426_v21 = vpop.eup %2425  ;;  %v1017_v12 = vmul.f32 1.442695, %v895_v27  ;;  %v1019_v22 = vmul.f32 1.442695, %v896_v26 }
 0x237   : >> { %v3479_v58 = vpop.eup %2427 }
 0x238   : >> { %2429 = vpow2.f32 %v1017_v12  ;;  %v3482_v15 = vadd.f32 %v3479_v58, %v2426_v21 }
 0x239   : >> { %2431 = vpow2.f32 %v1019_v22 }
 0x23b   : >> { %v743_v18 = vpop.xlane.xlu1 %742  ;;  %v833_v16 = vpop.xlane.xlu2 %832 }
 0x23c   : >> { %v837_v6 = vsub.f32 %v3212_v50, %v743_v18  ;;  %v838_v19 = vsub.f32 %v3214_v56, %v743_v18  ;;  %v897_v60 = vsub.f32 %v3371_v31, %v833_v16  ;;  %v898_v24 = vsub.f32 %v4154_v5, %v833_v16 }
 0x23e   : >> { %v2430_v30 = vpop.eup %2429  ;;  %v901_v27 = vmul.f32 1.442695, %v837_v6  ;;  %v903_v26 = vmul.f32 1.442695, %v838_v19  ;;  %v1021_v29 = vmul.f32 1.442695, %v897_v60 }
 0x23f   : >> { %v3488_v20 = vpop.eup %2431  ;;  %v1023_v12 = vmul.f32 1.442695, %v898_v24  ;;  %v1153_v13 = vpack.c.bf16 %v2430_v30, %v2426_v21  ;;  %v4155_v21 = vld [vmem:[#allocation34_spill] sm:$0xff] }
 0x240   : >> { %2433 = vpow2.f32 %v901_v27  ;;  %v3491_v22 = vadd.f32 %v3488_v20, %v2430_v30 }
 0x241   : >> { %2435 = vpow2.f32 %v903_v26  ;;  %1283 = vmatmul.bf16.gmra.mxu3 %v1153_v13 }
 0x242   : >> { %2437 = vpow2.f32 %v1021_v29 }
 0x243   : >> { %2439 = vpow2.f32 %v1023_v12  ;;  %v752_v31 = vpop.xlane.xlu1 %751  ;;  %v746_v56 = vpop.xlane.xlu2 %745 }
 0x244   : >> { %v843_v5 = vsub.f32 %v3230_v39, %v752_v31  ;;  %v844_v18 = vsub.f32 %v3232_v41, %v752_v31  ;;  %v839_v16 = vsub.f32 %v3219_v59, %v746_v56  ;;  %v840_v6 = vsub.f32 %v4155_v21, %v746_v56  ;;  %v836_v19 = vpop.xlane.xlu0 %835 }
 0x245   : >> { %v899_v60 = vsub.f32 %v3379_v14, %v836_v19  ;;  %v900_v24 = vsub.f32 %v3381_v28, %v836_v19 }
 0x246   : >> { %v2434_v30 = vpop.eup %2433  ;;  %v913_v27 = vmul.f32 1.442695, %v843_v5  ;;  %v915_v13 = vmul.f32 1.442695, %v844_v18  ;;  %v905_v29 = vmul.f32 1.442695, %v839_v16 }
 0x247   : >> { %v3501_v26 = vpop.eup %2435  ;;  %v907_v12 = vmul.f32 1.442695, %v840_v6  ;;  %v1025_v39 = vmul.f32 1.442695, %v899_v60  ;;  %v1027_v31 = vmul.f32 1.442695, %v900_v24 }
 0x248   : >> { %v2438_v50 = vpop.eup %2437  ;;  %2441 = vpow2.f32 %v913_v27  ;;  %v1029_v41 = vadd.f32 %v3501_v26, %v2434_v30 }
 0x249   : >> { %v3504_v59 = vpop.eup %2439  ;;  %2443 = vpow2.f32 %v915_v13 }
 0x24a   : >> { %2445 = vpow2.f32 %v905_v29  ;;  %1030 = vadd.xlane.f32.xlu2 %v1029_v41  ;;  %v3507_v28 = vadd.f32 %v3504_v59, %v2438_v50 }
 0x24b   : >> { %2447 = vpow2.f32 %v907_v12  ;;  %v761_v14 = vpop.xlane.xlu1 %760  ;;  %v755_v56 = vpop.xlane.xlu2 %754 }
 0x24c   : >> { %2449 = vpow2.f32 %v1025_v39  ;;  %v849_v5 = vsub.f32 %v3245_v54, %v761_v14  ;;  %v850_v18 = vsub.f32 %v3247_v55, %v761_v14  ;;  %v845_v16 = vsub.f32 %v3234_v46, %v755_v56  ;;  %v749_v21 = vpop.xlane.xlu0 %748 }
 0x24d   : >> { %2451 = vpow2.f32 %v1027_v31  ;;  %v846_v6 = vsub.f32 %v3236_v36, %v755_v56  ;;  %v841_v19 = vsub.f32 %v3223_v33, %v749_v21  ;;  %v842_v60 = vsub.f32 %v3225_v34, %v749_v21 }
 0x24e   : >> { %v3515_v24 = vpop.eup %2441  ;;  %v925_v27 = vmul.f32 1.442695, %v849_v5  ;;  %v927_v13 = vmul.f32 1.442695, %v850_v18  ;;  %v917_v29 = vmul.f32 1.442695, %v845_v16 }
 0x24f   : >> { %v3517_v12 = vpop.eup %2443  ;;  %v919_v54 = vmul.f32 1.442695, %v846_v6  ;;  %v909_v55 = vmul.f32 1.442695, %v841_v19  ;;  %v911_v33 = vmul.f32 1.442695, %v842_v60 }
 0x250   : >> { %v2446_v39 = vpop.eup %2445  ;;  %2453 = vpow2.f32 %v925_v27  ;;  %v1038_v46 = vadd.f32 %v3517_v12, %v3515_v24 }
 0x251   : >> { %v3521_v41 = vpop.eup %2447  ;;  %2455 = vpow2.f32 %v927_v13  ;;  %v1125_v36 = vpack.c.bf16 %v2446_v39, %v2434_v30 }
 0x252   : >> { %v2450_v34 = vpop.eup %2449  ;;  %2457 = vpow2.f32 %v917_v29  ;;  %1039 = vadd.xlane.f32.xlu2 %v1038_v46  ;;  %v1032_v31 = vadd.f32 %v3521_v41, %v2446_v39 }
 0x253   : >> { %v3524_v14 = vpop.eup %2451  ;;  %2459 = vpow2.f32 %v919_v54  ;;  %1213 = vmatmul.bf16.vlgmr.msrb.gmra.mxu0 %v1125_v36  ;;  %v1155_v56 = vpack.c.bf16 %v2450_v34, %v2438_v50  ;;  %v770_v5 = vpop.xlane.xlu1 %769 }
 0x254   : >> { %v764_v18 = vpop.xlane.xlu2 %763  ;;  %2461 = vpow2.f32 %v909_v55  ;;  %1033 = vadd.xlane.f32.xlu0 %v1032_v31  ;;  %v855_v16 = vsub.f32 %v3263_v42, %v770_v5  ;;  %v856_v21 = vsub.f32 %v3265_v48, %v770_v5  ;;  %v758_v6 = vpop.xlane.xlu0 %757  ;;  %v3533_v39 = vadd.f32 %v3524_v14, %v2450_v34 }
 0x255   : >> { %v851_v30 = vsub.f32 %v3252_v61, %v764_v18  ;;  %2463 = vpow2.f32 %v911_v33  ;;  %1288 = vmatmul.bf16.gmra.mxu3 %v1155_v56  ;;  %v852_v19 = vsub.f32 %v3254_v62, %v764_v18  ;;  %v847_v60 = vsub.f32 %v3241_v45, %v758_v6 }
 0x256   : >> { %v848_v27 = vsub.f32 %v3243_v49, %v758_v6  ;;  %v2454_v50 = vpop.eup %2453  ;;  %v937_v13 = vmul.f32 1.442695, %v855_v16  ;;  %v939_v29 = vmul.f32 1.442695, %v856_v21  ;;  %v1156_v61 = vpack.c.bf16 %v3524_v14, %v3504_v59 }
 0x257   : >> { %v929_v54 = vmul.f32 1.442695, %v851_v30  ;;  %v3535_v42 = vpop.eup %2455  ;;  %v931_v48 = vmul.f32 1.442695, %v852_v19  ;;  %v921_v62 = vmul.f32 1.442695, %v847_v60 }
 0x258   : >> { %v3539_v55 = vpop.eup %2457  ;;  %2465 = vpow2.f32 %v937_v13  ;;  %v1047_v45 = vadd.f32 %v3535_v42, %v2454_v50  ;;  %v923_v46 = vmul.f32 1.442695, %v848_v27 }
 0x259   : >> { %v3542_v49 = vpop.eup %2459  ;;  %2467 = vpow2.f32 %v939_v29 }
 0x25a   : >> { %v2462_v33 = vpop.eup %2461  ;;  %2469 = vpow2.f32 %v929_v54  ;;  %1048 = vadd.xlane.f32.xlu2 %v1047_v45  ;;  %v1041_v36 = vadd.f32 %v3542_v49, %v3539_v55 }
 0x25b   : >> { %v3546_v34 = vpop.eup %2463  ;;  %2471 = vpow2.f32 %v931_v48  ;;  %v773_v31 = vpop.xlane.xlu1 %772 }
 0x25c   : >> { %v779_v56 = vpop.xlane.xlu2 %778  ;;  %2473 = vpow2.f32 %v921_v62  ;;  %1042 = vadd.xlane.f32.xlu0 %v1041_v36  ;;  %v1035_v5 = vadd.f32 %v3546_v34, %v2462_v33  ;;  %v857_v18 = vsub.f32 %v3267_v57, %v773_v31  ;;  %v858_v16 = vsub.f32 %v3269_v52, %v773_v31  ;;  %v767_v21 = vpop.xlane.xlu0 %766 }
 0x25d   : >> { %2475 = vpow2.f32 %v923_v46  ;;  %v861_v30 = vsub.f32 %v3278_v51, %v779_v56  ;;  %v862_v6 = vsub.f32 %v3280_v47, %v779_v56  ;;  %v853_v19 = vsub.f32 %v3256_v38, %v767_v21 }
 0x25e   : >> { %v3554_v60 = vpop.eup %2465  ;;  %1036 = vadd.xlane.f32.xlu1 %v1035_v5  ;;  %v941_v27 = vmul.f32 1.442695, %v857_v18  ;;  %v943_v13 = vmul.f32 1.442695, %v858_v16  ;;  %v854_v29 = vsub.f32 %v3258_v43, %v767_v21  ;;  %v1127_v46 = vpack.c.bf16 %v3515_v24, %v2462_v33 }
 0x25f   : >> { %v3557_v54 = vpop.eup %2467  ;;  %v949_v57 = vmul.f32 1.442695, %v861_v30  ;;  %v951_v48 = vmul.f32 1.442695, %v862_v6  ;;  %v933_v62 = vmul.f32 1.442695, %v853_v19  ;;  %v1126_v56 = vpack.c.bf16 %v3521_v41, %v3501_v26 }
 0x260   : >> { %v2470_v52 = vpop.eup %2469  ;;  %2477 = vpow2.f32 %v941_v27  ;;  %v1056_v51 = vadd.f32 %v3557_v54, %v3554_v60  ;;  %v935_v38 = vmul.f32 1.442695, %v854_v29  ;;  %v4156_v30 = vld [vmem:[#allocation35_spill] sm:$0xff] }
 0x261   : >> { %v3561_v47 = vpop.eup %2471  ;;  %2479 = vpow2.f32 %v943_v13  ;;  %v1131_v45 = vpack.c.bf16 %v2470_v52, %v2454_v50  ;;  %v4157_v13 = vld [vmem:[#allocation36_spill] sm:$0xff] }
 0x262   : >> { %v3564_v36 = vpop.eup %2473  ;;  %2481 = vpow2.f32 %v949_v57  ;;  %1057 = vadd.xlane.f32.xlu2 %v1056_v51  ;;  %v1050_v43 = vadd.f32 %v3561_v47, %v2470_v52 }
 0x263   : >> { %v3567_v31 = vpop.eup %2475  ;;  %2483 = vpow2.f32 %v951_v48  ;;  %1228 = vmatmul.bf16.vlgmr.msrb.gmra.mxu1 %v1131_v45  ;;  %1218 = vmatmul.bf16.gmra.mxu0 %v1127_v46  ;;  %v788_v5 = vpop.xlane.xlu1 %787 }
 0x264   : >> { %v776_v18 = vpop.xlane.xlu2 %775  ;;  %2485 = vpow2.f32 %v933_v62  ;;  %1051 = vadd.xlane.f32.xlu0 %v1050_v43  ;;  %v1044_v24 = vadd.f32 %v3567_v31, %v3564_v36  ;;  %v867_v50 = vsub.f32 %v3295_v32, %v788_v5  ;;  %v868_v33 = vsub.f32 %v3297_v40, %v788_v5  ;;  %v782_v16 = vpop.xlane.xlu0 %781 }
 0x265   : >> { %2487 = vpow2.f32 %v935_v38  ;;  %1302 = vmatmul.bf16.vlgmr.msrb.gmra.mxu3 %v1126_v56  ;;  %v859_v21 = vsub.f32 %v3274_v37, %v776_v18  ;;  %v860_v6 = vsub.f32 %v4156_v30, %v776_v18  ;;  %v863_v26 = vsub.f32 %v3285_v3, %v782_v16  ;;  %v4158_v18 = vld [vmem:[#allocation38_spill] sm:$0xff] }
 0x266   : >> { %v3578_v41 = vpop.eup %2477  ;;  %1045 = vadd.xlane.f32.xlu1 %v1044_v24  ;;  %v961_v19 = vmul.f32 1.442695, %v867_v50  ;;  %v963_v27 = vmul.f32 1.442695, %v868_v33  ;;  %v864_v29 = vsub.f32 %v4157_v13, %v782_v16  ;;  %v4159_v16 = vld [vmem:[#allocation37_spill] sm:$0xff] }
 0x267   : >> { %v3581_v57 = vpop.eup %2479  ;;  %v945_v32 = vmul.f32 1.442695, %v859_v21  ;;  %v947_v40 = vmul.f32 1.442695, %v860_v6  ;;  %v953_v52 = vmul.f32 1.442695, %v863_v26 }
 0x268   : >> { %v2482_v48 = vpop.eup %2481  ;;  %2489 = vpow2.f32 %v961_v19  ;;  %v1059_v37 = vadd.f32 %v3581_v57, %v3578_v41  ;;  %v955_v3 = vmul.f32 1.442695, %v864_v29 }
 0x269   : >> { %v3585_v62 = vpop.eup %2483  ;;  %2491 = vpow2.f32 %v963_v27 }
 0x26a   : >> { %v2486_v51 = vpop.eup %2485  ;;  %2493 = vpow2.f32 %v945_v32  ;;  %v1065_v38 = vadd.f32 %v3585_v62, %v2482_v48 }
 0x26b   : >> { %v3588_v45 = vpop.eup %2487  ;;  %2495 = vpow2.f32 %v947_v40  ;;  %v797_v46 = vpop.xlane.xlu1 %796 }
 0x26c   : >> { %v791_v43 = vpop.xlane.xlu2 %790  ;;  %2497 = vpow2.f32 %v953_v52  ;;  %1066 = vadd.xlane.f32.xlu2 %v1065_v38  ;;  %1060 = vadd.xlane.f32.xlu0 %v1059_v37  ;;  %v1053_v56 = vadd.f32 %v3588_v45, %v2486_v51  ;;  %v873_v5 = vsub.f32 %v3307_v4, %v797_v46  ;;  %v874_v24 = vsub.f32 %v4158_v18, %v797_v46  ;;  %v785_v50 = vpop.xlane.xlu0 %784 }
 0x26d   : >> { %2499 = vpow2.f32 %v955_v3  ;;  %v869_v33 = vsub.f32 %v3299_v1, %v791_v43  ;;  %v870_v21 = vsub.f32 %v4159_v16, %v791_v43  ;;  %v865_v30 = vsub.f32 %v3289_v35, %v785_v50 }
 0x26e   : >> { %v3596_v6 = vpop.eup %2489  ;;  %1054 = vadd.xlane.f32.xlu1 %v1053_v56  ;;  %v973_v26 = vmul.f32 1.442695, %v873_v5  ;;  %v975_v19 = vmul.f32 1.442695, %v874_v24  ;;  %v866_v27 = vsub.f32 %v3291_v0, %v785_v50  ;;  %v1129_v37 = vpack.c.bf16 %v3564_v36, %v3539_v55 }
 0x26f   : >> { %v3599_v13 = vpop.eup %2491  ;;  %v965_v4 = vmul.f32 1.442695, %v869_v33  ;;  %v967_v29 = vmul.f32 1.442695, %v870_v21  ;;  %v957_v40 = vmul.f32 1.442695, %v865_v30  ;;  %v1133_v0 = vpack.c.bf16 %v3554_v60, %v2486_v51 }
 0x270   : >> { %v3601_v32 = vpop.eup %2493  ;;  %2501 = vpow2.f32 %v973_v26  ;;  %v1074_v1 = vadd.f32 %v3599_v13, %v3596_v6  ;;  %v959_v35 = vmul.f32 1.442695, %v866_v27  ;;  %v1128_v56 = vpack.c.bf16 %v3517_v12, %v3546_v34 }
 0x271   : >> { %v3605_v52 = vpop.eup %2495  ;;  %2503 = vpow2.f32 %v975_v19 }
 0x272   : >> { %v2498_v3 = vpop.eup %2497  ;;  %2505 = vpow2.f32 %v965_v4  ;;  %v1062_v38 = vadd.f32 %v3605_v52, %v3601_v32  ;;  %v1136_v46 = vpack.c.bf16 %v3605_v52, %v3581_v57 }
 0x273   : >> { %v3614_v43 = vpop.eup %2499  ;;  %2507 = vpow2.f32 %v967_v29  ;;  %1223 = vmatmul.bf16.gmra.mxu0 %v1129_v37  ;;  %1233 = vmatmul.bf16.gmra.mxu1 %v1133_v0  ;;  %v1137_v5 = vpack.c.bf16 %v2498_v3, %v2482_v48  ;;  %v806_v55 = vpop.xlane.xlu1 %805 }
 0x274   : >> { %v800_v36 = vpop.xlane.xlu2 %799  ;;  %2509 = vpow2.f32 %v957_v40  ;;  %1075 = vadd.xlane.f32.xlu2 %v1074_v1  ;;  %v1068_v60 = vadd.f32 %v3614_v43, %v2498_v3  ;;  %v879_v51 = vsub.f32 %v3319_v10, %v806_v55  ;;  %v880_v18 = vsub.f32 %v3321_v11, %v806_v55  ;;  %v794_v24 = vpop.xlane.xlu0 %793 }
 0x275   : >> { %2511 = vpow2.f32 %v959_v35  ;;  %1307 = vmatmul.bf16.gmra.mxu3 %v1128_v56  ;;  %1243 = vmatmul.bf16.vlgmr.msra.gmra.mxu2 %v1137_v5  ;;  %v875_v50 = vsub.f32 %v3311_v53, %v800_v36  ;;  %v876_v33 = vsub.f32 %v3313_v8, %v800_v36  ;;  %v871_v12 = vsub.f32 %v3303_v7, %v794_v24 }
 0x276   : >> { %v3624_v34 = vpop.eup %2501  ;;  %1063 = vadd.xlane.f32.xlu1 %v1062_v38  ;;  %1069 = vadd.xlane.f32.xlu0 %v1068_v60  ;;  %v985_v48 = vmul.f32 1.442695, %v879_v51  ;;  %v987_v16 = vmul.f32 1.442695, %v880_v18  ;;  %v872_v10 = vsub.f32 %v3305_v2, %v794_v24  ;;  %v1138_v11 = vpack.c.bf16 %v3614_v43, %v3585_v62 }
 0x277   : >> { %v3629_v21 = vpop.eup %2503  ;;  %v977_v30 = vmul.f32 1.442695, %v875_v50  ;;  %v979_v26 = vmul.f32 1.442695, %v876_v33  ;;  %v969_v8 = vmul.f32 1.442695, %v871_v12  ;;  %v1135_v51 = vpack.c.bf16 %v3601_v32, %v3578_v41 }
 0x278   : >> { %v3631_v53 = vpop.eup %2505  ;;  %2513 = vpow2.f32 %v985_v48  ;;  %v1083_v7 = vadd.f32 %v3629_v21, %v3624_v34  ;;  %v971_v27 = vmul.f32 1.442695, %v872_v10  ;;  %v1130_v50 = vpack.c.bf16 %v3567_v31, %v3542_v49  ;;  %v1432_v12 = vld [vmem:[%s1431_s28] sm:$0x1] }
 0x279   : >> { %v3635_v19 = vpop.eup %2507  ;;  %2515 = vpow2.f32 %v987_v16  ;;  %v1483_v16 = vsel %vm1481_vm1, %v1432_v12, 0 }
 0x27a   : >> { %v2510_v4 = vpop.eup %2509  ;;  %2517 = vpow2.f32 %v977_v30  ;;  %v1077_v2 = vadd.f32 %v3635_v19, %v3631_v53  ;;  %1492 = vmatpush.bf16.msrb.mxu2 %v1483_v16 }
 0x27b   : >> { %v3639_v29 = vpop.eup %2511  ;;  %2519 = vpow2.f32 %v979_v26  ;;  %v1139_v33 = vpack.c.bf16 %v3596_v6, %v2510_v4  ;;  %v1132_v6 = vpack.c.bf16 %v3561_v47, %v3535_v42  ;;  %v1134_v42 = vpack.c.bf16 %v3557_v54, %v3588_v45 }
 0x27c   : >> { %2521 = vpow2.f32 %v969_v8  ;;  %1084 = vadd.xlane.f32.xlu2 %v1083_v7  ;;  %v1071_v40 = vadd.f32 %v3639_v29, %v2510_v4  ;;  %v803_v1 = vpop.xlane.xlu0 %802  ;;  %v1140_v35 = vpack.c.bf16 %v3599_v13, %v3639_v29  ;;  %v4160_v8 = vld [vmem:[#allocation47_spill] sm:$0xff] }
 0x27d   : >> { %2523 = vpow2.f32 %v971_v27  ;;  %v877_v37 = vsub.f32 %v3315_v63, %v803_v1  ;;  %v878_v0 = vsub.f32 %v3317_v9, %v803_v1 }
 0x27e   : >> { %v2514_v3 = vpop.eup %2513  ;;  %1078 = vadd.xlane.f32.xlu0 %v1077_v2  ;;  %1072 = vadd.xlane.f32.xlu1 %v1071_v40 }
 0x27f   : >> { %v3646_v38 = vpop.eup %2515  ;;  %v981_v56 = vmul.f32 1.442695, %v877_v37  ;;  %v983_v5 = vmul.f32 1.442695, %v878_v0 }
 0x280   : >> { %v2518_v55 = vpop.eup %2517  ;;  %v1092_v36 = vadd.f32 %v3646_v38, %v2514_v3 }
 0x281   : >> { %v3649_v60 = vpop.eup %2519  ;;  %2525 = vpow2.f32 %v981_v56 }
 0x282   : >> { %v2522_v63 = vpop.eup %2521  ;;  %2527 = vpow2.f32 %v983_v5  ;;  %v1086_v9 = vadd.f32 %v3649_v60, %v2518_v55  ;;  %v1144_v18 = vpack.c.bf16 %v3649_v60, %v3629_v21 }
 0x283   : >> { %v2524_v24 = vpop.eup %2523  ;;  %1238 = vmatmul.bf16.gmra.mxu1 %v1135_v51  ;;  %v1141_v30 = vpack.c.bf16 %v2522_v63, %v3631_v53 }
 0x284   : >> { %1093 = vadd.xlane.f32.xlu2 %v1092_v36  ;;  %v1080_v41 = vadd.f32 %v2524_v24, %v2522_v63  ;;  %v1142_v32 = vpack.c.bf16 %v2524_v24, %v3635_v19 }
 0x285   : >> { %1312 = vmatmul.bf16.gmra.mxu3 %v1130_v50  ;;  %1248 = vmatmul.bf16.gmra.mxu2 %v1139_v33 }
 0x286   : >> { %1087 = vadd.xlane.f32.xlu0 %v1086_v9  ;;  %1081 = vadd.xlane.f32.xlu1 %v1080_v41 }
 0x287   : >> { %v2526_v48 = vpop.eup %2525 }
 0x288   : >> { %v3664_v10 = vpop.eup %2527 }
 0x289   : >> { %v1146_v49 = vpack.c.bf16 %v3646_v38, %v3664_v10  ;;  %v1089_v31 = vadd.f32 %v3664_v10, %v2526_v48  ;;  %v4162_v38 = vld [vmem:[#allocation46_spill] sm:$0xff]  ;;  %v4163_v10 = vld [vmem:[#allocation45_spill] sm:$0xff] }
 0x28c   : >> { %1102 = vadd.xlane.f32.xlu2 %v3450_v44 }
 0x28e   : >> { %1096 = vadd.xlane.f32.xlu0 %v3434_v25  ;;  %1090 = vadd.xlane.f32.xlu1 %v1089_v31  ;;  %v4161_v25 = vld [vmem:[#allocation40_spill] sm:$0xff] }
 0x294   : >> { %1111 = vadd.xlane.f32.xlu2 %v3473_v23  ;;  %v3675_v26 = vpop.f32.mrf.mxu3  ;;  %v1143_v23 = vpack.c.bf16 %v2518_v55, %v3624_v34 }
 0x295   : >> { %1317 = vmatmul.bf16.gmra.mxu3 %v1132_v6  ;;  %1253 = vmatmul.bf16.gmra.mxu2 %v1141_v30 }
 0x296   : >> { %1105 = vadd.xlane.f32.xlu0 %v3457_v17  ;;  %1099 = vadd.xlane.f32.xlu1 %v4160_v8 }
 0x29c   : >> { %1120 = vadd.xlane.f32.xlu2 %v3507_v28  ;;  %v3680_v44 = vpop.f32.mrf.mxu3  ;;  %v1145_v28 = vpack.c.bf16 %v2514_v3, %v2526_v48 }
 0x29e   : >> { %1114 = vadd.xlane.f32.xlu0 %v3482_v15  ;;  %1108 = vadd.xlane.f32.xlu1 %v4161_v25 }
 0x2a4   : >> { %v3687_v47 = vpop.f32.mrf.mxu3 }
 0x2a5   : >> { %1322 = vmatmul.bf16.gmra.mxu3 %v1134_v42  ;;  %1258 = vmatmul.bf16.gmra.mxu2 %v1143_v23 }
 0x2a6   : >> { %1123 = vadd.xlane.f32.xlu0 %v3533_v39  ;;  %1117 = vadd.xlane.f32.xlu1 %v3491_v22 }
 0x2ac   : >> { %v3691_v17 = vpop.f32.mrf.mxu3 }
 0x2b4   : >> { %v3693_v53 = vpop.f32.mrf.mxu3 }
 0x2b5   : >> { %1263 = vmatmul.bf16.gmra.mxu2 %v1145_v28  ;;  %1327 = vmatmul.bf16.gmra.mxu3 %v1136_v46 }
 0x2bc   : >> { %v3698_v15 = vpop.f32.mrf.mxu3 }
 0x2bd   : >> { %v1031_v57 = vpop.xlane.xlu2 %1030 }
 0x2be   : >> { %2529 = vrcp.f32 %v1031_v57 }
 0x2c4   : >> { %v3700_v54 = vpop.f32.mrf.mxu3 }
 0x2c5   : >> { %1332 = vmatmul.bf16.gmra.mxu3 %v1138_v11  ;;  %v2530_v11 = vpop.eup %2529  ;;  %v1040_v40 = vpop.xlane.xlu2 %1039 }
 0x2c7   : >> { %v1034_v7 = vpop.xlane.xlu0 %1033 }
 0x2c8   : >> { %2531 = vrcp.f32 %v1034_v7 }
 0x2c9   : >> { %2533 = vrcp.f32 %v1040_v40 }
 0x2cc   : >> { %v3705_v39 = vpop.f32.mrf.mxu3 }
 0x2cd   : >> { %v1049_v30 = vpop.xlane.xlu2 %1048 }
 0x2ce   : >> { %v2532_v27 = vpop.eup %2531 }
 0x2cf   : >> { %v2534_v56 = vpop.eup %2533  ;;  %v1043_v63 = vpop.xlane.xlu0 %1042 }
 0x2d0   : >> { %v1214_v45 = vpop.f32.mrf.mxu0 }
 0x2d5   : >> { %1337 = vmatmul.bf16.gmra.mxu3 %v1140_v35  ;;  %v1037_v35 = vpop.xlane.xlu1 %1036 }
 0x2d6   : >> { %2535 = vrcp.f32 %v1037_v35 }
 0x2d7   : >> { %2537 = vrcp.f32 %v1043_v63  ;;  %v1052_v23 = vpop.xlane.xlu0 %1051 }
 0x2d8   : >> { %v3710_v22 = vpop.f32.mrf.mxu3  ;;  %v1216_v52 = vpop.f32.mrf.mxu0 }
 0x2dc   : >> { %v2536_v55 = vpop.eup %2535 }
 0x2e0   : >> { %v3712_v34 = vpop.f32.mrf.mxu3  ;;  %v1219_v4 = vpop.f32.mrf.mxu0 }
 0x2e1   : >> { %v1229_v24 = vpop.f32.mrf.mxu1 }
 0x2e5   : >> { %1342 = vmatmul.bf16.gmra.mxu3 %v1142_v32  ;;  %v2538_v32 = vpop.eup %2537 }
 0x2e8   : >> { %v1303_v46 = vpop.f32.mrf.mxu3  ;;  %v1221_v37 = vpop.f32.mrf.mxu0 }
 0x2e9   : >> { %v1304_v62 = vadd.f32 %v1303_v46, %v1214_v45  ;;  %v1231_v8 = vpop.f32.mrf.mxu1 }
 0x2eb   : >> { %v1383_v13 = vmul.f32 %v2530_v11, %v1304_v62 }
 0x2f0   : >> { %v1305_v43 = vpop.f32.mrf.mxu3  ;;  %v1224_v60 = vpop.f32.mrf.mxu0 }
 0x2f1   : >> { %v1306_v19 = vadd.f32 %v1305_v43, %v1216_v52  ;;  %v1234_v52 = vpop.f32.mrf.mxu1 }
 0x2f3   : >> { %v1384_v2 = vmul.f32 %v2532_v27, %v1306_v19  ;;  %v4165_v19 = vld [vmem:[#allocation49_spill] sm:$0xff]  ;;  %v4166_v27 = vld [vmem:[#allocation48_spill] sm:$0xff] }
 0x2f5   : >> { %v1415_v29 = vpack.c.bf16 %v1384_v2, %v1383_v13  ;;  %1347 = vmatmul.bf16.gmra.mxu3 %v1144_v18  ;;  %v1046_v18 = vpop.xlane.xlu1 %1045  ;;  %v1058_v2 = vpop.xlane.xlu2 %1057 }
 0x2f6   : >> { %2539 = vrcp.f32 %v1046_v18 }
 0x2f7   : >> { %1972 = vmatmul.msk.bf16.vlgmr.msrb.gmra.mxu2 %vm466_vm0, %v1415_v29  ;;  %2541 = vrcp.f32 %v1049_v30 }
 0x2f8   : >> { %v1308_v1 = vpop.f32.mrf.mxu3  ;;  %v1226_v33 = vpop.f32.mrf.mxu0  ;;  %2543 = vrcp.f32 %v1052_v23 }
 0x2f9   : >> { %v1309_v0 = vadd.f32 %v1308_v1, %v1219_v4  ;;  %v1244_v25 = vpop.f32.mrf.mxu2  ;;  %v4167_v4 = vpack.c.bf16 %v4165_v19, %v4166_v27  ;;  %2545 = vrcp.f32 %v1058_v2  ;;  %v1236_v1 = vpop.f32.mrf.mxu1 }
 0x2fb   : >> { %v1385_v36 = vmul.f32 %v2536_v55, %v1309_v0 }
 0x2fc   : >> { %v2540_v48 = vpop.eup %2539 }
 0x2fd   : >> { %v2542_v57 = vpop.eup %2541  ;;  %v1055_v40 = vpop.xlane.xlu1 %1054 }
 0x2fe   : >> { %v2544_v7 = vpop.eup %2543  ;;  %2547 = vrcp.f32 %v1055_v40 }
 0x300   : >> { %v1310_v3 = vpop.f32.mrf.mxu3 }
 0x301   : >> { %v1311_v5 = vadd.f32 %v1310_v3, %v1221_v37  ;;  %v1246_v62 = vpop.f32.mrf.mxu2  ;;  %v2546_v3 = vpop.eup %2545 }
 0x303   : >> { %v1386_v51 = vmul.f32 %v2534_v56, %v1311_v5 }
 0x304   : >> { %v2548_v5 = vpop.eup %2547 }
 0x305   : >> { %1352 = vmatmul.bf16.gmra.mxu3 %v1146_v49  ;;  %v1416_v21 = vpack.c.bf16 %v1386_v51, %v1385_v36  ;;  %v4164_v49 = vpack.c.bf16 %v4162_v38, %v4163_v10  ;;  %v1239_v51 = vpop.f32.mrf.mxu1 }
 0x307   : >> { %1973 = vmatmul.msk.bf16.gmra.mxu2 %vm466_vm0, %v1416_v21  ;;  %v4168_v21 = vld [vmem:[#allocation41_spill] sm:$0xff] }
 0x308   : >> { %v1313_v9 = vpop.f32.mrf.mxu3 }
 0x309   : >> { %v1314_v50 = vadd.f32 %v1313_v9, %v1224_v60  ;;  %v1249_v35 = vpop.f32.mrf.mxu2  ;;  %v4169_v60 = vld [vmem:[#allocation39_spill] sm:$0xff] }
 0x30a   : >> { %v4170_v63 = vpack.c.bf16 %v4168_v21, %v4169_v60 }
 0x30b   : >> { %v1387_v16 = vmul.f32 %v2538_v32, %v1314_v50 }
 0x310   : >> { %v1315_v41 = vpop.f32.mrf.mxu3 }
 0x311   : >> { %v1316_v12 = vadd.f32 %v1315_v41, %v1226_v33  ;;  %v1251_v18 = vpop.f32.mrf.mxu2  ;;  %v1064_v33 = vpop.xlane.xlu1 %1063 }
 0x312   : >> { %v1241_v41 = vpop.f32.mrf.mxu1 }
 0x313   : >> { %v1388_v31 = vmul.f32 %v2540_v48, %v1316_v12 }
 0x315   : >> { %1357 = vmatmul.bf16.gmra.mxu3 %v4164_v49  ;;  %v1417_v6 = vpack.c.bf16 %v1388_v31, %v1387_v16 }
 0x317   : >> { %1974 = vmatmul.msk.bf16.gmra.mxu2 %vm466_vm0, %v1417_v6  ;;  %v4171_v6 = vpack.c.bf16 %v3488_v20, %v3479_v58 }
 0x318   : >> { %v1318_v42 = vpop.f32.mrf.mxu3 }
 0x319   : >> { %v1319_v28 = vadd.f32 %v1318_v42, %v1229_v24  ;;  %v1061_v24 = vpop.xlane.xlu0 %1060  ;;  %v1254_v12 = vpop.f32.mrf.mxu2 }
 0x31a   : >> { %2549 = vrcp.f32 %v1061_v24 }
 0x31b   : >> { %v1389_v43 = vmul.f32 %v2542_v57, %v1319_v28  ;;  %2551 = vrcp.f32 %v1064_v33  ;;  %v4172_v33 = vld [vmem:[#allocation33_spill] sm:$0xff] }
 0x320   : >> { %v1320_v45 = vpop.f32.mrf.mxu3  ;;  %v2550_v16 = vpop.eup %2549 }
 0x321   : >> { %v1321_v46 = vadd.f32 %v1320_v45, %v1231_v8  ;;  %v2552_v38 = vpop.eup %2551  ;;  %v1067_v8 = vpop.xlane.xlu2 %1066 }
 0x322   : >> { %v1070_v23 = vpop.xlane.xlu0 %1069  ;;  %v1256_v28 = vpop.f32.mrf.mxu2  ;;  %2553 = vrcp.f32 %v1067_v8 }
 0x323   : >> { %v1390_v11 = vmul.f32 %v2544_v7, %v1321_v46  ;;  %2555 = vrcp.f32 %v1070_v23 }
 0x325   : >> { %1362 = vmatmul.bf16.gmra.mxu3 %v4167_v4  ;;  %v1418_v13 = vpack.c.bf16 %v1390_v11, %v1389_v43  ;;  %v1073_v4 = vpop.xlane.xlu1 %1072 }
 0x327   : >> { %1975 = vmatmul.msk.bf16.gmra.mxu2 %vm466_vm0, %v1418_v13 }
 0x328   : >> { %v1323_v29 = vpop.f32.mrf.mxu3 }
 0x329   : >> { %v1324_v37 = vadd.f32 %v1323_v29, %v1234_v52  ;;  %v2554_v52 = vpop.eup %2553  ;;  %v1076_v58 = vpop.xlane.xlu2 %1075 }
 0x32a   : >> { %v2556_v7 = vpop.eup %2555  ;;  %v1259_v19 = vpop.f32.mrf.mxu2  ;;  %2557 = vrcp.f32 %v1076_v58 }
 0x32b   : >> { %v1391_v55 = vmul.f32 %v2548_v5, %v1324_v37  ;;  %2559 = vrcp.f32 %v1073_v4  ;;  %v4178_v4 = vld [vmem:[#allocation30_spill] sm:$0xff] }
 0x330   : >> { %v1325_v0 = vpop.f32.mrf.mxu3 }
 0x331   : >> { %v1326_v56 = vadd.f32 %v1325_v0, %v1236_v1 }
 0x333   : >> { %v1392_v36 = vmul.f32 %v2546_v3, %v1326_v56  ;;  %v1079_v3 = vpop.xlane.xlu0 %1078 }
 0x334   : >> { %2561 = vrcp.f32 %v1079_v3 }
 0x335   : >> { %1367 = vmatmul.bf16.gmra.mxu3 %v4170_v63  ;;  %v1419_v9 = vpack.c.bf16 %v1392_v36, %v1391_v55 }
 0x337   : >> { %1976 = vmatmul.msk.bf16.gmra.mxu2 %vm466_vm0, %v1419_v9  ;;  %v1085_v9 = vpop.xlane.xlu2 %1084 }
 0x338   : >> { %v1328_v50 = vpop.f32.mrf.mxu3 }
 0x339   : >> { %v1329_v32 = vadd.f32 %v1328_v50, %v1239_v51 }
 0x33b   : >> { %v1393_v10 = vmul.f32 %v2550_v16, %v1329_v32  ;;  %v1088_v24 = vpop.xlane.xlu0 %1087 }
 0x33f   : >> { %v1094_v23 = vpop.xlane.xlu2 %1093 }
 0x340   : >> { %v1330_v48 = vpop.f32.mrf.mxu3 }
 0x341   : >> { %v1331_v31 = vadd.f32 %v1330_v48, %v1241_v41 }
 0x343   : >> { %v1394_v49 = vmul.f32 %v2552_v38, %v1331_v31 }
 0x345   : >> { %1372 = vmatmul.bf16.gmra.mxu3 %v4171_v6  ;;  %v1420_v30 = vpack.c.bf16 %v1394_v49, %v1393_v10 }
 0x347   : >> { %1977 = vmatmul.msk.bf16.gmra.mxu2 %vm466_vm0, %v1420_v30  ;;  %v4174_v30 = vld [vmem:[#allocation32_spill] sm:$0xff] }
 0x348   : >> { %v1333_v42 = vpop.f32.mrf.mxu3 }
 0x349   : >> { %v1334_v45 = vadd.f32 %v1333_v42, %v1244_v25  ;;  %v1261_v25 = vpop.f32.mrf.mxu2 }
 0x34b   : >> { %v1395_v43 = vmul.f32 %v2554_v52, %v1334_v45 }
 0x350   : >> { %v1335_v57 = vpop.f32.mrf.mxu3 }
 0x351   : >> { %v1336_v46 = vadd.f32 %v1335_v57, %v1246_v62  ;;  %v2558_v62 = vpop.eup %2557  ;;  %v1264_v59 = vpop.f32.mrf.mxu2 }
 0x352   : >> { %v2560_v40 = vpop.eup %2559 }
 0x353   : >> { %v1396_v11 = vmul.f32 %v2556_v7, %v1336_v46  ;;  %v2562_v55 = vpop.eup %2561 }
 0x355   : >> { %1377 = vmatmul.bf16.gmra.mxu3 %v1156_v61  ;;  %v1421_v20 = vpack.c.bf16 %v1396_v11, %v1395_v43  ;;  %v1082_v61 = vpop.xlane.xlu1 %1081 }
 0x356   : >> { %2563 = vrcp.f32 %v1082_v61 }
 0x357   : >> { %1978 = vmatmul.msk.bf16.gmra.mxu2 %vm466_vm0, %v1421_v20  ;;  %2565 = vrcp.f32 %v1085_v9 }
 0x358   : >> { %v1338_v27 = vpop.f32.mrf.mxu3  ;;  %2567 = vrcp.f32 %v1088_v24 }
 0x359   : >> { %v1339_v13 = vadd.f32 %v1338_v27, %v1249_v35  ;;  %v1266_v51 = vpop.f32.mrf.mxu2  ;;  %2569 = vrcp.f32 %v1094_v23 }
 0x35b   : >> { %v1397_v1 = vmul.f32 %v2560_v40, %v1339_v13  ;;  %v1097_v13 = vpop.xlane.xlu0 %1096 }
 0x35c   : >> { %v2564_v35 = vpop.eup %2563 }
 0x35d   : >> { %v2566_v48 = vpop.eup %2565  ;;  %v1091_v45 = vpop.xlane.xlu1 %1090 }
 0x35e   : >> { %v2568_v38 = vpop.eup %2567  ;;  %2571 = vrcp.f32 %v1091_v45 }
 0x35f   : >> { %v2570_v43 = vpop.eup %2569  ;;  %2573 = vrcp.f32 %v1097_v13 }
 0x360   : >> { %v1340_v2 = vpop.f32.mrf.mxu3 }
 0x361   : >> { %v1341_v29 = vadd.f32 %v1340_v2, %v1251_v18 }
 0x363   : >> { %v1398_v37 = vmul.f32 %v2558_v62, %v1341_v29 }
 0x365   : >> { %v1422_v0 = vpack.c.bf16 %v1398_v37, %v1397_v1  ;;  %v1100_v40 = vpop.xlane.xlu1 %1099 }
 0x366   : >> { %2575 = vrcp.f32 %v1100_v40 }
 0x367   : >> { %1979 = vmatmul.msk.bf16.gmra.mxu2 %vm466_vm0, %v1422_v0 }
 0x368   : >> { %v1343_v14 = vpop.f32.mrf.mxu3 }
 0x369   : >> { %v1344_v56 = vadd.f32 %v1343_v14, %v1254_v12 }
 0x36b   : >> { %v1399_v21 = vmul.f32 %v2562_v55, %v1344_v56 }
 0x370   : >> { %v1345_v5 = vpop.f32.mrf.mxu3 }
 0x371   : >> { %v1346_v36 = vadd.f32 %v1345_v5, %v1256_v28 }
 0x373   : >> { %v1400_v60 = vmul.f32 %v2564_v35, %v1346_v36  ;;  %v4182_v36 = vld [vmem:[#allocation28_spill] sm:$0xff] }
 0x375   : >> { %v1423_v63 = vpack.c.bf16 %v1400_v60, %v1399_v21  ;;  %v1103_v21 = vpop.xlane.xlu2 %1102 }
 0x376   : >> { %2577 = vrcp.f32 %v1103_v21 }
 0x377   : >> { %1980 = vmatmul.msk.bf16.gmra.mxu2 %vm466_vm0, %v1423_v63  ;;  %v1106_v63 = vpop.xlane.xlu0 %1105 }
 0x378   : >> { %v1348_v18 = vpop.f32.mrf.mxu3  ;;  %2579 = vrcp.f32 %v1106_v63 }
 0x379   : >> { %v1349_v32 = vadd.f32 %v1348_v18, %v1259_v19  ;;  %v2572_v19 = vpop.eup %2571  ;;  %v4184_v18 = vld [vmem:[#allocation27_spill] sm:$0xff] }
 0x37a   : >> { %v1494_v50 = vpop.f32.mrf.mxu2 }
 0x37b   : >> { %v3745_v31 = vadd.f32 %v4172_v33, %v1494_v50   ;;  %v1401_v49 = vmul.f32 %v2566_v48, %v1349_v32 }
 0x37d   : >> { %4173 = vst [vmem:[#allocation50_spill] sm:$0xff] %v3745_v31  ;;  %v4176_v31 = vld [vmem:[#allocation31_spill] sm:$0xff] }
 0x380   : >> { %v1350_v12 = vpop.f32.mrf.mxu3 }
 0x381   : >> { %v1351_v16 = vadd.f32 %v1350_v12, %v1261_v25 }
 0x382   : >> { %v1496_v10 = vpop.f32.mrf.mxu2 }
 0x383   : >> { %v1402_v6 = vmul.f32 %v2568_v38, %v1351_v16  ;;  %v3748_v30 = vadd.f32 %v4174_v30, %v1496_v10   ;;  %v4186_v38 = vld [vmem:[#allocation26_spill] sm:$0xff] }
 0x385   : >> { %v4175_v42 = vmov %v3748_v30  ;;  %v1424_v8 = vpack.c.bf16 %v1402_v6, %v1401_v49  ;;  %v1112_v6 = vpop.xlane.xlu2 %1111 }
 0x386   : >> { %2581 = vrcp.f32 %v1112_v6 }
 0x387   : >> { %1981 = vmatmul.msk.bf16.gmra.mxu2 %vm466_vm0, %v1424_v8  ;;  %v1109_v8 = vpop.xlane.xlu1 %1108 }
 0x388   : >> { %v1353_v28 = vpop.f32.mrf.mxu3  ;;  %2583 = vrcp.f32 %v1109_v8 }
 0x389   : >> { %v1354_v46 = vadd.f32 %v1353_v28, %v1264_v59  ;;  %v2574_v59 = vpop.eup %2573 }
 0x38a   : >> { %v1499_v57 = vpop.f32.mrf.mxu2  ;;  %v2576_v61 = vpop.eup %2575 }
 0x38b   : >> { %v3752_v29 = vadd.f32 %v4176_v31, %v1499_v57   ;;  %v1403_v58 = vmul.f32 %v2572_v19, %v1354_v46  ;;  %v2578_v33 = vpop.eup %2577  ;;  %v4190_v19 = vld [vmem:[#allocation24_spill] sm:$0xff] }
 0x38c   : >> { %v2580_v12 = vpop.eup %2579 }
 0x38d   : >> { %v4177_v52 = vmov %v3752_v29  ;;  %v4180_v29 = vld [vmem:[#allocation29_spill] sm:$0xff]  ;;  %v2582_v57 = vpop.eup %2581 }
 0x38e   : >> { %v2584_v46 = vpop.eup %2583 }
 0x38f   : >> { %v1118_v13 = vpop.xlane.xlu1 %1117 }
 0x390   : >> { %v1355_v7 = vpop.f32.mrf.mxu3 }
 0x391   : >> { %v1356_v11 = vadd.f32 %v1355_v7, %v1266_v51 }
 0x392   : >> { %v1501_v20 = vpop.f32.mrf.mxu2 }
 0x393   : >> { %v1404_v27 = vmul.f32 %v2570_v43, %v1356_v11  ;;  %v3755_v28 = vadd.f32 %v4178_v4, %v1501_v20   ;;  %v1115_v4 = vpop.xlane.xlu0 %1114 }
 0x394   : >> { %2585 = vrcp.f32 %v1115_v4 }
 0x395   : >> { %v4179_v62 = vmov %v3755_v28  ;;  %v1425_v25 = vpack.c.bf16 %v1404_v27, %v1403_v58  ;;  %2587 = vrcp.f32 %v1118_v13 }
 0x397   : >> { %1982 = vmatmul.msk.bf16.gmra.mxu2 %vm466_vm0, %v1425_v25 }
 0x398   : >> { %v1358_v2 = vpop.f32.mrf.mxu3 }
 0x399   : >> { %v1359_v0 = vadd.f32 %v1358_v2, %v3675_v26 }
 0x39a   : >> { %v1504_v1 = vpop.f32.mrf.mxu2 }
 0x39b   : >> { %v3759_v27 = vadd.f32 %v4180_v29, %v1504_v1   ;;  %v1405_v5 = vmul.f32 %v2574_v59, %v1359_v0  ;;  %v2586_v29 = vpop.eup %2585 }
 0x39d   : >> { %v4181_v37 = vmov %v3759_v27 }
 0x3a0   : >> { %v1360_v3 = vpop.f32.mrf.mxu3 }
 0x3a1   : >> { %v1361_v14 = vadd.f32 %v1360_v3, %v3680_v44  ;;  %v2588_v3 = vpop.eup %2587 }
 0x3a2   : >> { %v1506_v56 = vpop.f32.mrf.mxu2 }
 0x3a3   : >> { %v1406_v55 = vmul.f32 %v2576_v61, %v1361_v14  ;;  %v3764_v26 = vadd.f32 %v4182_v36, %v1506_v56   ;;  %v4194_v56 = vld [vmem:[#allocation22_spill] sm:$0xff]  ;;  %v1121_v36 = vpop.xlane.xlu2 %1120 }
 0x3a4   : >> { %2589 = vrcp.f32 %v1121_v36 }
 0x3a5   : >> { %v4183_v35 = vmov %v3764_v26  ;;  %v1426_v51 = vpack.c.bf16 %v1406_v55, %v1405_v5 }
 0x3a7   : >> { %1983 = vmatmul.msk.bf16.gmra.mxu2 %vm466_vm0, %v1426_v51 }
 0x3a8   : >> { %v1363_v60 = vpop.f32.mrf.mxu3 }
 0x3a9   : >> { %v1364_v44 = vadd.f32 %v1363_v60, %v3687_v47  ;;  %v4188_v47 = vld [vmem:[#allocation25_spill] sm:$0xff] }
 0x3aa   : >> { %v1509_v9 = vpop.f32.mrf.mxu2 }
 0x3ab   : >> { %v3768_v25 = vadd.f32 %v4184_v18, %v1509_v9   ;;  %v1407_v48 = vmul.f32 %v2578_v33, %v1364_v44  ;;  %v2590_v18 = vpop.eup %2589 }
 0x3ad   : >> { %v4185_v50 = vmov %v3768_v25 }
 0x3b0   : >> { %v1365_v24 = vpop.f32.mrf.mxu3 }
 0x3b1   : >> { %v1366_v32 = vadd.f32 %v1365_v24, %v3691_v17 }
 0x3b2   : >> { %v1511_v26 = vpop.f32.mrf.mxu2 }
 0x3b3   : >> { %v1408_v16 = vmul.f32 %v2580_v12, %v1366_v32  ;;  %v3773_v24 = vadd.f32 %v4186_v38, %v1511_v26   ;;  %v4198_v26 = vld [vmem:[#allocation20_spill] sm:$0xff] }
 0x3b5   : >> { %v4187_v49 = vmov %v3773_v24  ;;  %v1427_v10 = vpack.c.bf16 %v1408_v16, %v1407_v48 }
 0x3b7   : >> { %1984 = vmatmul.msk.bf16.gmra.mxu2 %vm466_vm0, %v1427_v10  ;;  %v4200_v10 = vld [vmem:[#allocation19_spill] sm:$0xff] }
 0x3b8   : >> { %v1368_v30 = vpop.f32.mrf.mxu3 }
 0x3b9   : >> { %v1369_v17 = vadd.f32 %v1368_v30, %v3693_v53  ;;  %v4192_v53 = vld [vmem:[#allocation23_spill] sm:$0xff] }
 0x3ba   : >> { %v1514_v23 = vpop.f32.mrf.mxu2 }
 0x3bb   : >> { %v3777_v23 = vadd.f32 %v4188_v47, %v1514_v23   ;;  %v1409_v43 = vmul.f32 %v2584_v46, %v1369_v17 }
 0x3bd   : >> { %v4189_v45 = vmov %v3777_v23  ;;  %v4206_v23 = vld [vmem:[#allocation16_spill] sm:$0xff] }
 0x3c0   : >> { %v1370_v28 = vpop.f32.mrf.mxu3 }
 0x3c1   : >> { %v1371_v31 = vadd.f32 %v1370_v28, %v3698_v15 }
 0x3c2   : >> { %v1516_v7 = vpop.f32.mrf.mxu2 }
 0x3c3   : >> { %v1410_v11 = vmul.f32 %v2582_v57, %v1371_v31  ;;  %v3782_v20 = vadd.f32 %v4190_v19, %v1516_v7   ;;  %v4208_v31 = vld [vmem:[#allocation15_spill] sm:$0xff] }
 0x3c5   : >> { %v4191_v58 = vmov %v3782_v20  ;;  %v1428_v27 = vpack.c.bf16 %v1410_v11, %v1409_v43  ;;  %v4210_v11 = vld [vmem:[#allocation14_spill] sm:$0xff] }
 0x3c7   : >> { %1985 = vmatmul.msk.bf16.gmra.mxu2 %vm466_vm0, %v1428_v27  ;;  %v4214_v27 = vld [vmem:[#allocation12_spill] sm:$0xff] }
 0x3c8   : >> { %v1373_v25 = vpop.f32.mrf.mxu3 }
 0x3c9   : >> { %v1374_v15 = vadd.f32 %v1373_v25, %v3700_v54  ;;  %v4196_v54 = vld [vmem:[#allocation21_spill] sm:$0xff]  ;;  %v4216_v25 = vld [vmem:[#allocation11_spill] sm:$0xff] }
 0x3ca   : >> { %v1519_v2 = vpop.f32.mrf.mxu2 }
 0x3cb   : >> { %v3786_v21 = vadd.f32 %v4192_v53, %v1519_v2   ;;  %v1411_v14 = vmul.f32 %v2586_v29, %v1374_v15 }
 0x3cd   : >> { %v4193_v40 = vmov %v3786_v21  ;;  %v1124_v21 = vpop.xlane.xlu0 %1123 }
 0x3ce   : >> { %2591 = vrcp.f32 %v1124_v21 }
 0x3d0   : >> { %v1375_v1 = vpop.f32.mrf.mxu3 }
 0x3d1   : >> { %v1376_v0 = vadd.f32 %v1375_v1, %v3705_v39  ;;  %v4220_v1 = vld [vmem:[#allocation9_spill] sm:$0xff] }
 0x3d2   : >> { %v1521_v59 = vpop.f32.mrf.mxu2 }
 0x3d3   : >> { %v1412_v61 = vmul.f32 %v2588_v3, %v1376_v0  ;;  %v3791_v20 = vadd.f32 %v4194_v56, %v1521_v59   ;;  %v4222_v0 = vld [vmem:[#allocation8_spill] sm:$0xff] }
 0x3d4   : >> { %v2592_v24 = vpop.eup %2591 }
 0x3d5   : >> { %v4195_v55 = vmov %v3791_v20  ;;  %v1429_v5 = vpack.c.bf16 %v1412_v61, %v1411_v14 }
 0x3d7   : >> { %1986 = vmatmul.msk.bf16.gmra.mxu2 %vm466_vm0, %v1429_v5 }
 0x3d8   : >> { %v1378_v51 = vpop.f32.mrf.mxu3 }
 0x3d9   : >> { %v1379_v39 = vadd.f32 %v1378_v51, %v3710_v22  ;;  %v4202_v22 = vld [vmem:[#allocation18_spill] sm:$0xff] }
 0x3da   : >> { %v1524_v60 = vpop.f32.mrf.mxu2 }
 0x3db   : >> { %v3795_v19 = vadd.f32 %v4196_v54, %v1524_v60   ;;  %v1413_v32 = vmul.f32 %v2590_v18, %v1379_v39 }
 0x3dd   : >> { %v4197_v63 = vmov %v3795_v19  ;;  %v4212_v19 = vld [vmem:[#allocation13_spill] sm:$0xff] }
 0x3e0   : >> { %v1380_v9 = vpop.f32.mrf.mxu3 }
 0x3e1   : >> { %v1381_v44 = vadd.f32 %v1380_v9, %v3712_v34  ;;  %v4204_v34 = vld [vmem:[#allocation17_spill] sm:$0xff] }
 0x3e2   : >> { %v1526_v33 = vpop.f32.mrf.mxu2 }
 0x3e3   : >> { %v1414_v12 = vmul.f32 %v2592_v24, %v1381_v44  ;;  %v3800_v18 = vadd.f32 %v4198_v26, %v1526_v33   ;;  %v4228_v24 = vld [vmem:[#allocation5_spill] sm:$0xff] }
 0x3e5   : >> { %v4199_v48 = vmov %v3800_v18  ;;  %v1430_v16 = vpack.c.bf16 %v1414_v12, %v1413_v32  ;;  %v4226_v18 = vld [vmem:[#allocation6_spill] sm:$0xff] }
 0x3e7   : >> { %1987 = vmatmul.msk.bf16.gmra.mxu2 %vm466_vm0, %v1430_v16 }
 0x3ea   : >> { %v1529_v38 = vpop.f32.mrf.mxu2 }
 0x3eb   : >> { %v3804_v17 = vadd.f32 %v4200_v10, %v1529_v38  }
 0x3ed   : >> { %v4201_v47 = vmov %v3804_v17 }
 0x3f2   : >> { %v1531_v6 = vpop.f32.mrf.mxu2 }
 0x3f3   : >> { %v3807_v16 = vadd.f32 %v4202_v22, %v1531_v6   ;;  %v4265_v22 = vmov %v4191_v58 }
 0x3f5   : >> { %v4203_v57 = vmov %v3807_v16  ;;  %v4233_v16 = vld [vmem:[#allocation3_spill] sm:$0xff] }
 0x3fa   : >> { %v1534_v30 = vpop.f32.mrf.mxu2 }
 0x3fb   : >> { %v3810_v15 = vadd.f32 %v4204_v34, %v1534_v30   ;;  %v4273_v30 = vmov %v4175_v42 }
 0x3fd   : >> { %v4205_v46 = vmov %v3810_v15  ;;  %v4218_v15 = vld [vmem:[#allocation10_spill] sm:$0xff] }
 0x402   : >> { %v1536_v8 = vpop.f32.mrf.mxu2 }
 0x403   : >> { %v3813_v14 = vadd.f32 %v4206_v23, %v1536_v8   ;;  %v4266_v23 = vmov %v4189_v45 }
 0x405   : >> { %v4207_v43 = vmov %v3813_v14  ;;  %v4224_v14 = vld [vmem:[#allocation7_spill] sm:$0xff] }
 0x40a   : >> { %v1539_v28 = vpop.f32.mrf.mxu2 }
 0x40b   : >> { %v3816_v13 = vadd.f32 %v4208_v31, %v1539_v28   ;;  %v4271_v28 = vmov %v4179_v62  ;;  %v4274_v31 = vld [vmem:[#allocation50_spill] sm:$0xff] }
 0x40d   : >> { %v4209_v53 = vmov %v3816_v13 }
 0x412   : >> { %v1541_v7 = vpop.f32.mrf.mxu2 }
 0x413   : >> { %v3819_v12 = vadd.f32 %v4210_v11, %v1541_v7  }
 0x415   : >> { %v4211_v59 = vmov %v3819_v12  ;;  %v4230_v12 = vld [vmem:[#allocation4_spill] sm:$0xff] }
 0x41a   : >> { %v1544_v17 = vpop.f32.mrf.mxu2 }
 0x41b   : >> { %v3822_v11 = vadd.f32 %v4212_v19, %v1544_v17   ;;  %v4260_v17 = vmov %v4201_v47  ;;  %v4262_v19 = vmov %v4197_v63 }
 0x41d   : >> { %v4213_v61 = vmov %v3822_v11 }
 0x41e   : >> { %v4254_v11 = vmov %v4213_v61 }
 0x422   : >> { %v1546_v20 = vpop.f32.mrf.mxu2 }
 0x423   : >> { %v3825_v10 = vadd.f32 %v4214_v27, %v1546_v20   ;;  %v4263_v20 = vmov %v4195_v55  ;;  %v4270_v27 = vmov %v4181_v37 }
 0x425   : >> { %v4215_v56 = vmov %v3825_v10 }
 0x42a   : >> { %v1549_v4 = vpop.f32.mrf.mxu2 }
 0x42b   : >> { %v3828_v9 = vadd.f32 %v4216_v25, %v1549_v4   ;;  %v4268_v25 = vmov %v4185_v50 }
 0x42d   : >> { %v4217_v36 = vmov %v3828_v9 }
 0x432   : >> { %v1551_v2 = vpop.f32.mrf.mxu2 }
 0x433   : >> { %v3831_v8 = vadd.f32 %v4218_v15, %v1551_v2   ;;  %v4258_v15 = vmov %v4205_v46 }
 0x435   : >> { %v4219_v51 = vmov %v3831_v8 }
 0x436   : >> { %v4251_v8 = vmov %v4219_v51 }
 0x43a   : >> { %v1554_v13 = vpop.f32.mrf.mxu2 }
 0x43b   : >> { %v3834_v7 = vadd.f32 %v4220_v1, %v1554_v13   ;;  %v4256_v13 = vmov %v4209_v53 }
 0x43d   : >> { %v4221_v60 = vmov %v3834_v7 }
 0x43e   : >> { %v4250_v7 = vmov %v4221_v60 }
 0x442   : >> { %v1556_v29 = vpop.f32.mrf.mxu2 }
 0x443   : >> { %v3837_v6 = vadd.f32 %v4222_v0, %v1556_v29   ;;  %v4272_v29 = vmov %v4177_v52 }
 0x445   : >> { %v4223_v54 = vmov %v3837_v6  ;;  %v4236_v6 = vld [vmem:[#allocation2_spill] sm:$0xff] }
 0x44a   : >> { %v1559_v3 = vpop.f32.mrf.mxu2 }
 0x44b   : >> { %v3840_v5 = vadd.f32 %v4224_v14, %v1559_v3   ;;  %v4257_v14 = vmov %v4207_v43 }
 0x44d   : >> { %v4225_v39 = vmov %v3840_v5 }
 0x44e   : >> { %v4248_v5 = vmov %v4225_v39 }
 0x452   : >> { %v1561_v21 = vpop.f32.mrf.mxu2 }
 0x453   : >> { %v3843_v4 = vadd.f32 %v4226_v18, %v1561_v21   ;;  %v4261_v18 = vmov %v4199_v48  ;;  %v4264_v21 = vmov %v4193_v40 }
 0x455   : >> { %v4227_v44 = vmov %v3843_v4 }
 0x456   : >> { %v4247_v4 = vmov %v4227_v44 }
 0x45a   : >> { %v1564_v9 = vpop.f32.mrf.mxu2 }
 0x45b   : >> { %v3846_v3 = vadd.f32 %v4228_v24, %v1564_v9   ;;  %v4252_v9 = vmov %v4217_v36  ;;  %v4267_v24 = vmov %v4187_v49 }
 0x45d   : >> { %v4229_v33 = vmov %v3846_v3 }
 0x45e   : >> { %v4246_v3 = vmov %v4229_v33 }
 0x462   : >> { %v1566_v32 = vpop.f32.mrf.mxu2 }
 0x463   : >> { %v3849_v2 = vadd.f32 %v4230_v12, %v1566_v32   ;;  %v4255_v12 = vmov %v4211_v59  ;;  %v2593_v32 = vld [vmem:[%s4076_s2] ss:$0 sm:$0xff] (%p3860_p5) }
 0x464   : > { %v1611_v31 = vadd.f32 (%p3860_p5), %v2593_v32, %v4175_v42  ;;  %v1613_v5 = vadd.f32 (%p3860_p5), %v2593_v32, %v4179_v62  ;;  %v1614_v22 = vadd.f32 (%p3860_p5), %v2593_v32, %v4181_v37  ;;  %v1615_v30 = vadd.f32 (%p3860_p5), %v2593_v32, %v4183_v35 }
 0x465   : >> { %4231 = vst [vmem:[#allocation51_spill] sm:$0xff] %v3849_v2  ;;  %v4244_v38 = vmov %v3849_v2  ;;  %v1617_v42 = vadd.f32 (%p3860_p5), %v2593_v32, %v4187_v49  ;;  %v1619_v62 = vadd.f32 (%p3860_p5), %v2593_v32, %v4191_v58  ;;  %v1620_v37 = vadd.f32 (%p3860_p5), %v2593_v32, %v4193_v40 }
 0x466   : >> { %v4245_v2 = vmov %v4244_v38  ;;  %v1612_v38 = vadd.f32 (%p3860_p5), %v2593_v32, %v4177_v52  ;;  %1644 = vst.msk [vmem:[%s2928_s22 + $0x8] sm:$0xff] (%p3860_p5), %vm1642_vm2, %v1611_v31  ;;  %v1618_v52 = vadd.f32 (%p3860_p5), %v2593_v32, %v4189_v45  ;;  %v1623_v49 = vadd.f32 (%p3860_p5), %v2593_v32, %v4199_v48 }
 0x467   : > { %1646 = vst.msk [vmem:[%s2928_s22 + $0x18] sm:$0xff] (%p3860_p5), %vm1642_vm2, %v1613_v5  ;;  %v1624_v45 = vadd.f32 (%p3860_p5), %v2593_v32, %v4201_v47  ;;  %v1625_v58 = vadd.f32 (%p3860_p5), %v2593_v32, %v4203_v57  ;;  %v1626_v40 = vadd.f32 (%p3860_p5), %v2593_v32, %v4205_v46  ;;  %v1629_v48 = vadd.f32 (%p3860_p5), %v2593_v32, %v4211_v59 }
 0x468   : > { %1645 = vst.msk [vmem:[%s2928_s22 + $0x10] sm:$0xff] (%p3860_p5), %vm1642_vm2, %v1612_v38  ;;  %v1630_v47 = vadd.f32 (%p3860_p5), %v2593_v32, %v4213_v61  ;;  %v1632_v46 = vadd.f32 (%p3860_p5), %v2593_v32, %v4217_v36  ;;  %v1633_v8 = vadd.f32 (%p3860_p5), %v2593_v32, %v4219_v51  ;;  %v1634_v23 = vadd.f32 (%p3860_p5), %v2593_v32, %v4221_v60 }
 0x469   : > { %1647 = vst.msk [vmem:[%s2928_s22 + $0x20] sm:$0xff] (%p3860_p5), %vm1642_vm2, %v1614_v22  ;;  %v1636_v28 = vadd.f32 (%p3860_p5), %v2593_v32, %v4225_v39  ;;  %v1638_v7 = vadd.f32 (%p3860_p5), %v2593_v32, %v4229_v33 }
 0x46a   : >> { %v1569_v26 = vpop.f32.mrf.mxu2  ;;  %1648 = vst.msk [vmem:[%s2928_s22 + $0x28] sm:$0xff] (%p3860_p5), %vm1642_vm2, %v1615_v30 }
 0x46b   : >> { %v3852_v1 = vadd.f32 %v4233_v16, %v1569_v26   ;;  %v4259_v16 = vmov %v4203_v57  ;;  %v4269_v26 = vmov %v4183_v35  ;;  %1650 = vst.msk [vmem:[%s2928_s22 + $0x38] sm:$0xff] (%p3860_p5), %vm1642_vm2, %v1617_v42  ;;  %v1621_v35 = vadd.f32 (%p3860_p5), %v2593_v32, %v4195_v55 }
 0x46c   : > { %1651 = vst.msk [vmem:[%s2928_s22 + $0x40] sm:$0xff] (%p3860_p5), %vm1642_vm2, %v1618_v52  ;;  %v1627_v55 = vadd.f32 (%p3860_p5), %v2593_v32, %v4207_v43  ;;  %v1631_v57 = vadd.f32 (%p3860_p5), %v2593_v32, %v4215_v56  ;;  %v1635_v43 = vadd.f32 (%p3860_p5), %v2593_v32, %v4223_v54  ;;  %v4277_v11 = vld [vmem:[#allocation51_spill] sm:$0xff] (%p3860_p5) }
 0x46d   : >> { %4234 = vst [vmem:[#allocation52_spill] sm:$0xff] %v3852_v1  ;;  %v4242_v34 = vmov %v3852_v1  ;;  %v1639_v59 = vadd.f32 (%p3860_p5), %v2593_v32, %v4277_v11 }
 0x46e   : >> { %v4243_v1 = vmov %v4242_v34  ;;  %1652 = vst.msk [vmem:[%s2928_s22 + $0x48] sm:$0xff] (%p3860_p5), %vm1642_vm2, %v1619_v62 }
 0x46f   : > { %1653 = vst.msk [vmem:[%s2928_s22 + $0x50] sm:$0xff] (%p3860_p5), %vm1642_vm2, %v1620_v37 }
 0x470   : > { %1654 = vst.msk [vmem:[%s2928_s22 + $0x58] sm:$0xff] (%p3860_p5), %vm1642_vm2, %v1621_v35 }
 0x471   : > { %1656 = vst.msk [vmem:[%s2928_s22 + $0x68] sm:$0xff] (%p3860_p5), %vm1642_vm2, %v1623_v49 }
 0x472   : >> { %v1571_v10 = vpop.f32.mrf.mxu2  ;;  %200 = sbr.rel (!%p3860_p5) target bundleno = 20 (0x14), region = 72  ;;  %1657 = vst.msk [vmem:[%s2928_s22 + $0x70] sm:$0xff] (%p3860_p5), %vm1642_vm2, %v1624_v45 }
 0x473   : >> { %v3855_v0 = vadd.f32 %v4236_v6, %v1571_v10   ;;  %v4249_v6 = vmov %v4223_v54  ;;  %v4253_v10 = vmov %v4215_v56  ;;  %1658 = vst.msk [vmem:[%s2928_s22 + $0x78] sm:$0xff] (%p3860_p5), %vm1642_vm2, %v1625_v58 }
 0x474   : > { %1659 = vst.msk [vmem:[%s2928_s22 + $0x80] sm:$0xff] (%p3860_p5), %vm1642_vm2, %v1626_v40  ;;  %v4278_v17 = vld [vmem:[#allocation52_spill] sm:$0xff] (%p3860_p5) }
 0x475   : >> { %4237 = vst [vmem:[#allocation53_spill] sm:$0xff] %v3855_v0  ;;  %v4240_v41 = vmov %v3855_v0  ;;  %v1640_v19 = vadd.f32 (%p3860_p5), %v2593_v32, %v4278_v17 }
 0x476   : >> { %v4241_v0 = vmov %v4240_v41  ;;  %v4276_v41 = vld [vmem:[#allocation50_spill] sm:$0xff] (%p3860_p5)  ;;  %1660 = vst.msk [vmem:[%s2928_s22 + $0x88] sm:$0xff] (%p3860_p5), %vm1642_vm2, %v1627_v55 }
 0x477   : > { %v1610_v34 = vadd.f32 %v2593_v32, %v4276_v41  ;;  %v1616_v41 = vadd.f32 %v2593_v32, %v4185_v50  ;;  %v1622_v50 = vadd.f32 %v2593_v32, %v4197_v63  ;;  %v1628_v63 = vadd.f32 %v2593_v32, %v4209_v53  ;;  %1662 = vst.msk [vmem:[%s2928_s22 + $0x98] sm:$0xff] %vm1642_vm2, %v1629_v48 }
 0x478   : > { %1663 = vst.msk [vmem:[%s2928_s22 + $0xa0] sm:$0xff] %vm1642_vm2, %v1630_v47  ;;  %v1637_v53 = vadd.f32 %v2593_v32, %v4227_v44 }
 0x479   : > { %1643 = vst.msk [vmem:[%s2928_s22] sm:$0xff] %vm1642_vm2, %v1610_v34 }
 0x47a   : > { %1649 = vst.msk [vmem:[%s2928_s22 + $0x30] sm:$0xff] %vm1642_vm2, %v1616_v41 }
 0x47b   : > { %1655 = vst.msk [vmem:[%s2928_s22 + $0x60] sm:$0xff] %vm1642_vm2, %v1622_v50 }
 0x47c   : > { %1661 = vst.msk [vmem:[%s2928_s22 + $0x90] sm:$0xff] %vm1642_vm2, %v1628_v63  ;;  %v4279_v61 = vld [vmem:[#allocation53_spill] sm:$0xff] }
 0x47d   : > { %1664 = vst.msk [vmem:[%s2928_s22 + $0xa8] sm:$0xff] %vm1642_vm2, %v1631_v57  ;;  %v1641_v20 = vadd.f32 %v2593_v32, %v4279_v61 }
 0x47e   : > { %1665 = vst.msk [vmem:[%s2928_s22 + $0xb0] sm:$0xff] %vm1642_vm2, %v1632_v46 }
 0x47f   : > { %1666 = vst.msk [vmem:[%s2928_s22 + $0xb8] sm:$0xff] %vm1642_vm2, %v1633_v8 }
 0x480   : > { %1667 = vst.msk [vmem:[%s2928_s22 + $0xc0] sm:$0xff] %vm1642_vm2, %v1634_v23 }
 0x481   : > { %1668 = vst.msk [vmem:[%s2928_s22 + $0xc8] sm:$0xff] %vm1642_vm2, %v1635_v43 }
 0x482   : > { %1669 = vst.msk [vmem:[%s2928_s22 + $0xd0] sm:$0xff] %vm1642_vm2, %v1636_v28 }
 0x483   : > { %1670 = vst.msk [vmem:[%s2928_s22 + $0xd8] sm:$0xff] %vm1642_vm2, %v1637_v53 }
 0x484   : > { %1671 = vst.msk [vmem:[%s2928_s22 + $0xe0] sm:$0xff] %vm1642_vm2, %v1638_v7 }
 0x485   : > { %1672 = vst.msk [vmem:[%s2928_s22 + $0xe8] sm:$0xff] %vm1642_vm2, %v1639_v59 }
 0x486   : > { %1673 = vst.msk [vmem:[%s2928_s22 + $0xf0] sm:$0xff] %vm1642_vm2, %v1640_v19 }
 0x487   : > { %1674 = vst.msk [vmem:[%s2928_s22 + $0xf8] sm:$0xff] %vm1642_vm2, %v1641_v20 }
 0x488 PF: > { %s13_s14 = sadd.s32 1, %s2748_s14   ;;  %s4280_s12 = smov %s2744_s13 }
 0x489   : > { %p10_p6 = scmp.ge.s32.totalorder %s13_s14, 4   ;;  %s4281_s13 = smov %s4283_s15 }
 0x48b   :  { %12 = sbr.rel (!%p10_p6) target bundleno = 2 (0x2), region = 83 }

</bundles_post_ra>
